<compile_context>
chip_gen: v6e
topology: v6e:2x2x1
jax: 0.10.0
libtpu: 0.0.40
codegen_flags: <defaults>
</compile_context>

<pallas_src>
import functools

import jax
import jax.numpy as jnp
from jax import lax
from jax.experimental import pallas as pl
from jax.experimental.pallas import tpu as pltpu

INPUT_SIZE = 5
IN_PAD = 8            # input features zero-padded to a sublane multiple
HIDDEN_SIZE = 64
FC_HIDDEN = 32
OUT_DIM = 2
OUT_PAD = 128         # lane-dense padded output width
MAX_T_CHUNK = 64      # max timesteps resident in VMEM per grid step


def _round_up(a, m):
    return -(-a // m) * m


def _lstm_fc_kernel(x_ref,        # (T_CHUNK, B_TILE, IN_PAD) raw inputs, zero lane-padded
                    wih0_ref,     # (IN_PAD, 4H)   layer-0 input weight (i/f/o cols pre-scaled)
                    b0_ref,       # (1, 4H)        layer-0 b_ih + b_hh   (pre-scaled)
                    whh0_ref,     # (H, 4H)        layer-0 recurrent weight (pre-scaled)
                    wih1_ref,     # (H, 4H)        layer-1 input weight (pre-scaled)
                    whh1_ref,     # (H, 4H)        layer-1 recurrent weight (pre-scaled)
                    b1_ref,       # (1, 4H)        layer-1 b_ih + b_hh   (pre-scaled)
                    wfc1_ref,     # (H, 32)
                    bfc1_ref,     # (1, 32)
                    wfc2_ref,     # (32, 128)      zero-padded from (32, 2)
                    bfc2_ref,     # (1, 128)       zero-padded from (1, 2)
                    out_ref,      # (B_TILE, 128)
                    xp_ref,       # (T_CHUNK, B_TILE, 4H) VMEM scratch: chunk input projection
                    h0_ref, c0_ref, h1_ref, c1_ref,   # (B_TILE, H) carried LSTM state
                    *, t_true, mask_time):
    t_idx = pl.program_id(1)
    nt = pl.num_programs(1)

    t_chunk, bt, gdim = xp_ref.shape
    H = whh0_ref.shape[0]
    ip = x_ref.shape[-1]

    # ---- init carried state at the first time chunk of each batch tile ----
    @pl.when(t_idx == 0)
    def _():
        z = jnp.zeros((bt, H), jnp.float32)
        h0_ref[...] = z
        c0_ref[...] = z
        h1_ref[...] = z
        c1_ref[...] = z

    # ---- chunk-granularity layer-0 input projection (bias folded in) ----
    x2 = x_ref[...].reshape(t_chunk * bt, ip)
    xp = jnp.dot(x2, wih0_ref[...], preferred_element_type=jnp.float32) + b0_ref[...]
    xp_ref[...] = xp.reshape(t_chunk, bt, gdim)

    # Resident weights hoisted out of the time loop.
    whh0 = whh0_ref[...]
    wih1 = wih1_ref[...]
    whh1 = whh1_ref[...]
    b1 = b1_ref[...]

    def cell(gates, c):
        # i/f/o lanes were pre-scaled to z/2 at pack time:
        #   sigmoid(z) = 0.5*tanh(z/2) + 0.5  -> one full-width tanh per gate vector.
        tg = jnp.tanh(gates)
        i_g = 0.5 * tg[:, 0 * H:1 * H] + 0.5
        f_g = 0.5 * tg[:, 1 * H:2 * H] + 0.5
        g_g = tg[:, 2 * H:3 * H]
        o_g = 0.5 * tg[:, 3 * H:4 * H] + 0.5
        c_new = f_g * c + i_g * g_g
        h_new = o_g * jnp.tanh(c_new)
        return h_new, c_new

    t_base = t_idx * t_chunk

    def step(tt, carry):
        h0 = h0_ref[...]
        c0 = c0_ref[...]
        h1 = h1_ref[...]
        c1 = c1_ref[...]
        # Layer-1 recurrent matmul depends only on h1(t-1): overlaps layer-0.
        r1 = jnp.dot(h1, whh1, preferred_element_type=jnp.float32)
        # Layer 0: input projection already done; only the K=64 recurrent matmul.
        g0 = xp_ref[tt] + jnp.dot(h0, whh0, preferred_element_type=jnp.float32)
        h0n, c0n = cell(g0, c0)
        # Layer 1 (inter-layer dropout = identity at eval).
        g1 = jnp.dot(h0n, wih1, preferred_element_type=jnp.float32) + r1 + b1
        h1n, c1n = cell(g1, c1)
        if mask_time:  # static Python flag: only compiled in when T was padded
            valid = (t_base + tt) < t_true
            h0n = jnp.where(valid, h0n, h0)
            c0n = jnp.where(valid, c0n, c0)
            h1n = jnp.where(valid, h1n, h1)
            c1n = jnp.where(valid, c1n, c1)
        h0_ref[...] = h0n
        c0_ref[...] = c0n
        h1_ref[...] = h1n
        c1_ref[...] = c1n
        return carry

    # Deep unroll only for small batch tiles (latency-bound); shallow for large
    # tiles to keep gate temporaries inside the 64-vreg file.
    unroll = 8 if bt <= 16 else (2 if bt <= 64 else 1)
    unroll = min(unroll, t_chunk)
    while t_chunk % unroll:
        unroll -= 1
    lax.fori_loop(0, t_chunk, step, 0, unroll=unroll)

    # ---- fc head on the final top-layer hidden state, lane-dense store ----
    @pl.when(t_idx == nt - 1)
    def _():
        hid = jnp.maximum(
            jnp.dot(h1_ref[...], wfc1_ref[...], preferred_element_type=jnp.float32)
            + bfc1_ref[...], 0.0)
        out_ref[...] = (jnp.dot(hid, wfc2_ref[...], preferred_element_type=jnp.float32)
                        + bfc2_ref[...])


# ----------------------------------------------------------------------------
# Parameter construction (PyTorch layout) + packing into the kernel layout.
# ----------------------------------------------------------------------------
def init_raw_params(key, input_size=INPUT_SIZE, hidden_size=HIDDEN_SIZE,
                    fc_hidden=FC_HIDDEN, out_dim=OUT_DIM):
    """PyTorch-shaped params: U(-1/sqrt(fan), 1/sqrt(fan)) like nn.LSTM/nn.Linear defaults."""
    H = hidden_size
    keys = jax.random.split(key, 12)
    k_lstm = 1.0 / jnp.sqrt(H)
    k_fc1 = 1.0 / jnp.sqrt(H)
    k_fc2 = 1.0 / jnp.sqrt(fc_hidden)

    def u(k, shape, bound):
        return jax.random.uniform(k, shape, jnp.float32, -bound, bound)

    return dict(
        w_ih0=u(keys[0], (4 * H, input_size), k_lstm),
        w_hh0=u(keys[1], (4 * H, H), k_lstm),
        b_ih0=u(keys[2], (4 * H,), k_lstm),
        b_hh0=u(keys[3], (4 * H,), k_lstm),
        w_ih1=u(keys[4], (4 * H, H), k_lstm),
        w_hh1=u(keys[5], (4 * H, H), k_lstm),
        b_ih1=u(keys[6], (4 * H,), k_lstm),
        b_hh1=u(keys[7], (4 * H,), k_lstm),
        w_fc1=u(keys[8], (fc_hidden, H), k_fc1),
        b_fc1=u(keys[9], (fc_hidden,), k_fc1),
        w_fc2=u(keys[10], (out_dim, fc_hidden), k_fc2),
        b_fc2=u(keys[11], (out_dim,), k_fc2),
    )


def pack_params(raw):
    """Pack PyTorch-layout weights into the kernel layout (transposed / fused / padded).
    Gate order is PyTorch's [i | f | g | o].  The i/f/o columns and bias lanes are
    pre-scaled by 0.5 (exact in f32) so the kernel can compute
    sigmoid(z) = 0.5*tanh(z/2) + 0.5 with a single full-width tanh."""
    H = raw["w_hh0"].shape[1]
    fc_hidden, out_dim = raw["w_fc2"].shape[1], raw["w_fc2"].shape[0]
    gate_scale = jnp.concatenate([
        jnp.full((2 * H,), 0.5, jnp.float32),   # i, f
        jnp.ones((H,), jnp.float32),            # g
        jnp.full((H,), 0.5, jnp.float32),       # o
    ])

    def s(w):  # last dim is 4H (gate-major columns)
        return w * gate_scale

    wfc2 = raw["w_fc2"].T                      # (32, 2)
    bfc2 = raw["b_fc2"].reshape(1, -1)         # (1, 2)
    wfc2p = jnp.zeros((fc_hidden, OUT_PAD), jnp.float32).at[:, :out_dim].set(wfc2)
    bfc2p = jnp.zeros((1, OUT_PAD), jnp.float32).at[:, :out_dim].set(bfc2)
    return dict(
        wih0=s(raw["w_ih0"].T),                                    # (I, 4H)
        b0=s((raw["b_ih0"] + raw["b_hh0"]).reshape(1, -1)),        # (1, 4H)
        whh0=s(raw["w_hh0"].T),                                    # (H, 4H)
        wih1=s(raw["w_ih1"].T),                                    # (H, 4H)
        whh1=s(raw["w_hh1"].T),                                    # (H, 4H)
        b1=s((raw["b_ih1"] + raw["b_hh1"]).reshape(1, -1)),        # (1, 4H)
        wfc1=raw["w_fc1"].T,                                       # (H, 32)
        bfc1=raw["b_fc1"].reshape(1, -1),                          # (1, 32)
        wfc2=wfc2p,                                                # (32, 128) padded
        bfc2=bfc2p,                                                # (1, 128) padded
    )


# ----------------------------------------------------------------------------
# Wrapper
# ----------------------------------------------------------------------------
def _pick_b_tile(batch):
    b8 = _round_up(batch, 8)
    if b8 <= 16:
        return b8
    if b8 <= 256:
        # split into >=2 batch tiles so both v7x TensorCores stay busy
        return _round_up(b8 // 2, 8)
    return 128


@jax.jit
def storm_predictor_forward(x, params):
    """x: (B, T, input_size), batch-first like the PyTorch module. Returns (B, 2)."""
    B, T, I = x.shape
    H = params["whh0"].shape[0]
    G = 4 * H

    b_tile = _pick_b_tile(B)
    b_pad = _round_up(B, b_tile)
    t_chunk = min(T, MAX_T_CHUNK)
    t_pad = _round_up(T, t_chunk)
    mask_time = (t_pad != T)

    xf = x.astype(jnp.float32)
    xf = jnp.pad(xf, ((0, b_pad - B), (0, t_pad - T), (0, IN_PAD - I)))
    # Time-major (T_pad, b_pad, IN_PAD): the streamed x is the raw 5(->8)-wide input;
    # the (., ., 4H) projection never touches HBM (done per-chunk inside the kernel).
    xtm = jnp.transpose(xf, (1, 0, 2))

    wih0 = jnp.pad(params["wih0"], ((0, IN_PAD - params["wih0"].shape[0]), (0, 0)))

    weights = (wih0, params["b0"], params["whh0"], params["wih1"], params["whh1"],
               params["b1"], params["wfc1"], params["bfc1"], params["wfc2"], params["bfc2"])

    in_specs = [pl.BlockSpec((t_chunk, b_tile, IN_PAD), lambda b, t: (t, b, 0))]
    in_specs += [pl.BlockSpec(w.shape, lambda b, t: (0, 0)) for w in weights]
    out_spec = pl.BlockSpec((b_tile, OUT_PAD), lambda b, t: (b, 0))

    grid = (b_pad // b_tile, t_pad // t_chunk)

    # VMEM budget: double-buffered x stream + resident weights + xp scratch + state + out.
    x_block = 4 * t_chunk * b_tile * 128                       # minor dim lane-pads to 128
    xp_block = 4 * t_chunk * b_tile * G
    w_bytes = 4 * sum(_round_up(w.shape[0], 8) * _round_up(w.shape[1], 128) for w in weights)
    state_bytes = 4 * 4 * b_tile * H
    out_bytes = 4 * b_tile * OUT_PAD
    vmem_limit = int(min(48 << 20,
                         max(32 << 20,
                             2 * x_block + 2 * w_bytes + 2 * out_bytes
                             + xp_block + state_bytes + (8 << 20))))

    kernel = functools.partial(_lstm_fc_kernel, t_true=T, mask_time=mask_time)

    out = pl.pallas_call(
        kernel,
        out_shape=jax.ShapeDtypeStruct((b_pad, OUT_PAD), jnp.float32),
        grid_spec=pltpu.PrefetchScalarGridSpec(
            num_scalar_prefetch=0,
            grid=grid,
            in_specs=in_specs,
            out_specs=out_spec,
            scratch_shapes=[pltpu.VMEM((t_chunk, b_tile, G), jnp.float32)]
                           + [pltpu.VMEM((b_tile, H), jnp.float32)] * 4,
        ),
        compiler_params=pltpu.CompilerParams(
            dimension_semantics=("parallel", "arbitrary"),
            vmem_limit_bytes=vmem_limit,
        ),
    )(xtm, *weights)

    return out[:B, :OUT_DIM]


# ----------------------------------------------------------------------------
# Pure-JAX reference that consumes PyTorch-layout weights (validates the packing).
# ----------------------------------------------------------------------------
def _torch_layout_reference(x, raw):
    B, T, _ = x.shape
    H = raw["w_hh0"].shape[1]

    def cell(x_t, h, c, w_ih, w_hh, b_ih, b_hh):
        g = x_t @ w_ih.T + h @ w_hh.T + b_ih + b_hh
        i = jax.nn.sigmoid(g[:, :H])
        f = jax.nn.sigmoid(g[:, H:2 * H])
        gg = jnp.tanh(g[:, 2 * H:3 * H])
        o = jax.nn.sigmoid(g[:, 3 * H:])
        c = f * c + i * gg
        return o * jnp.tanh(c), c

    h0 = c0 = h1 = c1 = jnp.zeros((B, H), jnp.float32)
    for t in range(T):
        h0, c0 = cell(x[:, t], h0, c0, raw["w_ih0"], raw["w_hh0"], raw["b_ih0"], raw["b_hh0"])
        h1, c1 = cell(h0, h1, c1, raw["w_ih1"], raw["w_hh1"], raw["b_ih1"], raw["b_hh1"])
    hid = jnp.maximum(h1 @ raw["w_fc1"].T + raw["b_fc1"], 0.0)
    return hid @ raw["w_fc2"].T + raw["b_fc2"]


if __name__ == "__main__":
    key = jax.random.PRNGKey(0)
    k_x, k_p = jax.random.split(key)

    B, T = 2, 8
    x = jax.random.normal(k_x, (B, T, INPUT_SIZE), jnp.float32)

    raw = init_raw_params(k_p)
    params = pack_params(raw)

    out = storm_predictor_forward(x, params)
    out = jax.block_until_ready(out)

    ref = _torch_layout_reference(x, raw)
    assert out.shape == (B, OUT_DIM)
    assert jnp.allclose(out, ref, atol=1e-3, rtol=1e-3), (out, ref)

    print("KERNEL_OK")
</pallas_src>

<mosaic_0001>
module attributes {stable_mosaic.version = 11 : i64} {
  func.func @_lstm_fc_kernel(%arg0: i32, %arg1: i32, %arg2: memref<8x8x8xf32, #tpu.memory_space<vmem>>, %arg3: memref<8x256xf32, #tpu.memory_space<vmem>>, %arg4: memref<1x256xf32, #tpu.memory_space<vmem>>, %arg5: memref<64x256xf32, #tpu.memory_space<vmem>>, %arg6: memref<64x256xf32, #tpu.memory_space<vmem>>, %arg7: memref<64x256xf32, #tpu.memory_space<vmem>>, %arg8: memref<1x256xf32, #tpu.memory_space<vmem>>, %arg9: memref<64x32xf32, #tpu.memory_space<vmem>>, %arg10: memref<1x32xf32, #tpu.memory_space<vmem>>, %arg11: memref<32x128xf32, #tpu.memory_space<vmem>>, %arg12: memref<1x128xf32, #tpu.memory_space<vmem>>, %arg13: memref<8x128xf32, #tpu.memory_space<vmem>>, %arg14: memref<8x8x256xf32, #tpu.memory_space<vmem>>, %arg15: memref<8x64xf32, #tpu.memory_space<vmem>>, %arg16: memref<8x64xf32, #tpu.memory_space<vmem>>, %arg17: memref<8x64xf32, #tpu.memory_space<vmem>>, %arg18: memref<8x64xf32, #tpu.memory_space<vmem>>) attributes {dimension_semantics = [#tpu.dimension_semantics<parallel>, #tpu.dimension_semantics<arbitrary>], iteration_bounds = array<i64: 1, 1>, scalar_prefetch = 0 : i64, scratch_operands = 5 : i64, tpu.core_type = #tpu.core_type<tc>, window_params = [{transform_indices = @transform_0, window_bounds = array<i64: 8, 8, 8>}, {pipeline_mode = #tpu.pipeline_mode<synchronous>, transform_indices = @transform_1, window_bounds = array<i64: 8, 256>}, {pipeline_mode = #tpu.pipeline_mode<synchronous>, transform_indices = @transform_2, window_bounds = array<i64: 1, 256>}, {pipeline_mode = #tpu.pipeline_mode<synchronous>, transform_indices = @transform_3, window_bounds = array<i64: 64, 256>}, {pipeline_mode = #tpu.pipeline_mode<synchronous>, transform_indices = @transform_4, window_bounds = array<i64: 64, 256>}, {pipeline_mode = #tpu.pipeline_mode<synchronous>, transform_indices = @transform_5, window_bounds = array<i64: 64, 256>}, {pipeline_mode = #tpu.pipeline_mode<synchronous>, transform_indices = @transform_6, window_bounds = array<i64: 1, 256>}, {pipeline_mode = #tpu.pipeline_mode<synchronous>, transform_indices = @transform_7, window_bounds = array<i64: 64, 32>}, {pipeline_mode = #tpu.pipeline_mode<synchronous>, transform_indices = @transform_8, window_bounds = array<i64: 1, 32>}, {pipeline_mode = #tpu.pipeline_mode<synchronous>, transform_indices = @transform_9, window_bounds = array<i64: 32, 128>}, {pipeline_mode = #tpu.pipeline_mode<synchronous>, transform_indices = @transform_10, window_bounds = array<i64: 1, 128>}, {transform_indices = @transform_11, window_bounds = array<i64: 8, 128>}]} {
    %c0_i32 = arith.constant 0 : i32
    %0 = arith.cmpi eq, %arg1, %c0_i32 : i32
    %1 = arith.extui %0 : i1 to i32
    %c0_i32_0 = arith.constant 0 : i32
    %2 = arith.cmpi ne, %1, %c0_i32_0 : i32
    scf.if %2 {
      %cst_285 = arith.constant 0.000000e+00 : f32
      %515 = vector.broadcast %cst_285 : f32 to vector<8x64xf32>
      %c0_286 = arith.constant 0 : index
      %c0_287 = arith.constant 0 : index
      %516 = vector.load %arg15[%c0_286, %c0_287] : memref<8x64xf32, #tpu.memory_space<vmem>>, vector<8x64xf32>
      tpu.vector_store %arg15[%c0_286, %c0_287], %515 {strides = array<i32>} : memref<8x64xf32, #tpu.memory_space<vmem>>, vector<8x64xf32>,
      %c0_288 = arith.constant 0 : index
      %c0_289 = arith.constant 0 : index
      %517 = vector.load %arg16[%c0_288, %c0_289] : memref<8x64xf32, #tpu.memory_space<vmem>>, vector<8x64xf32>
      tpu.vector_store %arg16[%c0_288, %c0_289], %515 {strides = array<i32>} : memref<8x64xf32, #tpu.memory_space<vmem>>, vector<8x64xf32>,
      %c0_290 = arith.constant 0 : index
      %c0_291 = arith.constant 0 : index
      %518 = vector.load %arg17[%c0_290, %c0_291] : memref<8x64xf32, #tpu.memory_space<vmem>>, vector<8x64xf32>
      tpu.vector_store %arg17[%c0_290, %c0_291], %515 {strides = array<i32>} : memref<8x64xf32, #tpu.memory_space<vmem>>, vector<8x64xf32>,
      %c0_292 = arith.constant 0 : index
      %c0_293 = arith.constant 0 : index
      %519 = vector.load %arg18[%c0_292, %c0_293] : memref<8x64xf32, #tpu.memory_space<vmem>>, vector<8x64xf32>
      tpu.vector_store %arg18[%c0_292, %c0_293], %515 {strides = array<i32>} : memref<8x64xf32, #tpu.memory_space<vmem>>, vector<8x64xf32>,
    } else {
    }
    %c0 = arith.constant 0 : index
    %c0_1 = arith.constant 0 : index
    %c0_2 = arith.constant 0 : index
    %3 = vector.load %arg2[%c0, %c0_1, %c0_2] : memref<8x8x8xf32, #tpu.memory_space<vmem>>, vector<8x8x8xf32>
    %4 = vector.shape_cast %3 : vector<8x8x8xf32> to vector<64x8xf32>
    %c0_3 = arith.constant 0 : index
    %c0_4 = arith.constant 0 : index
    %5 = vector.load %arg3[%c0_3, %c0_4] : memref<8x256xf32, #tpu.memory_space<vmem>>, vector<8x256xf32>
    %cst = arith.constant dense<0.000000e+00> : vector<64x256xf32>
    %6 = tpu.matmul %4, %5, %cst {dimension_numbers = #tpu.dot_dimension_numbers<[1], [0], [0], [1], [0, 0, 1, 1], [], []>} : vector<64x8xf32>, vector<8x256xf32>, vector<64x256xf32> -> vector<64x256xf32>
    %c0_5 = arith.constant 0 : index
    %c0_6 = arith.constant 0 : index
    %7 = vector.load %arg4[%c0_5, %c0_6] : memref<1x256xf32, #tpu.memory_space<vmem>>, vector<1x256xf32>
    %8 = vector.broadcast %7 : vector<1x256xf32> to vector<64x256xf32>
    %9 = arith.addf %6, %8 : vector<64x256xf32>
    %10 = vector.shape_cast %9 : vector<64x256xf32> to vector<8x8x256xf32>
    %c0_7 = arith.constant 0 : index
    %c0_8 = arith.constant 0 : index
    %c0_9 = arith.constant 0 : index
    %11 = vector.load %arg14[%c0_7, %c0_8, %c0_9] : memref<8x8x256xf32, #tpu.memory_space<vmem>>, vector<8x8x256xf32>
    tpu.vector_store %arg14[%c0_7, %c0_8, %c0_9], %10 {strides = array<i32>} : memref<8x8x256xf32, #tpu.memory_space<vmem>>, vector<8x8x256xf32>,
    %c0_10 = arith.constant 0 : index
    %c0_11 = arith.constant 0 : index
    %12 = vector.load %arg5[%c0_10, %c0_11] : memref<64x256xf32, #tpu.memory_space<vmem>>, vector<64x256xf32>
    %c0_12 = arith.constant 0 : index
    %c0_13 = arith.constant 0 : index
    %13 = vector.load %arg6[%c0_12, %c0_13] : memref<64x256xf32, #tpu.memory_space<vmem>>, vector<64x256xf32>
    %c0_14 = arith.constant 0 : index
    %c0_15 = arith.constant 0 : index
    %14 = vector.load %arg7[%c0_14, %c0_15] : memref<64x256xf32, #tpu.memory_space<vmem>>, vector<64x256xf32>
    %c0_16 = arith.constant 0 : index
    %c0_17 = arith.constant 0 : index
    %15 = vector.load %arg8[%c0_16, %c0_17] : memref<1x256xf32, #tpu.memory_space<vmem>>, vector<1x256xf32>
    %c0_i32_18 = arith.constant 0 : i32
    %c0_19 = arith.constant 0 : index
    %c0_20 = arith.constant 0 : index
    %16 = vector.load %arg15[%c0_19, %c0_20] : memref<8x64xf32, #tpu.memory_space<vmem>>, vector<8x64xf32>
    %c0_21 = arith.constant 0 : index
    %c0_22 = arith.constant 0 : index
    %17 = vector.load %arg16[%c0_21, %c0_22] : memref<8x64xf32, #tpu.memory_space<vmem>>, vector<8x64xf32>
    %c0_23 = arith.constant 0 : index
    %c0_24 = arith.constant 0 : index
    %18 = vector.load %arg17[%c0_23, %c0_24] : memref<8x64xf32, #tpu.memory_space<vmem>>, vector<8x64xf32>
    %c0_25 = arith.constant 0 : index
    %c0_26 = arith.constant 0 : index
    %19 = vector.load %arg18[%c0_25, %c0_26] : memref<8x64xf32, #tpu.memory_space<vmem>>, vector<8x64xf32>
    %cst_27 = arith.constant dense<0.000000e+00> : vector<8x256xf32>
    %20 = tpu.matmul %18, %14, %cst_27 {dimension_numbers = #tpu.dot_dimension_numbers<[1], [0], [0], [1], [0, 0, 1, 1], [], []>} : vector<8x64xf32>, vector<64x256xf32>, vector<8x256xf32> -> vector<8x256xf32>
    %21 = arith.index_cast %c0_i32_18 : i32 to index
    %c0_28 = arith.constant 0 : index
    %c0_29 = arith.constant 0 : index
    %22 = vector.load %arg14[%21, %c0_28, %c0_29] : memref<8x8x256xf32, #tpu.memory_space<vmem>>, vector<1x8x256xf32>
    %23 = vector.shape_cast %22 : vector<1x8x256xf32> to vector<8x256xf32>
    %cst_30 = arith.constant dense<0.000000e+00> : vector<8x256xf32>
    %24 = tpu.matmul %16, %12, %cst_30 {dimension_numbers = #tpu.dot_dimension_numbers<[1], [0], [0], [1], [0, 0, 1, 1], [], []>} : vector<8x64xf32>, vector<64x256xf32>, vector<8x256xf32> -> vector<8x256xf32>
    %25 = arith.addf %23, %24 : vector<8x256xf32>
    %26 = math.tanh %25 : vector<8x256xf32>
    %27 = vector.extract_strided_slice %26 {offsets = [0, 0], sizes = [8, 64], strides = [1, 1]} : vector<8x256xf32> to vector<8x64xf32>
    %cst_31 = arith.constant 5.000000e-01 : f32
    %28 = vector.broadcast %cst_31 : f32 to vector<8x64xf32>
    %29 = arith.mulf %28, %27 : vector<8x64xf32>
    %cst_32 = arith.constant 5.000000e-01 : f32
    %30 = vector.broadcast %cst_32 : f32 to vector<8x64xf32>
    %31 = arith.addf %29, %30 : vector<8x64xf32>
    %32 = vector.extract_strided_slice %26 {offsets = [0, 64], sizes = [8, 64], strides = [1, 1]} : vector<8x256xf32> to vector<8x64xf32>
    %cst_33 = arith.constant 5.000000e-01 : f32
    %33 = vector.broadcast %cst_33 : f32 to vector<8x64xf32>
    %34 = arith.mulf %33, %32 : vector<8x64xf32>
    %cst_34 = arith.constant 5.000000e-01 : f32
    %35 = vector.broadcast %cst_34 : f32 to vector<8x64xf32>
    %36 = arith.addf %34, %35 : vector<8x64xf32>
    %37 = vector.extract_strided_slice %26 {offsets = [0, 128], sizes = [8, 64], strides = [1, 1]} : vector<8x256xf32> to vector<8x64xf32>
    %38 = vector.extract_strided_slice %26 {offsets = [0, 192], sizes = [8, 64], strides = [1, 1]} : vector<8x256xf32> to vector<8x64xf32>
    %cst_35 = arith.constant 5.000000e-01 : f32
    %39 = vector.broadcast %cst_35 : f32 to vector<8x64xf32>
    %40 = arith.mulf %39, %38 : vector<8x64xf32>
    %cst_36 = arith.constant 5.000000e-01 : f32
    %41 = vector.broadcast %cst_36 : f32 to vector<8x64xf32>
    %42 = arith.addf %40, %41 : vector<8x64xf32>
    %43 = arith.mulf %36, %17 : vector<8x64xf32>
    %44 = arith.mulf %31, %37 : vector<8x64xf32>
    %45 = arith.addf %43, %44 : vector<8x64xf32>
    %46 = math.tanh %45 : vector<8x64xf32>
    %47 = arith.mulf %42, %46 : vector<8x64xf32>
    %cst_37 = arith.constant dense<0.000000e+00> : vector<8x256xf32>
    %48 = tpu.matmul %47, %13, %cst_37 {dimension_numbers = #tpu.dot_dimension_numbers<[1], [0], [0], [1], [0, 0, 1, 1], [], []>} : vector<8x64xf32>, vector<64x256xf32>, vector<8x256xf32> -> vector<8x256xf32>
    %49 = arith.addf %48, %20 : vector<8x256xf32>
    %50 = vector.broadcast %15 : vector<1x256xf32> to vector<8x256xf32>
    %51 = arith.addf %49, %50 : vector<8x256xf32>
    %52 = math.tanh %51 : vector<8x256xf32>
    %53 = vector.extract_strided_slice %52 {offsets = [0, 0], sizes = [8, 64], strides = [1, 1]} : vector<8x256xf32> to vector<8x64xf32>
    %cst_38 = arith.constant 5.000000e-01 : f32
    %54 = vector.broadcast %cst_38 : f32 to vector<8x64xf32>
    %55 = arith.mulf %54, %53 : vector<8x64xf32>
    %cst_39 = arith.constant 5.000000e-01 : f32
    %56 = vector.broadcast %cst_39 : f32 to vector<8x64xf32>
    %57 = arith.addf %55, %56 : vector<8x64xf32>
    %58 = vector.extract_strided_slice %52 {offsets = [0, 64], sizes = [8, 64], strides = [1, 1]} : vector<8x256xf32> to vector<8x64xf32>
    %cst_40 = arith.constant 5.000000e-01 : f32
    %59 = vector.broadcast %cst_40 : f32 to vector<8x64xf32>
    %60 = arith.mulf %59, %58 : vector<8x64xf32>
    %cst_41 = arith.constant 5.000000e-01 : f32
    %61 = vector.broadcast %cst_41 : f32 to vector<8x64xf32>
    %62 = arith.addf %60, %61 : vector<8x64xf32>
    %63 = vector.extract_strided_slice %52 {offsets = [0, 128], sizes = [8, 64], strides = [1, 1]} : vector<8x256xf32> to vector<8x64xf32>
    %64 = vector.extract_strided_slice %52 {offsets = [0, 192], sizes = [8, 64], strides = [1, 1]} : vector<8x256xf32> to vector<8x64xf32>
    %cst_42 = arith.constant 5.000000e-01 : f32
    %65 = vector.broadcast %cst_42 : f32 to vector<8x64xf32>
    %66 = arith.mulf %65, %64 : vector<8x64xf32>
    %cst_43 = arith.constant 5.000000e-01 : f32
    %67 = vector.broadcast %cst_43 : f32 to vector<8x64xf32>
    %68 = arith.addf %66, %67 : vector<8x64xf32>
    %69 = arith.mulf %62, %19 : vector<8x64xf32>
    %70 = arith.mulf %57, %63 : vector<8x64xf32>
    %71 = arith.addf %69, %70 : vector<8x64xf32>
    %72 = math.tanh %71 : vector<8x64xf32>
    %73 = arith.mulf %68, %72 : vector<8x64xf32>
    %c0_44 = arith.constant 0 : index
    %c0_45 = arith.constant 0 : index
    %74 = vector.load %arg15[%c0_44, %c0_45] : memref<8x64xf32, #tpu.memory_space<vmem>>, vector<8x64xf32>
    tpu.vector_store %arg15[%c0_44, %c0_45], %47 {strides = array<i32>} : memref<8x64xf32, #tpu.memory_space<vmem>>, vector<8x64xf32>,
    %c0_46 = arith.constant 0 : index
    %c0_47 = arith.constant 0 : index
    %75 = vector.load %arg16[%c0_46, %c0_47] : memref<8x64xf32, #tpu.memory_space<vmem>>, vector<8x64xf32>
    tpu.vector_store %arg16[%c0_46, %c0_47], %45 {strides = array<i32>} : memref<8x64xf32, #tpu.memory_space<vmem>>, vector<8x64xf32>,
    %c0_48 = arith.constant 0 : index
    %c0_49 = arith.constant 0 : index
    %76 = vector.load %arg17[%c0_48, %c0_49] : memref<8x64xf32, #tpu.memory_space<vmem>>, vector<8x64xf32>
    tpu.vector_store %arg17[%c0_48, %c0_49], %73 {strides = array<i32>} : memref<8x64xf32, #tpu.memory_space<vmem>>, vector<8x64xf32>,
    %c0_50 = arith.constant 0 : index
    %c0_51 = arith.constant 0 : index
    %77 = vector.load %arg18[%c0_50, %c0_51] : memref<8x64xf32, #tpu.memory_space<vmem>>, vector<8x64xf32>
    tpu.vector_store %arg18[%c0_50, %c0_51], %71 {strides = array<i32>} : memref<8x64xf32, #tpu.memory_space<vmem>>, vector<8x64xf32>,
    %c1_i32 = arith.constant 1 : i32
    %c0_52 = arith.constant 0 : index
    %c0_53 = arith.constant 0 : index
    %78 = vector.load %arg15[%c0_52, %c0_53] : memref<8x64xf32, #tpu.memory_space<vmem>>, vector<8x64xf32>
    %c0_54 = arith.constant 0 : index
    %c0_55 = arith.constant 0 : index
    %79 = vector.load %arg16[%c0_54, %c0_55] : memref<8x64xf32, #tpu.memory_space<vmem>>, vector<8x64xf32>
    %c0_56 = arith.constant 0 : index
    %c0_57 = arith.constant 0 : index
    %80 = vector.load %arg17[%c0_56, %c0_57] : memref<8x64xf32, #tpu.memory_space<vmem>>, vector<8x64xf32>
    %c0_58 = arith.constant 0 : index
    %c0_59 = arith.constant 0 : index
    %81 = vector.load %arg18[%c0_58, %c0_59] : memref<8x64xf32, #tpu.memory_space<vmem>>, vector<8x64xf32>
    %cst_60 = arith.constant dense<0.000000e+00> : vector<8x256xf32>
    %82 = tpu.matmul %80, %14, %cst_60 {dimension_numbers = #tpu.dot_dimension_numbers<[1], [0], [0], [1], [0, 0, 1, 1], [], []>} : vector<8x64xf32>, vector<64x256xf32>, vector<8x256xf32> -> vector<8x256xf32>
    %83 = arith.index_cast %c1_i32 : i32 to index
    %c0_61 = arith.constant 0 : index
    %c0_62 = arith.constant 0 : index
    %84 = vector.load %arg14[%83, %c0_61, %c0_62] : memref<8x8x256xf32, #tpu.memory_space<vmem>>, vector<1x8x256xf32>
    %85 = vector.shape_cast %84 : vector<1x8x256xf32> to vector<8x256xf32>
    %cst_63 = arith.constant dense<0.000000e+00> : vector<8x256xf32>
    %86 = tpu.matmul %78, %12, %cst_63 {dimension_numbers = #tpu.dot_dimension_numbers<[1], [0], [0], [1], [0, 0, 1, 1], [], []>} : vector<8x64xf32>, vector<64x256xf32>, vector<8x256xf32> -> vector<8x256xf32>
    %87 = arith.addf %85, %86 : vector<8x256xf32>
    %88 = math.tanh %87 : vector<8x256xf32>
    %89 = vector.extract_strided_slice %88 {offsets = [0, 0], sizes = [8, 64], strides = [1, 1]} : vector<8x256xf32> to vector<8x64xf32>
    %cst_64 = arith.constant 5.000000e-01 : f32
    %90 = vector.broadcast %cst_64 : f32 to vector<8x64xf32>
    %91 = arith.mulf %90, %89 : vector<8x64xf32>
    %cst_65 = arith.constant 5.000000e-01 : f32
    %92 = vector.broadcast %cst_65 : f32 to vector<8x64xf32>
    %93 = arith.addf %91, %92 : vector<8x64xf32>
    %94 = vector.extract_strided_slice %88 {offsets = [0, 64], sizes = [8, 64], strides = [1, 1]} : vector<8x256xf32> to vector<8x64xf32>
    %cst_66 = arith.constant 5.000000e-01 : f32
    %95 = vector.broadcast %cst_66 : f32 to vector<8x64xf32>
    %96 = arith.mulf %95, %94 : vector<8x64xf32>
    %cst_67 = arith.constant 5.000000e-01 : f32
    %97 = vector.broadcast %cst_67 : f32 to vector<8x64xf32>
    %98 = arith.addf %96, %97 : vector<8x64xf32>
    %99 = vector.extract_strided_slice %88 {offsets = [0, 128], sizes = [8, 64], strides = [1, 1]} : vector<8x256xf32> to vector<8x64xf32>
    %100 = vector.extract_strided_slice %88 {offsets = [0, 192], sizes = [8, 64], strides = [1, 1]} : vector<8x256xf32> to vector<8x64xf32>
    %cst_68 = arith.constant 5.000000e-01 : f32
    %101 = vector.broadcast %cst_68 : f32 to vector<8x64xf32>
    %102 = arith.mulf %101, %100 : vector<8x64xf32>
    %cst_69 = arith.constant 5.000000e-01 : f32
    %103 = vector.broadcast %cst_69 : f32 to vector<8x64xf32>
    %104 = arith.addf %102, %103 : vector<8x64xf32>
    %105 = arith.mulf %98, %79 : vector<8x64xf32>
    %106 = arith.mulf %93, %99 : vector<8x64xf32>
    %107 = arith.addf %105, %106 : vector<8x64xf32>
    %108 = math.tanh %107 : vector<8x64xf32>
    %109 = arith.mulf %104, %108 : vector<8x64xf32>
    %cst_70 = arith.constant dense<0.000000e+00> : vector<8x256xf32>
    %110 = tpu.matmul %109, %13, %cst_70 {dimension_numbers = #tpu.dot_dimension_numbers<[1], [0], [0], [1], [0, 0, 1, 1], [], []>} : vector<8x64xf32>, vector<64x256xf32>, vector<8x256xf32> -> vector<8x256xf32>
    %111 = arith.addf %110, %82 : vector<8x256xf32>
    %112 = vector.broadcast %15 : vector<1x256xf32> to vector<8x256xf32>
    %113 = arith.addf %111, %112 : vector<8x256xf32>
    %114 = math.tanh %113 : vector<8x256xf32>
    %115 = vector.extract_strided_slice %114 {offsets = [0, 0], sizes = [8, 64], strides = [1, 1]} : vector<8x256xf32> to vector<8x64xf32>
    %cst_71 = arith.constant 5.000000e-01 : f32
    %116 = vector.broadcast %cst_71 : f32 to vector<8x64xf32>
    %117 = arith.mulf %116, %115 : vector<8x64xf32>
    %cst_72 = arith.constant 5.000000e-01 : f32
    %118 = vector.broadcast %cst_72 : f32 to vector<8x64xf32>
    %119 = arith.addf %117, %118 : vector<8x64xf32>
    %120 = vector.extract_strided_slice %114 {offsets = [0, 64], sizes = [8, 64], strides = [1, 1]} : vector<8x256xf32> to vector<8x64xf32>
    %cst_73 = arith.constant 5.000000e-01 : f32
    %121 = vector.broadcast %cst_73 : f32 to vector<8x64xf32>
    %122 = arith.mulf %121, %120 : vector<8x64xf32>
    %cst_74 = arith.constant 5.000000e-01 : f32
    %123 = vector.broadcast %cst_74 : f32 to vector<8x64xf32>
    %124 = arith.addf %122, %123 : vector<8x64xf32>
    %125 = vector.extract_strided_slice %114 {offsets = [0, 128], sizes = [8, 64], strides = [1, 1]} : vector<8x256xf32> to vector<8x64xf32>
    %126 = vector.extract_strided_slice %114 {offsets = [0, 192], sizes = [8, 64], strides = [1, 1]} : vector<8x256xf32> to vector<8x64xf32>
    %cst_75 = arith.constant 5.000000e-01 : f32
    %127 = vector.broadcast %cst_75 : f32 to vector<8x64xf32>
    %128 = arith.mulf %127, %126 : vector<8x64xf32>
    %cst_76 = arith.constant 5.000000e-01 : f32
    %129 = vector.broadcast %cst_76 : f32 to vector<8x64xf32>
    %130 = arith.addf %128, %129 : vector<8x64xf32>
    %131 = arith.mulf %124, %81 : vector<8x64xf32>
    %132 = arith.mulf %119, %125 : vector<8x64xf32>
    %133 = arith.addf %131, %132 : vector<8x64xf32>
    %134 = math.tanh %133 : vector<8x64xf32>
    %135 = arith.mulf %130, %134 : vector<8x64xf32>
    %c0_77 = arith.constant 0 : index
    %c0_78 = arith.constant 0 : index
    %136 = vector.load %arg15[%c0_77, %c0_78] : memref<8x64xf32, #tpu.memory_space<vmem>>, vector<8x64xf32>
    tpu.vector_store %arg15[%c0_77, %c0_78], %109 {strides = array<i32>} : memref<8x64xf32, #tpu.memory_space<vmem>>, vector<8x64xf32>,
    %c0_79 = arith.constant 0 : index
    %c0_80 = arith.constant 0 : index
    %137 = vector.load %arg16[%c0_79, %c0_80] : memref<8x64xf32, #tpu.memory_space<vmem>>, vector<8x64xf32>
    tpu.vector_store %arg16[%c0_79, %c0_80], %107 {strides = array<i32>} : memref<8x64xf32, #tpu.memory_space<vmem>>, vector<8x64xf32>,
    %c0_81 = arith.constant 0 : index
    %c0_82 = arith.constant 0 : index
    %138 = vector.load %arg17[%c0_81, %c0_82] : memref<8x64xf32, #tpu.memory_space<vmem>>, vector<8x64xf32>
    tpu.vector_store %arg17[%c0_81, %c0_82], %135 {strides = array<i32>} : memref<8x64xf32, #tpu.memory_space<vmem>>, vector<8x64xf32>,
    %c0_83 = arith.constant 0 : index
    %c0_84 = arith.constant 0 : index
    %139 = vector.load %arg18[%c0_83, %c0_84] : memref<8x64xf32, #tpu.memory_space<vmem>>, vector<8x64xf32>
    tpu.vector_store %arg18[%c0_83, %c0_84], %133 {strides = array<i32>} : memref<8x64xf32, #tpu.memory_space<vmem>>, vector<8x64xf32>,
    %c2_i32 = arith.constant 2 : i32
    %c0_85 = arith.constant 0 : index
    %c0_86 = arith.constant 0 : index
    %140 = vector.load %arg15[%c0_85, %c0_86] : memref<8x64xf32, #tpu.memory_space<vmem>>, vector<8x64xf32>
    %c0_87 = arith.constant 0 : index
    %c0_88 = arith.constant 0 : index
    %141 = vector.load %arg16[%c0_87, %c0_88] : memref<8x64xf32, #tpu.memory_space<vmem>>, vector<8x64xf32>
    %c0_89 = arith.constant 0 : index
    %c0_90 = arith.constant 0 : index
    %142 = vector.load %arg17[%c0_89, %c0_90] : memref<8x64xf32, #tpu.memory_space<vmem>>, vector<8x64xf32>
    %c0_91 = arith.constant 0 : index
    %c0_92 = arith.constant 0 : index
    %143 = vector.load %arg18[%c0_91, %c0_92] : memref<8x64xf32, #tpu.memory_space<vmem>>, vector<8x64xf32>
    %cst_93 = arith.constant dense<0.000000e+00> : vector<8x256xf32>
    %144 = tpu.matmul %142, %14, %cst_93 {dimension_numbers = #tpu.dot_dimension_numbers<[1], [0], [0], [1], [0, 0, 1, 1], [], []>} : vector<8x64xf32>, vector<64x256xf32>, vector<8x256xf32> -> vector<8x256xf32>
    %145 = arith.index_cast %c2_i32 : i32 to index
    %c0_94 = arith.constant 0 : index
    %c0_95 = arith.constant 0 : index
    %146 = vector.load %arg14[%145, %c0_94, %c0_95] : memref<8x8x256xf32, #tpu.memory_space<vmem>>, vector<1x8x256xf32>
    %147 = vector.shape_cast %146 : vector<1x8x256xf32> to vector<8x256xf32>
    %cst_96 = arith.constant dense<0.000000e+00> : vector<8x256xf32>
    %148 = tpu.matmul %140, %12, %cst_96 {dimension_numbers = #tpu.dot_dimension_numbers<[1], [0], [0], [1], [0, 0, 1, 1], [], []>} : vector<8x64xf32>, vector<64x256xf32>, vector<8x256xf32> -> vector<8x256xf32>
    %149 = arith.addf %147, %148 : vector<8x256xf32>
    %150 = math.tanh %149 : vector<8x256xf32>
    %151 = vector.extract_strided_slice %150 {offsets = [0, 0], sizes = [8, 64], strides = [1, 1]} : vector<8x256xf32> to vector<8x64xf32>
    %cst_97 = arith.constant 5.000000e-01 : f32
    %152 = vector.broadcast %cst_97 : f32 to vector<8x64xf32>
    %153 = arith.mulf %152, %151 : vector<8x64xf32>
    %cst_98 = arith.constant 5.000000e-01 : f32
    %154 = vector.broadcast %cst_98 : f32 to vector<8x64xf32>
    %155 = arith.addf %153, %154 : vector<8x64xf32>
    %156 = vector.extract_strided_slice %150 {offsets = [0, 64], sizes = [8, 64], strides = [1, 1]} : vector<8x256xf32> to vector<8x64xf32>
    %cst_99 = arith.constant 5.000000e-01 : f32
    %157 = vector.broadcast %cst_99 : f32 to vector<8x64xf32>
    %158 = arith.mulf %157, %156 : vector<8x64xf32>
    %cst_100 = arith.constant 5.000000e-01 : f32
    %159 = vector.broadcast %cst_100 : f32 to vector<8x64xf32>
    %160 = arith.addf %158, %159 : vector<8x64xf32>
    %161 = vector.extract_strided_slice %150 {offsets = [0, 128], sizes = [8, 64], strides = [1, 1]} : vector<8x256xf32> to vector<8x64xf32>
    %162 = vector.extract_strided_slice %150 {offsets = [0, 192], sizes = [8, 64], strides = [1, 1]} : vector<8x256xf32> to vector<8x64xf32>
    %cst_101 = arith.constant 5.000000e-01 : f32
    %163 = vector.broadcast %cst_101 : f32 to vector<8x64xf32>
    %164 = arith.mulf %163, %162 : vector<8x64xf32>
    %cst_102 = arith.constant 5.000000e-01 : f32
    %165 = vector.broadcast %cst_102 : f32 to vector<8x64xf32>
    %166 = arith.addf %164, %165 : vector<8x64xf32>
    %167 = arith.mulf %160, %141 : vector<8x64xf32>
    %168 = arith.mulf %155, %161 : vector<8x64xf32>
    %169 = arith.addf %167, %168 : vector<8x64xf32>
    %170 = math.tanh %169 : vector<8x64xf32>
    %171 = arith.mulf %166, %170 : vector<8x64xf32>
    %cst_103 = arith.constant dense<0.000000e+00> : vector<8x256xf32>
    %172 = tpu.matmul %171, %13, %cst_103 {dimension_numbers = #tpu.dot_dimension_numbers<[1], [0], [0], [1], [0, 0, 1, 1], [], []>} : vector<8x64xf32>, vector<64x256xf32>, vector<8x256xf32> -> vector<8x256xf32>
    %173 = arith.addf %172, %144 : vector<8x256xf32>
    %174 = vector.broadcast %15 : vector<1x256xf32> to vector<8x256xf32>
    %175 = arith.addf %173, %174 : vector<8x256xf32>
    %176 = math.tanh %175 : vector<8x256xf32>
    %177 = vector.extract_strided_slice %176 {offsets = [0, 0], sizes = [8, 64], strides = [1, 1]} : vector<8x256xf32> to vector<8x64xf32>
    %cst_104 = arith.constant 5.000000e-01 : f32
    %178 = vector.broadcast %cst_104 : f32 to vector<8x64xf32>
    %179 = arith.mulf %178, %177 : vector<8x64xf32>
    %cst_105 = arith.constant 5.000000e-01 : f32
    %180 = vector.broadcast %cst_105 : f32 to vector<8x64xf32>
    %181 = arith.addf %179, %180 : vector<8x64xf32>
    %182 = vector.extract_strided_slice %176 {offsets = [0, 64], sizes = [8, 64], strides = [1, 1]} : vector<8x256xf32> to vector<8x64xf32>
    %cst_106 = arith.constant 5.000000e-01 : f32
    %183 = vector.broadcast %cst_106 : f32 to vector<8x64xf32>
    %184 = arith.mulf %183, %182 : vector<8x64xf32>
    %cst_107 = arith.constant 5.000000e-01 : f32
    %185 = vector.broadcast %cst_107 : f32 to vector<8x64xf32>
    %186 = arith.addf %184, %185 : vector<8x64xf32>
    %187 = vector.extract_strided_slice %176 {offsets = [0, 128], sizes = [8, 64], strides = [1, 1]} : vector<8x256xf32> to vector<8x64xf32>
    %188 = vector.extract_strided_slice %176 {offsets = [0, 192], sizes = [8, 64], strides = [1, 1]} : vector<8x256xf32> to vector<8x64xf32>
    %cst_108 = arith.constant 5.000000e-01 : f32
    %189 = vector.broadcast %cst_108 : f32 to vector<8x64xf32>
    %190 = arith.mulf %189, %188 : vector<8x64xf32>
    %cst_109 = arith.constant 5.000000e-01 : f32
    %191 = vector.broadcast %cst_109 : f32 to vector<8x64xf32>
    %192 = arith.addf %190, %191 : vector<8x64xf32>
    %193 = arith.mulf %186, %143 : vector<8x64xf32>
    %194 = arith.mulf %181, %187 : vector<8x64xf32>
    %195 = arith.addf %193, %194 : vector<8x64xf32>
    %196 = math.tanh %195 : vector<8x64xf32>
    %197 = arith.mulf %192, %196 : vector<8x64xf32>
    %c0_110 = arith.constant 0 : index
    %c0_111 = arith.constant 0 : index
    %198 = vector.load %arg15[%c0_110, %c0_111] : memref<8x64xf32, #tpu.memory_space<vmem>>, vector<8x64xf32>
    tpu.vector_store %arg15[%c0_110, %c0_111], %171 {strides = array<i32>} : memref<8x64xf32, #tpu.memory_space<vmem>>, vector<8x64xf32>,
    %c0_112 = arith.constant 0 : index
    %c0_113 = arith.constant 0 : index
    %199 = vector.load %arg16[%c0_112, %c0_113] : memref<8x64xf32, #tpu.memory_space<vmem>>, vector<8x64xf32>
    tpu.vector_store %arg16[%c0_112, %c0_113], %169 {strides = array<i32>} : memref<8x64xf32, #tpu.memory_space<vmem>>, vector<8x64xf32>,
    %c0_114 = arith.constant 0 : index
    %c0_115 = arith.constant 0 : index
    %200 = vector.load %arg17[%c0_114, %c0_115] : memref<8x64xf32, #tpu.memory_space<vmem>>, vector<8x64xf32>
    tpu.vector_store %arg17[%c0_114, %c0_115], %197 {strides = array<i32>} : memref<8x64xf32, #tpu.memory_space<vmem>>, vector<8x64xf32>,
    %c0_116 = arith.constant 0 : index
    %c0_117 = arith.constant 0 : index
    %201 = vector.load %arg18[%c0_116, %c0_117] : memref<8x64xf32, #tpu.memory_space<vmem>>, vector<8x64xf32>
    tpu.vector_store %arg18[%c0_116, %c0_117], %195 {strides = array<i32>} : memref<8x64xf32, #tpu.memory_space<vmem>>, vector<8x64xf32>,
    %c3_i32 = arith.constant 3 : i32
    %c0_118 = arith.constant 0 : index
    %c0_119 = arith.constant 0 : index
    %202 = vector.load %arg15[%c0_118, %c0_119] : memref<8x64xf32, #tpu.memory_space<vmem>>, vector<8x64xf32>
    %c0_120 = arith.constant 0 : index
    %c0_121 = arith.constant 0 : index
    %203 = vector.load %arg16[%c0_120, %c0_121] : memref<8x64xf32, #tpu.memory_space<vmem>>, vector<8x64xf32>
    %c0_122 = arith.constant 0 : index
    %c0_123 = arith.constant 0 : index
    %204 = vector.load %arg17[%c0_122, %c0_123] : memref<8x64xf32, #tpu.memory_space<vmem>>, vector<8x64xf32>
    %c0_124 = arith.constant 0 : index
    %c0_125 = arith.constant 0 : index
    %205 = vector.load %arg18[%c0_124, %c0_125] : memref<8x64xf32, #tpu.memory_space<vmem>>, vector<8x64xf32>
    %cst_126 = arith.constant dense<0.000000e+00> : vector<8x256xf32>
    %206 = tpu.matmul %204, %14, %cst_126 {dimension_numbers = #tpu.dot_dimension_numbers<[1], [0], [0], [1], [0, 0, 1, 1], [], []>} : vector<8x64xf32>, vector<64x256xf32>, vector<8x256xf32> -> vector<8x256xf32>
    %207 = arith.index_cast %c3_i32 : i32 to index
    %c0_127 = arith.constant 0 : index
    %c0_128 = arith.constant 0 : index
    %208 = vector.load %arg14[%207, %c0_127, %c0_128] : memref<8x8x256xf32, #tpu.memory_space<vmem>>, vector<1x8x256xf32>
    %209 = vector.shape_cast %208 : vector<1x8x256xf32> to vector<8x256xf32>
    %cst_129 = arith.constant dense<0.000000e+00> : vector<8x256xf32>
    %210 = tpu.matmul %202, %12, %cst_129 {dimension_numbers = #tpu.dot_dimension_numbers<[1], [0], [0], [1], [0, 0, 1, 1], [], []>} : vector<8x64xf32>, vector<64x256xf32>, vector<8x256xf32> -> vector<8x256xf32>
    %211 = arith.addf %209, %210 : vector<8x256xf32>
    %212 = math.tanh %211 : vector<8x256xf32>
    %213 = vector.extract_strided_slice %212 {offsets = [0, 0], sizes = [8, 64], strides = [1, 1]} : vector<8x256xf32> to vector<8x64xf32>
    %cst_130 = arith.constant 5.000000e-01 : f32
    %214 = vector.broadcast %cst_130 : f32 to vector<8x64xf32>
    %215 = arith.mulf %214, %213 : vector<8x64xf32>
    %cst_131 = arith.constant 5.000000e-01 : f32
    %216 = vector.broadcast %cst_131 : f32 to vector<8x64xf32>
    %217 = arith.addf %215, %216 : vector<8x64xf32>
    %218 = vector.extract_strided_slice %212 {offsets = [0, 64], sizes = [8, 64], strides = [1, 1]} : vector<8x256xf32> to vector<8x64xf32>
    %cst_132 = arith.constant 5.000000e-01 : f32
    %219 = vector.broadcast %cst_132 : f32 to vector<8x64xf32>
    %220 = arith.mulf %219, %218 : vector<8x64xf32>
    %cst_133 = arith.constant 5.000000e-01 : f32
    %221 = vector.broadcast %cst_133 : f32 to vector<8x64xf32>
    %222 = arith.addf %220, %221 : vector<8x64xf32>
    %223 = vector.extract_strided_slice %212 {offsets = [0, 128], sizes = [8, 64], strides = [1, 1]} : vector<8x256xf32> to vector<8x64xf32>
    %224 = vector.extract_strided_slice %212 {offsets = [0, 192], sizes = [8, 64], strides = [1, 1]} : vector<8x256xf32> to vector<8x64xf32>
    %cst_134 = arith.constant 5.000000e-01 : f32
    %225 = vector.broadcast %cst_134 : f32 to vector<8x64xf32>
    %226 = arith.mulf %225, %224 : vector<8x64xf32>
    %cst_135 = arith.constant 5.000000e-01 : f32
    %227 = vector.broadcast %cst_135 : f32 to vector<8x64xf32>
    %228 = arith.addf %226, %227 : vector<8x64xf32>
    %229 = arith.mulf %222, %203 : vector<8x64xf32>
    %230 = arith.mulf %217, %223 : vector<8x64xf32>
    %231 = arith.addf %229, %230 : vector<8x64xf32>
    %232 = math.tanh %231 : vector<8x64xf32>
    %233 = arith.mulf %228, %232 : vector<8x64xf32>
    %cst_136 = arith.constant dense<0.000000e+00> : vector<8x256xf32>
    %234 = tpu.matmul %233, %13, %cst_136 {dimension_numbers = #tpu.dot_dimension_numbers<[1], [0], [0], [1], [0, 0, 1, 1], [], []>} : vector<8x64xf32>, vector<64x256xf32>, vector<8x256xf32> -> vector<8x256xf32>
    %235 = arith.addf %234, %206 : vector<8x256xf32>
    %236 = vector.broadcast %15 : vector<1x256xf32> to vector<8x256xf32>
    %237 = arith.addf %235, %236 : vector<8x256xf32>
    %238 = math.tanh %237 : vector<8x256xf32>
    %239 = vector.extract_strided_slice %238 {offsets = [0, 0], sizes = [8, 64], strides = [1, 1]} : vector<8x256xf32> to vector<8x64xf32>
    %cst_137 = arith.constant 5.000000e-01 : f32
    %240 = vector.broadcast %cst_137 : f32 to vector<8x64xf32>
    %241 = arith.mulf %240, %239 : vector<8x64xf32>
    %cst_138 = arith.constant 5.000000e-01 : f32
    %242 = vector.broadcast %cst_138 : f32 to vector<8x64xf32>
    %243 = arith.addf %241, %242 : vector<8x64xf32>
    %244 = vector.extract_strided_slice %238 {offsets = [0, 64], sizes = [8, 64], strides = [1, 1]} : vector<8x256xf32> to vector<8x64xf32>
    %cst_139 = arith.constant 5.000000e-01 : f32
    %245 = vector.broadcast %cst_139 : f32 to vector<8x64xf32>
    %246 = arith.mulf %245, %244 : vector<8x64xf32>
    %cst_140 = arith.constant 5.000000e-01 : f32
    %247 = vector.broadcast %cst_140 : f32 to vector<8x64xf32>
    %248 = arith.addf %246, %247 : vector<8x64xf32>
    %249 = vector.extract_strided_slice %238 {offsets = [0, 128], sizes = [8, 64], strides = [1, 1]} : vector<8x256xf32> to vector<8x64xf32>
    %250 = vector.extract_strided_slice %238 {offsets = [0, 192], sizes = [8, 64], strides = [1, 1]} : vector<8x256xf32> to vector<8x64xf32>
    %cst_141 = arith.constant 5.000000e-01 : f32
    %251 = vector.broadcast %cst_141 : f32 to vector<8x64xf32>
    %252 = arith.mulf %251, %250 : vector<8x64xf32>
    %cst_142 = arith.constant 5.000000e-01 : f32
    %253 = vector.broadcast %cst_142 : f32 to vector<8x64xf32>
    %254 = arith.addf %252, %253 : vector<8x64xf32>
    %255 = arith.mulf %248, %205 : vector<8x64xf32>
    %256 = arith.mulf %243, %249 : vector<8x64xf32>
    %257 = arith.addf %255, %256 : vector<8x64xf32>
    %258 = math.tanh %257 : vector<8x64xf32>
    %259 = arith.mulf %254, %258 : vector<8x64xf32>
    %c0_143 = arith.constant 0 : index
    %c0_144 = arith.constant 0 : index
    %260 = vector.load %arg15[%c0_143, %c0_144] : memref<8x64xf32, #tpu.memory_space<vmem>>, vector<8x64xf32>
    tpu.vector_store %arg15[%c0_143, %c0_144], %233 {strides = array<i32>} : memref<8x64xf32, #tpu.memory_space<vmem>>, vector<8x64xf32>,
    %c0_145 = arith.constant 0 : index
    %c0_146 = arith.constant 0 : index
    %261 = vector.load %arg16[%c0_145, %c0_146] : memref<8x64xf32, #tpu.memory_space<vmem>>, vector<8x64xf32>
    tpu.vector_store %arg16[%c0_145, %c0_146], %231 {strides = array<i32>} : memref<8x64xf32, #tpu.memory_space<vmem>>, vector<8x64xf32>,
    %c0_147 = arith.constant 0 : index
    %c0_148 = arith.constant 0 : index
    %262 = vector.load %arg17[%c0_147, %c0_148] : memref<8x64xf32, #tpu.memory_space<vmem>>, vector<8x64xf32>
    tpu.vector_store %arg17[%c0_147, %c0_148], %259 {strides = array<i32>} : memref<8x64xf32, #tpu.memory_space<vmem>>, vector<8x64xf32>,
    %c0_149 = arith.constant 0 : index
    %c0_150 = arith.constant 0 : index
    %263 = vector.load %arg18[%c0_149, %c0_150] : memref<8x64xf32, #tpu.memory_space<vmem>>, vector<8x64xf32>
    tpu.vector_store %arg18[%c0_149, %c0_150], %257 {strides = array<i32>} : memref<8x64xf32, #tpu.memory_space<vmem>>, vector<8x64xf32>,
    %c4_i32 = arith.constant 4 : i32
    %c0_151 = arith.constant 0 : index
    %c0_152 = arith.constant 0 : index
    %264 = vector.load %arg15[%c0_151, %c0_152] : memref<8x64xf32, #tpu.memory_space<vmem>>, vector<8x64xf32>
    %c0_153 = arith.constant 0 : index
    %c0_154 = arith.constant 0 : index
    %265 = vector.load %arg16[%c0_153, %c0_154] : memref<8x64xf32, #tpu.memory_space<vmem>>, vector<8x64xf32>
    %c0_155 = arith.constant 0 : index
    %c0_156 = arith.constant 0 : index
    %266 = vector.load %arg17[%c0_155, %c0_156] : memref<8x64xf32, #tpu.memory_space<vmem>>, vector<8x64xf32>
    %c0_157 = arith.constant 0 : index
    %c0_158 = arith.constant 0 : index
    %267 = vector.load %arg18[%c0_157, %c0_158] : memref<8x64xf32, #tpu.memory_space<vmem>>, vector<8x64xf32>
    %cst_159 = arith.constant dense<0.000000e+00> : vector<8x256xf32>
    %268 = tpu.matmul %266, %14, %cst_159 {dimension_numbers = #tpu.dot_dimension_numbers<[1], [0], [0], [1], [0, 0, 1, 1], [], []>} : vector<8x64xf32>, vector<64x256xf32>, vector<8x256xf32> -> vector<8x256xf32>
    %269 = arith.index_cast %c4_i32 : i32 to index
    %c0_160 = arith.constant 0 : index
    %c0_161 = arith.constant 0 : index
    %270 = vector.load %arg14[%269, %c0_160, %c0_161] : memref<8x8x256xf32, #tpu.memory_space<vmem>>, vector<1x8x256xf32>
    %271 = vector.shape_cast %270 : vector<1x8x256xf32> to vector<8x256xf32>
    %cst_162 = arith.constant dense<0.000000e+00> : vector<8x256xf32>
    %272 = tpu.matmul %264, %12, %cst_162 {dimension_numbers = #tpu.dot_dimension_numbers<[1], [0], [0], [1], [0, 0, 1, 1], [], []>} : vector<8x64xf32>, vector<64x256xf32>, vector<8x256xf32> -> vector<8x256xf32>
    %273 = arith.addf %271, %272 : vector<8x256xf32>
    %274 = math.tanh %273 : vector<8x256xf32>
    %275 = vector.extract_strided_slice %274 {offsets = [0, 0], sizes = [8, 64], strides = [1, 1]} : vector<8x256xf32> to vector<8x64xf32>
    %cst_163 = arith.constant 5.000000e-01 : f32
    %276 = vector.broadcast %cst_163 : f32 to vector<8x64xf32>
    %277 = arith.mulf %276, %275 : vector<8x64xf32>
    %cst_164 = arith.constant 5.000000e-01 : f32
    %278 = vector.broadcast %cst_164 : f32 to vector<8x64xf32>
    %279 = arith.addf %277, %278 : vector<8x64xf32>
    %280 = vector.extract_strided_slice %274 {offsets = [0, 64], sizes = [8, 64], strides = [1, 1]} : vector<8x256xf32> to vector<8x64xf32>
    %cst_165 = arith.constant 5.000000e-01 : f32
    %281 = vector.broadcast %cst_165 : f32 to vector<8x64xf32>
    %282 = arith.mulf %281, %280 : vector<8x64xf32>
    %cst_166 = arith.constant 5.000000e-01 : f32
    %283 = vector.broadcast %cst_166 : f32 to vector<8x64xf32>
    %284 = arith.addf %282, %283 : vector<8x64xf32>
    %285 = vector.extract_strided_slice %274 {offsets = [0, 128], sizes = [8, 64], strides = [1, 1]} : vector<8x256xf32> to vector<8x64xf32>
    %286 = vector.extract_strided_slice %274 {offsets = [0, 192], sizes = [8, 64], strides = [1, 1]} : vector<8x256xf32> to vector<8x64xf32>
    %cst_167 = arith.constant 5.000000e-01 : f32
    %287 = vector.broadcast %cst_167 : f32 to vector<8x64xf32>
    %288 = arith.mulf %287, %286 : vector<8x64xf32>
    %cst_168 = arith.constant 5.000000e-01 : f32
    %289 = vector.broadcast %cst_168 : f32 to vector<8x64xf32>
    %290 = arith.addf %288, %289 : vector<8x64xf32>
    %291 = arith.mulf %284, %265 : vector<8x64xf32>
    %292 = arith.mulf %279, %285 : vector<8x64xf32>
    %293 = arith.addf %291, %292 : vector<8x64xf32>
    %294 = math.tanh %293 : vector<8x64xf32>
    %295 = arith.mulf %290, %294 : vector<8x64xf32>
    %cst_169 = arith.constant dense<0.000000e+00> : vector<8x256xf32>
    %296 = tpu.matmul %295, %13, %cst_169 {dimension_numbers = #tpu.dot_dimension_numbers<[1], [0], [0], [1], [0, 0, 1, 1], [], []>} : vector<8x64xf32>, vector<64x256xf32>, vector<8x256xf32> -> vector<8x256xf32>
    %297 = arith.addf %296, %268 : vector<8x256xf32>
    %298 = vector.broadcast %15 : vector<1x256xf32> to vector<8x256xf32>
    %299 = arith.addf %297, %298 : vector<8x256xf32>
    %300 = math.tanh %299 : vector<8x256xf32>
    %301 = vector.extract_strided_slice %300 {offsets = [0, 0], sizes = [8, 64], strides = [1, 1]} : vector<8x256xf32> to vector<8x64xf32>
    %cst_170 = arith.constant 5.000000e-01 : f32
    %302 = vector.broadcast %cst_170 : f32 to vector<8x64xf32>
    %303 = arith.mulf %302, %301 : vector<8x64xf32>
    %cst_171 = arith.constant 5.000000e-01 : f32
    %304 = vector.broadcast %cst_171 : f32 to vector<8x64xf32>
    %305 = arith.addf %303, %304 : vector<8x64xf32>
    %306 = vector.extract_strided_slice %300 {offsets = [0, 64], sizes = [8, 64], strides = [1, 1]} : vector<8x256xf32> to vector<8x64xf32>
    %cst_172 = arith.constant 5.000000e-01 : f32
    %307 = vector.broadcast %cst_172 : f32 to vector<8x64xf32>
    %308 = arith.mulf %307, %306 : vector<8x64xf32>
    %cst_173 = arith.constant 5.000000e-01 : f32
    %309 = vector.broadcast %cst_173 : f32 to vector<8x64xf32>
    %310 = arith.addf %308, %309 : vector<8x64xf32>
    %311 = vector.extract_strided_slice %300 {offsets = [0, 128], sizes = [8, 64], strides = [1, 1]} : vector<8x256xf32> to vector<8x64xf32>
    %312 = vector.extract_strided_slice %300 {offsets = [0, 192], sizes = [8, 64], strides = [1, 1]} : vector<8x256xf32> to vector<8x64xf32>
    %cst_174 = arith.constant 5.000000e-01 : f32
    %313 = vector.broadcast %cst_174 : f32 to vector<8x64xf32>
    %314 = arith.mulf %313, %312 : vector<8x64xf32>
    %cst_175 = arith.constant 5.000000e-01 : f32
    %315 = vector.broadcast %cst_175 : f32 to vector<8x64xf32>
    %316 = arith.addf %314, %315 : vector<8x64xf32>
    %317 = arith.mulf %310, %267 : vector<8x64xf32>
    %318 = arith.mulf %305, %311 : vector<8x64xf32>
    %319 = arith.addf %317, %318 : vector<8x64xf32>
    %320 = math.tanh %319 : vector<8x64xf32>
    %321 = arith.mulf %316, %320 : vector<8x64xf32>
    %c0_176 = arith.constant 0 : index
    %c0_177 = arith.constant 0 : index
    %322 = vector.load %arg15[%c0_176, %c0_177] : memref<8x64xf32, #tpu.memory_space<vmem>>, vector<8x64xf32>
    tpu.vector_store %arg15[%c0_176, %c0_177], %295 {strides = array<i32>} : memref<8x64xf32, #tpu.memory_space<vmem>>, vector<8x64xf32>,
    %c0_178 = arith.constant 0 : index
    %c0_179 = arith.constant 0 : index
    %323 = vector.load %arg16[%c0_178, %c0_179] : memref<8x64xf32, #tpu.memory_space<vmem>>, vector<8x64xf32>
    tpu.vector_store %arg16[%c0_178, %c0_179], %293 {strides = array<i32>} : memref<8x64xf32, #tpu.memory_space<vmem>>, vector<8x64xf32>,
    %c0_180 = arith.constant 0 : index
    %c0_181 = arith.constant 0 : index
    %324 = vector.load %arg17[%c0_180, %c0_181] : memref<8x64xf32, #tpu.memory_space<vmem>>, vector<8x64xf32>
    tpu.vector_store %arg17[%c0_180, %c0_181], %321 {strides = array<i32>} : memref<8x64xf32, #tpu.memory_space<vmem>>, vector<8x64xf32>,
    %c0_182 = arith.constant 0 : index
    %c0_183 = arith.constant 0 : index
    %325 = vector.load %arg18[%c0_182, %c0_183] : memref<8x64xf32, #tpu.memory_space<vmem>>, vector<8x64xf32>
    tpu.vector_store %arg18[%c0_182, %c0_183], %319 {strides = array<i32>} : memref<8x64xf32, #tpu.memory_space<vmem>>, vector<8x64xf32>,
    %c5_i32 = arith.constant 5 : i32
    %c0_184 = arith.constant 0 : index
    %c0_185 = arith.constant 0 : index
    %326 = vector.load %arg15[%c0_184, %c0_185] : memref<8x64xf32, #tpu.memory_space<vmem>>, vector<8x64xf32>
    %c0_186 = arith.constant 0 : index
    %c0_187 = arith.constant 0 : index
    %327 = vector.load %arg16[%c0_186, %c0_187] : memref<8x64xf32, #tpu.memory_space<vmem>>, vector<8x64xf32>
    %c0_188 = arith.constant 0 : index
    %c0_189 = arith.constant 0 : index
    %328 = vector.load %arg17[%c0_188, %c0_189] : memref<8x64xf32, #tpu.memory_space<vmem>>, vector<8x64xf32>
    %c0_190 = arith.constant 0 : index
    %c0_191 = arith.constant 0 : index
    %329 = vector.load %arg18[%c0_190, %c0_191] : memref<8x64xf32, #tpu.memory_space<vmem>>, vector<8x64xf32>
    %cst_192 = arith.constant dense<0.000000e+00> : vector<8x256xf32>
    %330 = tpu.matmul %328, %14, %cst_192 {dimension_numbers = #tpu.dot_dimension_numbers<[1], [0], [0], [1], [0, 0, 1, 1], [], []>} : vector<8x64xf32>, vector<64x256xf32>, vector<8x256xf32> -> vector<8x256xf32>
    %331 = arith.index_cast %c5_i32 : i32 to index
    %c0_193 = arith.constant 0 : index
    %c0_194 = arith.constant 0 : index
    %332 = vector.load %arg14[%331, %c0_193, %c0_194] : memref<8x8x256xf32, #tpu.memory_space<vmem>>, vector<1x8x256xf32>
    %333 = vector.shape_cast %332 : vector<1x8x256xf32> to vector<8x256xf32>
    %cst_195 = arith.constant dense<0.000000e+00> : vector<8x256xf32>
    %334 = tpu.matmul %326, %12, %cst_195 {dimension_numbers = #tpu.dot_dimension_numbers<[1], [0], [0], [1], [0, 0, 1, 1], [], []>} : vector<8x64xf32>, vector<64x256xf32>, vector<8x256xf32> -> vector<8x256xf32>
    %335 = arith.addf %333, %334 : vector<8x256xf32>
    %336 = math.tanh %335 : vector<8x256xf32>
    %337 = vector.extract_strided_slice %336 {offsets = [0, 0], sizes = [8, 64], strides = [1, 1]} : vector<8x256xf32> to vector<8x64xf32>
    %cst_196 = arith.constant 5.000000e-01 : f32
    %338 = vector.broadcast %cst_196 : f32 to vector<8x64xf32>
    %339 = arith.mulf %338, %337 : vector<8x64xf32>
    %cst_197 = arith.constant 5.000000e-01 : f32
    %340 = vector.broadcast %cst_197 : f32 to vector<8x64xf32>
    %341 = arith.addf %339, %340 : vector<8x64xf32>
    %342 = vector.extract_strided_slice %336 {offsets = [0, 64], sizes = [8, 64], strides = [1, 1]} : vector<8x256xf32> to vector<8x64xf32>
    %cst_198 = arith.constant 5.000000e-01 : f32
    %343 = vector.broadcast %cst_198 : f32 to vector<8x64xf32>
    %344 = arith.mulf %343, %342 : vector<8x64xf32>
    %cst_199 = arith.constant 5.000000e-01 : f32
    %345 = vector.broadcast %cst_199 : f32 to vector<8x64xf32>
    %346 = arith.addf %344, %345 : vector<8x64xf32>
    %347 = vector.extract_strided_slice %336 {offsets = [0, 128], sizes = [8, 64], strides = [1, 1]} : vector<8x256xf32> to vector<8x64xf32>
    %348 = vector.extract_strided_slice %336 {offsets = [0, 192], sizes = [8, 64], strides = [1, 1]} : vector<8x256xf32> to vector<8x64xf32>
    %cst_200 = arith.constant 5.000000e-01 : f32
    %349 = vector.broadcast %cst_200 : f32 to vector<8x64xf32>
    %350 = arith.mulf %349, %348 : vector<8x64xf32>
    %cst_201 = arith.constant 5.000000e-01 : f32
    %351 = vector.broadcast %cst_201 : f32 to vector<8x64xf32>
    %352 = arith.addf %350, %351 : vector<8x64xf32>
    %353 = arith.mulf %346, %327 : vector<8x64xf32>
    %354 = arith.mulf %341, %347 : vector<8x64xf32>
    %355 = arith.addf %353, %354 : vector<8x64xf32>
    %356 = math.tanh %355 : vector<8x64xf32>
    %357 = arith.mulf %352, %356 : vector<8x64xf32>
    %cst_202 = arith.constant dense<0.000000e+00> : vector<8x256xf32>
    %358 = tpu.matmul %357, %13, %cst_202 {dimension_numbers = #tpu.dot_dimension_numbers<[1], [0], [0], [1], [0, 0, 1, 1], [], []>} : vector<8x64xf32>, vector<64x256xf32>, vector<8x256xf32> -> vector<8x256xf32>
    %359 = arith.addf %358, %330 : vector<8x256xf32>
    %360 = vector.broadcast %15 : vector<1x256xf32> to vector<8x256xf32>
    %361 = arith.addf %359, %360 : vector<8x256xf32>
    %362 = math.tanh %361 : vector<8x256xf32>
    %363 = vector.extract_strided_slice %362 {offsets = [0, 0], sizes = [8, 64], strides = [1, 1]} : vector<8x256xf32> to vector<8x64xf32>
    %cst_203 = arith.constant 5.000000e-01 : f32
    %364 = vector.broadcast %cst_203 : f32 to vector<8x64xf32>
    %365 = arith.mulf %364, %363 : vector<8x64xf32>
    %cst_204 = arith.constant 5.000000e-01 : f32
    %366 = vector.broadcast %cst_204 : f32 to vector<8x64xf32>
    %367 = arith.addf %365, %366 : vector<8x64xf32>
    %368 = vector.extract_strided_slice %362 {offsets = [0, 64], sizes = [8, 64], strides = [1, 1]} : vector<8x256xf32> to vector<8x64xf32>
    %cst_205 = arith.constant 5.000000e-01 : f32
    %369 = vector.broadcast %cst_205 : f32 to vector<8x64xf32>
    %370 = arith.mulf %369, %368 : vector<8x64xf32>
    %cst_206 = arith.constant 5.000000e-01 : f32
    %371 = vector.broadcast %cst_206 : f32 to vector<8x64xf32>
    %372 = arith.addf %370, %371 : vector<8x64xf32>
    %373 = vector.extract_strided_slice %362 {offsets = [0, 128], sizes = [8, 64], strides = [1, 1]} : vector<8x256xf32> to vector<8x64xf32>
    %374 = vector.extract_strided_slice %362 {offsets = [0, 192], sizes = [8, 64], strides = [1, 1]} : vector<8x256xf32> to vector<8x64xf32>
    %cst_207 = arith.constant 5.000000e-01 : f32
    %375 = vector.broadcast %cst_207 : f32 to vector<8x64xf32>
    %376 = arith.mulf %375, %374 : vector<8x64xf32>
    %cst_208 = arith.constant 5.000000e-01 : f32
    %377 = vector.broadcast %cst_208 : f32 to vector<8x64xf32>
    %378 = arith.addf %376, %377 : vector<8x64xf32>
    %379 = arith.mulf %372, %329 : vector<8x64xf32>
    %380 = arith.mulf %367, %373 : vector<8x64xf32>
    %381 = arith.addf %379, %380 : vector<8x64xf32>
    %382 = math.tanh %381 : vector<8x64xf32>
    %383 = arith.mulf %378, %382 : vector<8x64xf32>
    %c0_209 = arith.constant 0 : index
    %c0_210 = arith.constant 0 : index
    %384 = vector.load %arg15[%c0_209, %c0_210] : memref<8x64xf32, #tpu.memory_space<vmem>>, vector<8x64xf32>
    tpu.vector_store %arg15[%c0_209, %c0_210], %357 {strides = array<i32>} : memref<8x64xf32, #tpu.memory_space<vmem>>, vector<8x64xf32>,
    %c0_211 = arith.constant 0 : index
    %c0_212 = arith.constant 0 : index
    %385 = vector.load %arg16[%c0_211, %c0_212] : memref<8x64xf32, #tpu.memory_space<vmem>>, vector<8x64xf32>
    tpu.vector_store %arg16[%c0_211, %c0_212], %355 {strides = array<i32>} : memref<8x64xf32, #tpu.memory_space<vmem>>, vector<8x64xf32>,
    %c0_213 = arith.constant 0 : index
    %c0_214 = arith.constant 0 : index
    %386 = vector.load %arg17[%c0_213, %c0_214] : memref<8x64xf32, #tpu.memory_space<vmem>>, vector<8x64xf32>
    tpu.vector_store %arg17[%c0_213, %c0_214], %383 {strides = array<i32>} : memref<8x64xf32, #tpu.memory_space<vmem>>, vector<8x64xf32>,
    %c0_215 = arith.constant 0 : index
    %c0_216 = arith.constant 0 : index
    %387 = vector.load %arg18[%c0_215, %c0_216] : memref<8x64xf32, #tpu.memory_space<vmem>>, vector<8x64xf32>
    tpu.vector_store %arg18[%c0_215, %c0_216], %381 {strides = array<i32>} : memref<8x64xf32, #tpu.memory_space<vmem>>, vector<8x64xf32>,
    %c6_i32 = arith.constant 6 : i32
    %c0_217 = arith.constant 0 : index
    %c0_218 = arith.constant 0 : index
    %388 = vector.load %arg15[%c0_217, %c0_218] : memref<8x64xf32, #tpu.memory_space<vmem>>, vector<8x64xf32>
    %c0_219 = arith.constant 0 : index
    %c0_220 = arith.constant 0 : index
    %389 = vector.load %arg16[%c0_219, %c0_220] : memref<8x64xf32, #tpu.memory_space<vmem>>, vector<8x64xf32>
    %c0_221 = arith.constant 0 : index
    %c0_222 = arith.constant 0 : index
    %390 = vector.load %arg17[%c0_221, %c0_222] : memref<8x64xf32, #tpu.memory_space<vmem>>, vector<8x64xf32>
    %c0_223 = arith.constant 0 : index
    %c0_224 = arith.constant 0 : index
    %391 = vector.load %arg18[%c0_223, %c0_224] : memref<8x64xf32, #tpu.memory_space<vmem>>, vector<8x64xf32>
    %cst_225 = arith.constant dense<0.000000e+00> : vector<8x256xf32>
    %392 = tpu.matmul %390, %14, %cst_225 {dimension_numbers = #tpu.dot_dimension_numbers<[1], [0], [0], [1], [0, 0, 1, 1], [], []>} : vector<8x64xf32>, vector<64x256xf32>, vector<8x256xf32> -> vector<8x256xf32>
    %393 = arith.index_cast %c6_i32 : i32 to index
    %c0_226 = arith.constant 0 : index
    %c0_227 = arith.constant 0 : index
    %394 = vector.load %arg14[%393, %c0_226, %c0_227] : memref<8x8x256xf32, #tpu.memory_space<vmem>>, vector<1x8x256xf32>
    %395 = vector.shape_cast %394 : vector<1x8x256xf32> to vector<8x256xf32>
    %cst_228 = arith.constant dense<0.000000e+00> : vector<8x256xf32>
    %396 = tpu.matmul %388, %12, %cst_228 {dimension_numbers = #tpu.dot_dimension_numbers<[1], [0], [0], [1], [0, 0, 1, 1], [], []>} : vector<8x64xf32>, vector<64x256xf32>, vector<8x256xf32> -> vector<8x256xf32>
    %397 = arith.addf %395, %396 : vector<8x256xf32>
    %398 = math.tanh %397 : vector<8x256xf32>
    %399 = vector.extract_strided_slice %398 {offsets = [0, 0], sizes = [8, 64], strides = [1, 1]} : vector<8x256xf32> to vector<8x64xf32>
    %cst_229 = arith.constant 5.000000e-01 : f32
    %400 = vector.broadcast %cst_229 : f32 to vector<8x64xf32>
    %401 = arith.mulf %400, %399 : vector<8x64xf32>
    %cst_230 = arith.constant 5.000000e-01 : f32
    %402 = vector.broadcast %cst_230 : f32 to vector<8x64xf32>
    %403 = arith.addf %401, %402 : vector<8x64xf32>
    %404 = vector.extract_strided_slice %398 {offsets = [0, 64], sizes = [8, 64], strides = [1, 1]} : vector<8x256xf32> to vector<8x64xf32>
    %cst_231 = arith.constant 5.000000e-01 : f32
    %405 = vector.broadcast %cst_231 : f32 to vector<8x64xf32>
    %406 = arith.mulf %405, %404 : vector<8x64xf32>
    %cst_232 = arith.constant 5.000000e-01 : f32
    %407 = vector.broadcast %cst_232 : f32 to vector<8x64xf32>
    %408 = arith.addf %406, %407 : vector<8x64xf32>
    %409 = vector.extract_strided_slice %398 {offsets = [0, 128], sizes = [8, 64], strides = [1, 1]} : vector<8x256xf32> to vector<8x64xf32>
    %410 = vector.extract_strided_slice %398 {offsets = [0, 192], sizes = [8, 64], strides = [1, 1]} : vector<8x256xf32> to vector<8x64xf32>
    %cst_233 = arith.constant 5.000000e-01 : f32
    %411 = vector.broadcast %cst_233 : f32 to vector<8x64xf32>
    %412 = arith.mulf %411, %410 : vector<8x64xf32>
    %cst_234 = arith.constant 5.000000e-01 : f32
    %413 = vector.broadcast %cst_234 : f32 to vector<8x64xf32>
    %414 = arith.addf %412, %413 : vector<8x64xf32>
    %415 = arith.mulf %408, %389 : vector<8x64xf32>
    %416 = arith.mulf %403, %409 : vector<8x64xf32>
    %417 = arith.addf %415, %416 : vector<8x64xf32>
    %418 = math.tanh %417 : vector<8x64xf32>
    %419 = arith.mulf %414, %418 : vector<8x64xf32>
    %cst_235 = arith.constant dense<0.000000e+00> : vector<8x256xf32>
    %420 = tpu.matmul %419, %13, %cst_235 {dimension_numbers = #tpu.dot_dimension_numbers<[1], [0], [0], [1], [0, 0, 1, 1], [], []>} : vector<8x64xf32>, vector<64x256xf32>, vector<8x256xf32> -> vector<8x256xf32>
    %421 = arith.addf %420, %392 : vector<8x256xf32>
    %422 = vector.broadcast %15 : vector<1x256xf32> to vector<8x256xf32>
    %423 = arith.addf %421, %422 : vector<8x256xf32>
    %424 = math.tanh %423 : vector<8x256xf32>
    %425 = vector.extract_strided_slice %424 {offsets = [0, 0], sizes = [8, 64], strides = [1, 1]} : vector<8x256xf32> to vector<8x64xf32>
    %cst_236 = arith.constant 5.000000e-01 : f32
    %426 = vector.broadcast %cst_236 : f32 to vector<8x64xf32>
    %427 = arith.mulf %426, %425 : vector<8x64xf32>
    %cst_237 = arith.constant 5.000000e-01 : f32
    %428 = vector.broadcast %cst_237 : f32 to vector<8x64xf32>
    %429 = arith.addf %427, %428 : vector<8x64xf32>
    %430 = vector.extract_strided_slice %424 {offsets = [0, 64], sizes = [8, 64], strides = [1, 1]} : vector<8x256xf32> to vector<8x64xf32>
    %cst_238 = arith.constant 5.000000e-01 : f32
    %431 = vector.broadcast %cst_238 : f32 to vector<8x64xf32>
    %432 = arith.mulf %431, %430 : vector<8x64xf32>
    %cst_239 = arith.constant 5.000000e-01 : f32
    %433 = vector.broadcast %cst_239 : f32 to vector<8x64xf32>
    %434 = arith.addf %432, %433 : vector<8x64xf32>
    %435 = vector.extract_strided_slice %424 {offsets = [0, 128], sizes = [8, 64], strides = [1, 1]} : vector<8x256xf32> to vector<8x64xf32>
    %436 = vector.extract_strided_slice %424 {offsets = [0, 192], sizes = [8, 64], strides = [1, 1]} : vector<8x256xf32> to vector<8x64xf32>
    %cst_240 = arith.constant 5.000000e-01 : f32
    %437 = vector.broadcast %cst_240 : f32 to vector<8x64xf32>
    %438 = arith.mulf %437, %436 : vector<8x64xf32>
    %cst_241 = arith.constant 5.000000e-01 : f32
    %439 = vector.broadcast %cst_241 : f32 to vector<8x64xf32>
    %440 = arith.addf %438, %439 : vector<8x64xf32>
    %441 = arith.mulf %434, %391 : vector<8x64xf32>
    %442 = arith.mulf %429, %435 : vector<8x64xf32>
    %443 = arith.addf %441, %442 : vector<8x64xf32>
    %444 = math.tanh %443 : vector<8x64xf32>
    %445 = arith.mulf %440, %444 : vector<8x64xf32>
    %c0_242 = arith.constant 0 : index
    %c0_243 = arith.constant 0 : index
    %446 = vector.load %arg15[%c0_242, %c0_243] : memref<8x64xf32, #tpu.memory_space<vmem>>, vector<8x64xf32>
    tpu.vector_store %arg15[%c0_242, %c0_243], %419 {strides = array<i32>} : memref<8x64xf32, #tpu.memory_space<vmem>>, vector<8x64xf32>,
    %c0_244 = arith.constant 0 : index
    %c0_245 = arith.constant 0 : index
    %447 = vector.load %arg16[%c0_244, %c0_245] : memref<8x64xf32, #tpu.memory_space<vmem>>, vector<8x64xf32>
    tpu.vector_store %arg16[%c0_244, %c0_245], %417 {strides = array<i32>} : memref<8x64xf32, #tpu.memory_space<vmem>>, vector<8x64xf32>,
    %c0_246 = arith.constant 0 : index
    %c0_247 = arith.constant 0 : index
    %448 = vector.load %arg17[%c0_246, %c0_247] : memref<8x64xf32, #tpu.memory_space<vmem>>, vector<8x64xf32>
    tpu.vector_store %arg17[%c0_246, %c0_247], %445 {strides = array<i32>} : memref<8x64xf32, #tpu.memory_space<vmem>>, vector<8x64xf32>,
    %c0_248 = arith.constant 0 : index
    %c0_249 = arith.constant 0 : index
    %449 = vector.load %arg18[%c0_248, %c0_249] : memref<8x64xf32, #tpu.memory_space<vmem>>, vector<8x64xf32>
    tpu.vector_store %arg18[%c0_248, %c0_249], %443 {strides = array<i32>} : memref<8x64xf32, #tpu.memory_space<vmem>>, vector<8x64xf32>,
    %c7_i32 = arith.constant 7 : i32
    %c0_250 = arith.constant 0 : index
    %c0_251 = arith.constant 0 : index
    %450 = vector.load %arg15[%c0_250, %c0_251] : memref<8x64xf32, #tpu.memory_space<vmem>>, vector<8x64xf32>
    %c0_252 = arith.constant 0 : index
    %c0_253 = arith.constant 0 : index
    %451 = vector.load %arg16[%c0_252, %c0_253] : memref<8x64xf32, #tpu.memory_space<vmem>>, vector<8x64xf32>
    %c0_254 = arith.constant 0 : index
    %c0_255 = arith.constant 0 : index
    %452 = vector.load %arg17[%c0_254, %c0_255] : memref<8x64xf32, #tpu.memory_space<vmem>>, vector<8x64xf32>
    %c0_256 = arith.constant 0 : index
    %c0_257 = arith.constant 0 : index
    %453 = vector.load %arg18[%c0_256, %c0_257] : memref<8x64xf32, #tpu.memory_space<vmem>>, vector<8x64xf32>
    %cst_258 = arith.constant dense<0.000000e+00> : vector<8x256xf32>
    %454 = tpu.matmul %452, %14, %cst_258 {dimension_numbers = #tpu.dot_dimension_numbers<[1], [0], [0], [1], [0, 0, 1, 1], [], []>} : vector<8x64xf32>, vector<64x256xf32>, vector<8x256xf32> -> vector<8x256xf32>
    %455 = arith.index_cast %c7_i32 : i32 to index
    %c0_259 = arith.constant 0 : index
    %c0_260 = arith.constant 0 : index
    %456 = vector.load %arg14[%455, %c0_259, %c0_260] : memref<8x8x256xf32, #tpu.memory_space<vmem>>, vector<1x8x256xf32>
    %457 = vector.shape_cast %456 : vector<1x8x256xf32> to vector<8x256xf32>
    %cst_261 = arith.constant dense<0.000000e+00> : vector<8x256xf32>
    %458 = tpu.matmul %450, %12, %cst_261 {dimension_numbers = #tpu.dot_dimension_numbers<[1], [0], [0], [1], [0, 0, 1, 1], [], []>} : vector<8x64xf32>, vector<64x256xf32>, vector<8x256xf32> -> vector<8x256xf32>
    %459 = arith.addf %457, %458 : vector<8x256xf32>
    %460 = math.tanh %459 : vector<8x256xf32>
    %461 = vector.extract_strided_slice %460 {offsets = [0, 0], sizes = [8, 64], strides = [1, 1]} : vector<8x256xf32> to vector<8x64xf32>
    %cst_262 = arith.constant 5.000000e-01 : f32
    %462 = vector.broadcast %cst_262 : f32 to vector<8x64xf32>
    %463 = arith.mulf %462, %461 : vector<8x64xf32>
    %cst_263 = arith.constant 5.000000e-01 : f32
    %464 = vector.broadcast %cst_263 : f32 to vector<8x64xf32>
    %465 = arith.addf %463, %464 : vector<8x64xf32>
    %466 = vector.extract_strided_slice %460 {offsets = [0, 64], sizes = [8, 64], strides = [1, 1]} : vector<8x256xf32> to vector<8x64xf32>
    %cst_264 = arith.constant 5.000000e-01 : f32
    %467 = vector.broadcast %cst_264 : f32 to vector<8x64xf32>
    %468 = arith.mulf %467, %466 : vector<8x64xf32>
    %cst_265 = arith.constant 5.000000e-01 : f32
    %469 = vector.broadcast %cst_265 : f32 to vector<8x64xf32>
    %470 = arith.addf %468, %469 : vector<8x64xf32>
    %471 = vector.extract_strided_slice %460 {offsets = [0, 128], sizes = [8, 64], strides = [1, 1]} : vector<8x256xf32> to vector<8x64xf32>
    %472 = vector.extract_strided_slice %460 {offsets = [0, 192], sizes = [8, 64], strides = [1, 1]} : vector<8x256xf32> to vector<8x64xf32>
    %cst_266 = arith.constant 5.000000e-01 : f32
    %473 = vector.broadcast %cst_266 : f32 to vector<8x64xf32>
    %474 = arith.mulf %473, %472 : vector<8x64xf32>
    %cst_267 = arith.constant 5.000000e-01 : f32
    %475 = vector.broadcast %cst_267 : f32 to vector<8x64xf32>
    %476 = arith.addf %474, %475 : vector<8x64xf32>
    %477 = arith.mulf %470, %451 : vector<8x64xf32>
    %478 = arith.mulf %465, %471 : vector<8x64xf32>
    %479 = arith.addf %477, %478 : vector<8x64xf32>
    %480 = math.tanh %479 : vector<8x64xf32>
    %481 = arith.mulf %476, %480 : vector<8x64xf32>
    %cst_268 = arith.constant dense<0.000000e+00> : vector<8x256xf32>
    %482 = tpu.matmul %481, %13, %cst_268 {dimension_numbers = #tpu.dot_dimension_numbers<[1], [0], [0], [1], [0, 0, 1, 1], [], []>} : vector<8x64xf32>, vector<64x256xf32>, vector<8x256xf32> -> vector<8x256xf32>
    %483 = arith.addf %482, %454 : vector<8x256xf32>
    %484 = vector.broadcast %15 : vector<1x256xf32> to vector<8x256xf32>
    %485 = arith.addf %483, %484 : vector<8x256xf32>
    %486 = math.tanh %485 : vector<8x256xf32>
    %487 = vector.extract_strided_slice %486 {offsets = [0, 0], sizes = [8, 64], strides = [1, 1]} : vector<8x256xf32> to vector<8x64xf32>
    %cst_269 = arith.constant 5.000000e-01 : f32
    %488 = vector.broadcast %cst_269 : f32 to vector<8x64xf32>
    %489 = arith.mulf %488, %487 : vector<8x64xf32>
    %cst_270 = arith.constant 5.000000e-01 : f32
    %490 = vector.broadcast %cst_270 : f32 to vector<8x64xf32>
    %491 = arith.addf %489, %490 : vector<8x64xf32>
    %492 = vector.extract_strided_slice %486 {offsets = [0, 64], sizes = [8, 64], strides = [1, 1]} : vector<8x256xf32> to vector<8x64xf32>
    %cst_271 = arith.constant 5.000000e-01 : f32
    %493 = vector.broadcast %cst_271 : f32 to vector<8x64xf32>
    %494 = arith.mulf %493, %492 : vector<8x64xf32>
    %cst_272 = arith.constant 5.000000e-01 : f32
    %495 = vector.broadcast %cst_272 : f32 to vector<8x64xf32>
    %496 = arith.addf %494, %495 : vector<8x64xf32>
    %497 = vector.extract_strided_slice %486 {offsets = [0, 128], sizes = [8, 64], strides = [1, 1]} : vector<8x256xf32> to vector<8x64xf32>
    %498 = vector.extract_strided_slice %486 {offsets = [0, 192], sizes = [8, 64], strides = [1, 1]} : vector<8x256xf32> to vector<8x64xf32>
    %cst_273 = arith.constant 5.000000e-01 : f32
    %499 = vector.broadcast %cst_273 : f32 to vector<8x64xf32>
    %500 = arith.mulf %499, %498 : vector<8x64xf32>
    %cst_274 = arith.constant 5.000000e-01 : f32
    %501 = vector.broadcast %cst_274 : f32 to vector<8x64xf32>
    %502 = arith.addf %500, %501 : vector<8x64xf32>
    %503 = arith.mulf %496, %453 : vector<8x64xf32>
    %504 = arith.mulf %491, %497 : vector<8x64xf32>
    %505 = arith.addf %503, %504 : vector<8x64xf32>
    %506 = math.tanh %505 : vector<8x64xf32>
    %507 = arith.mulf %502, %506 : vector<8x64xf32>
    %c0_275 = arith.constant 0 : index
    %c0_276 = arith.constant 0 : index
    %508 = vector.load %arg15[%c0_275, %c0_276] : memref<8x64xf32, #tpu.memory_space<vmem>>, vector<8x64xf32>
    tpu.vector_store %arg15[%c0_275, %c0_276], %481 {strides = array<i32>} : memref<8x64xf32, #tpu.memory_space<vmem>>, vector<8x64xf32>,
    %c0_277 = arith.constant 0 : index
    %c0_278 = arith.constant 0 : index
    %509 = vector.load %arg16[%c0_277, %c0_278] : memref<8x64xf32, #tpu.memory_space<vmem>>, vector<8x64xf32>
    tpu.vector_store %arg16[%c0_277, %c0_278], %479 {strides = array<i32>} : memref<8x64xf32, #tpu.memory_space<vmem>>, vector<8x64xf32>,
    %c0_279 = arith.constant 0 : index
    %c0_280 = arith.constant 0 : index
    %510 = vector.load %arg17[%c0_279, %c0_280] : memref<8x64xf32, #tpu.memory_space<vmem>>, vector<8x64xf32>
    tpu.vector_store %arg17[%c0_279, %c0_280], %507 {strides = array<i32>} : memref<8x64xf32, #tpu.memory_space<vmem>>, vector<8x64xf32>,
    %c0_281 = arith.constant 0 : index
    %c0_282 = arith.constant 0 : index
    %511 = vector.load %arg18[%c0_281, %c0_282] : memref<8x64xf32, #tpu.memory_space<vmem>>, vector<8x64xf32>
    tpu.vector_store %arg18[%c0_281, %c0_282], %505 {strides = array<i32>} : memref<8x64xf32, #tpu.memory_space<vmem>>, vector<8x64xf32>,
    %c8_i32 = arith.constant 8 : i32
    %c0_i32_283 = arith.constant 0 : i32
    %512 = arith.cmpi eq, %arg1, %c0_i32_283 : i32
    %513 = arith.extui %512 : i1 to i32
    %c0_i32_284 = arith.constant 0 : i32
    %514 = arith.cmpi ne, %513, %c0_i32_284 : i32
    scf.if %514 {
      %c0_285 = arith.constant 0 : index
      %c0_286 = arith.constant 0 : index
      %515 = vector.load %arg17[%c0_285, %c0_286] : memref<8x64xf32, #tpu.memory_space<vmem>>, vector<8x64xf32>
      %c0_287 = arith.constant 0 : index
      %c0_288 = arith.constant 0 : index
      %516 = vector.load %arg9[%c0_287, %c0_288] : memref<64x32xf32, #tpu.memory_space<vmem>>, vector<64x32xf32>
      %cst_289 = arith.constant dense<0.000000e+00> : vector<8x32xf32>
      %517 = tpu.matmul %515, %516, %cst_289 {dimension_numbers = #tpu.dot_dimension_numbers<[1], [0], [0], [1], [0, 0, 1, 1], [], []>} : vector<8x64xf32>, vector<64x32xf32>, vector<8x32xf32> -> vector<8x32xf32>
      %c0_290 = arith.constant 0 : index
      %c0_291 = arith.constant 0 : index
      %518 = vector.load %arg10[%c0_290, %c0_291] : memref<1x32xf32, #tpu.memory_space<vmem>>, vector<1x32xf32>
      %519 = vector.broadcast %518 : vector<1x32xf32> to vector<8x32xf32>
      %520 = arith.addf %517, %519 : vector<8x32xf32>
      %cst_292 = arith.constant 0.000000e+00 : f32
      %521 = vector.broadcast %cst_292 : f32 to vector<8x32xf32>
      %522 = arith.maximumf %520, %521 : vector<8x32xf32>
      %c0_293 = arith.constant 0 : index
      %c0_294 = arith.constant 0 : index
      %523 = vector.load %arg11[%c0_293, %c0_294] : memref<32x128xf32, #tpu.memory_space<vmem>>, vector<32x128xf32>
      %cst_295 = arith.constant dense<0.000000e+00> : vector<8x128xf32>
      %524 = tpu.matmul %522, %523, %cst_295 {dimension_numbers = #tpu.dot_dimension_numbers<[1], [0], [0], [1], [0, 0, 1, 1], [], []>} : vector<8x32xf32>, vector<32x128xf32>, vector<8x128xf32> -> vector<8x128xf32>
      %c0_296 = arith.constant 0 : index
      %c0_297 = arith.constant 0 : index
      %525 = vector.load %arg12[%c0_296, %c0_297] : memref<1x128xf32, #tpu.memory_space<vmem>>, vector<1x128xf32>
      %526 = vector.broadcast %525 : vector<1x128xf32> to vector<8x128xf32>
      %527 = arith.addf %524, %526 : vector<8x128xf32>
      %c0_298 = arith.constant 0 : index
      %c0_299 = arith.constant 0 : index
      %528 = vector.load %arg13[%c0_298, %c0_299] : memref<8x128xf32, #tpu.memory_space<vmem>>, vector<8x128xf32>
      tpu.vector_store %arg13[%c0_298, %c0_299], %527 {strides = array<i32>} : memref<8x128xf32, #tpu.memory_space<vmem>>, vector<8x128xf32>,
    } else {
    }
    return
  }
  func.func @transform_0(%arg0: i32, %arg1: i32) -> (i32, i32, i32) {
    %c0_i32 = arith.constant 0 : i32
    %c0_i32_0 = arith.constant 0 : i32
    return %arg1, %arg0, %c0_i32 : i32, i32, i32
  }
  func.func @transform_1(%arg0: i32, %arg1: i32) -> (i32, i32) {
    %c0_i32 = arith.constant 0 : i32
    %c0_i32_0 = arith.constant 0 : i32
    %c0_i32_1 = arith.constant 0 : i32
    return %c0_i32, %c0_i32_0 : i32, i32
  }
  func.func @transform_2(%arg0: i32, %arg1: i32) -> (i32, i32) {
    %c0_i32 = arith.constant 0 : i32
    %c0_i32_0 = arith.constant 0 : i32
    %c0_i32_1 = arith.constant 0 : i32
    return %c0_i32, %c0_i32_0 : i32, i32
  }
  func.func @transform_3(%arg0: i32, %arg1: i32) -> (i32, i32) {
    %c0_i32 = arith.constant 0 : i32
    %c0_i32_0 = arith.constant 0 : i32
    %c0_i32_1 = arith.constant 0 : i32
    return %c0_i32, %c0_i32_0 : i32, i32
  }
  func.func @transform_4(%arg0: i32, %arg1: i32) -> (i32, i32) {
    %c0_i32 = arith.constant 0 : i32
    %c0_i32_0 = arith.constant 0 : i32
    %c0_i32_1 = arith.constant 0 : i32
    return %c0_i32, %c0_i32_0 : i32, i32
  }
  func.func @transform_5(%arg0: i32, %arg1: i32) -> (i32, i32) {
    %c0_i32 = arith.constant 0 : i32
    %c0_i32_0 = arith.constant 0 : i32
    %c0_i32_1 = arith.constant 0 : i32
    return %c0_i32, %c0_i32_0 : i32, i32
  }
  func.func @transform_6(%arg0: i32, %arg1: i32) -> (i32, i32) {
    %c0_i32 = arith.constant 0 : i32
    %c0_i32_0 = arith.constant 0 : i32
    %c0_i32_1 = arith.constant 0 : i32
    return %c0_i32, %c0_i32_0 : i32, i32
  }
  func.func @transform_7(%arg0: i32, %arg1: i32) -> (i32, i32) {
    %c0_i32 = arith.constant 0 : i32
    %c0_i32_0 = arith.constant 0 : i32
    %c0_i32_1 = arith.constant 0 : i32
    return %c0_i32, %c0_i32_0 : i32, i32
  }
  func.func @transform_8(%arg0: i32, %arg1: i32) -> (i32, i32) {
    %c0_i32 = arith.constant 0 : i32
    %c0_i32_0 = arith.constant 0 : i32
    %c0_i32_1 = arith.constant 0 : i32
    return %c0_i32, %c0_i32_0 : i32, i32
  }
  func.func @transform_9(%arg0: i32, %arg1: i32) -> (i32, i32) {
    %c0_i32 = arith.constant 0 : i32
    %c0_i32_0 = arith.constant 0 : i32
    %c0_i32_1 = arith.constant 0 : i32
    return %c0_i32, %c0_i32_0 : i32, i32
  }
  func.func @transform_10(%arg0: i32, %arg1: i32) -> (i32, i32) {
    %c0_i32 = arith.constant 0 : i32
    %c0_i32_0 = arith.constant 0 : i32
    %c0_i32_1 = arith.constant 0 : i32
    return %c0_i32, %c0_i32_0 : i32, i32
  }
  func.func @transform_11(%arg0: i32, %arg1: i32) -> (i32, i32) {
    %c0_i32 = arith.constant 0 : i32
    %c0_i32_0 = arith.constant 0 : i32
    return %arg0, %c0_i32 : i32, i32
  }
}

</mosaic_0001>

<bundles_post_ra>
// kernel: storm_predictor_forward.1
= control target key start
LH: loop header
LB: loop body
LE: loop exit
PB: predicated region body
PF: predicated region fallthrough
CT: control target
= control target key end

     0   :  { %16 = vsyncpa [#allocation8], 0  ;;  %s4194_s0 = inlined_call_operand.vmem [shape: f32[8,8,8], index: 0, kind: input, shape index: {}]   ;;  %s4195_s1 = inlined_call_operand.vmem [shape: f32[8,256], index: 1, kind: input, shape index: {}]   ;;  %s4196_s2 = inlined_call_operand.vmem [shape: f32[1,256], index: 2, kind: input, shape index: {}]   ;;  %s4197_s3 = inlined_call_operand.vmem [shape: f32[64,256], index: 3, kind: input, shape index: {}]   ;;  %s4198_s4 = inlined_call_operand.hbm [shape: f32[64,256], index: 4, kind: input, shape index: {}]   ;;  %s4199_s5 = inlined_call_operand.hbm [shape: f32[64,256], index: 5, kind: input, shape index: {}]   ;;  %s4200_s6 = inlined_call_operand.vmem [shape: f32[1,256], index: 6, kind: input, shape index: {}]   ;;  %s4201_s7 = inlined_call_operand.vmem [shape: f32[64,32], index: 7, kind: input, shape index: {}]   ;;  %s4202_s8 = inlined_call_operand.vmem [shape: f32[1,32], index: 8, kind: input, shape index: {}]   ;;  %s4203_s9 = inlined_call_operand.vmem [shape: f32[32,128], index: 9, kind: input, shape index: {}]   ;;  %s4204_s10 = inlined_call_operand.vmem [shape: f32[1,128], index: 10, kind: input, shape index: {}]   ;;  %s4205_s11 = inlined_call_operand.vmem [shape: f32[8,128], index: 11, kind: output, shape index: {}]  }
   0x1   :  { %17 = vsyncpa [#allocation10], 0  ;;  %s3091_s17 = smov [#allocation7]  }
   0x2   :  { %s31_s18 = sshll.u32 %s3091_s17, 4  ;;  %s32_s18 = int_to_ptr.vmem [resolvable:$true] %s31_s18 }
   0x3   :  { %s3055_s19 = scalar_lea.vmem %s32_s18, 2048  ;;  %p3060_p1 = scmp.lt.s32.totalorder %s32_s18, %s32_s18 }
   0x4   :  { %p3056_p0 = scmp.ne.s32.totalorder %s32_s18, %s3055_s19  ;;  %p3061_p2 = scmp.lt.s32.totalorder %s3055_s19, %s3055_s19 }
   0x6   :  { %p3062_p3 = por %p3061_p2, %p3060_p1 }
   0x8   :  { %p3063_p4 = pnand %p3062_p3, %p3056_p0 }
   0xa   :  { %3066 = shalt.err (!%p3063_p4)
}
   0xb   :  { %s3092_s20 = smov 256   ;;  %s3093_s21 = smov 16  }
   0xc   :  { %37 = dma.hbm_to_vmem [thread:$0]  %s4198_s4, 2048, %s32_s18, [#allocation8], %s3092_s20, %s3092_s20, %s3093_s21  }
   0xd   :  { %s3094_s24 = smov [#allocation9]  }
   0xe   :  { %s43_s25 = sshll.u32 %s3094_s24, 4  ;;  %s44_s25 = int_to_ptr.vmem [resolvable:$true] %s43_s25 }
   0xf   :  { %s3075_s26 = scalar_lea.vmem %s44_s25, 2048  ;;  %p3080_p6 = scmp.lt.s32.totalorder %s44_s25, %s44_s25 }
  0x10   :  { %p3076_p5 = scmp.ne.s32.totalorder %s44_s25, %s3075_s26  ;;  %p3081_p7 = scmp.lt.s32.totalorder %s3075_s26, %s3075_s26 }
  0x12   :  { %p3082_p8 = por %p3081_p7, %p3080_p6 }
  0x14   :  { %p3083_p9 = pnand %p3082_p8, %p3076_p5 }
  0x16   :  { %3086 = shalt.err (!%p3083_p9)
}
  0x17   :  { %49 = dma.hbm_to_vmem [thread:$0]  %s4199_s5, 2048, %s44_s25, [#allocation10], %s3092_s20, %s3092_s20, %s3093_s21  }
  0x18   :  { %3087 = dma.done.wait [#allocation8], 2048  }
  0x19   :  { %3088 = vsyncadd [#allocation8], 4294965248 }
  0x1a   :  { %3089 = dma.done.wait [#allocation10], 2048  }
  0x1b   :  { %3090 = vsyncadd [#allocation10], 4294965248  ;;  %vm70_vm0 = vcmask 523264   ;;  %v4214_v0 = vmov 0.0   ;;  %v3174_v1 = vld [vmem:[#allocation9 + $0x78] sm:$0xff]  ;;  %v3176_v2 = vld [vmem:[#allocation9 + $0x70] sm:$0xff]  ;;  %v87_v39 = vlaneseq }
  0x1c   :  { %372 = vmatprep.mubr.f32.mxu1 %v4214_v0  ;;  %73 = vst.msk [vmem:[#allocation5] sm:$0xff] %vm70_vm0, %v4214_v0  ;;  %71 = vst.msk [vmem:[#allocation3] sm:$0xff] %vm70_vm0, %v4214_v0  ;;  %186 = vmatprep.mubr.f32.mxu0 %v4214_v0  ;;  %v3178_v3 = vld [vmem:[#allocation9 + $0x68] sm:$0xff]  ;;  %v3181_v4 = vld [vmem:[#allocation9 + $0x60] sm:$0xff]  ;;  %vm97_vm1 = vcmask 64512   ;;  %vm3097_vm2 = vmmov 0  }
  0x1d   :  { %72 = vst.msk [vmem:[#allocation4] sm:$0xff] %vm70_vm0, %v4214_v0  ;;  %74 = vst.msk [vmem:[#allocation6] sm:$0xff] %vm70_vm0, %v4214_v0  ;;  %324 = vmatprep.subr.mxu1 %v3174_v1  ;;  %v3184_v5 = vld [vmem:[#allocation9 + $0x58] sm:$0xff]  ;;  %v3187_v6 = vld [vmem:[#allocation9 + $0x50] sm:$0xff]  ;;  %v3350_v40 = vshrl.u32 %v87_v39, 7  ;;  %vm2735_vm3 = vcmask 261120  }
  0x1e   :  { %325 = vmatpush1.msra.mxu1 %v3176_v2  ;;  %v3190_v7 = vld [vmem:[#allocation9 + $0x48] sm:$0xff]  ;;  %v3193_v8 = vld [vmem:[#allocation9 + $0x40] sm:$0xff]  ;;  %v3196_v9 = vld [vmem:[#allocation9 + $0x38] sm:$0xff] }
  0x1f   :  { %326 = vmatprep.subr.mxu1 %v3178_v3  ;;  %v3199_v10 = vld [vmem:[#allocation9 + $0x30] sm:$0xff]  ;;  %v3202_v11 = vld [vmem:[#allocation9 + $0x28] sm:$0xff]  ;;  %v3205_v12 = vld [vmem:[#allocation9 + $0x20] sm:$0xff]  ;;  %v4207_v41 = vsub.s32 0, %v3350_v40  ;;  %v4206_v44 = vsub.s32 1, %v3350_v40 }
  0x20   :  { %327 = vmatpush1.msra.mxu1 %v3181_v4  ;;  %4237 = vst [vmem:[#allocation13_spill] sm:$0xff] %v3205_v12  ;;  %v84_v13 = vld [vmem:[%s4195_s1 + $0x8] sm:$0xff]  ;;  %v83_v14 = vld [vmem:[%s4195_s1] sm:$0xff]  ;;  %v3223_v18 = vld [vmem:[#allocation9 + $0x8] sm:$0xff]  ;;  %s3096_s1 = smov 64  }
  0x21   :  { %328 = vmatprep.subr.mxu1 %v3184_v5  ;;  %v3214_v15 = vld [vmem:[#allocation9 + $0x18] sm:$0xff]  ;;  %152 = vmatprep.subr.mxu0 %v84_v13  ;;  %v75_v16 = vld [vmem:[%s4194_s0] sm:$0xff]  ;;  %4240 = vst [vmem:[#allocation16_spill] sm:$0xff] %v3223_v18  ;;  %v3227_v20 = vld [vmem:[#allocation9] sm:$0xff] }
  0x22   :  { %329 = vmatpush1.msra.mxu1 %v3187_v6  ;;  %4238 = vst [vmem:[#allocation14_spill] sm:$0xff] %v3214_v15  ;;  %v3220_v17 = vld [vmem:[#allocation9 + $0x10] sm:$0xff]  ;;  %153 = vmatpush1.msra.mxu0 %v83_v14  ;;  %4241 = vst [vmem:[#allocation17_spill] sm:$0xff] %v3227_v20  ;;  %v3234_v22 = vld [vmem:[%s4197_s3 + $0x78] sm:$0xff] }
  0x23   :  { %330 = vmatprep.subr.mxu1 %v3190_v7  ;;  %4239 = vst [vmem:[#allocation15_spill] sm:$0xff] %v3220_v17  ;;  %2816 = vmatmul.mubr.msk.f32.vlgmr.msra.gmra.mxu0 %vm97_vm1, %v75_v16  ;;  %v302_v21 = vld [vmem:[#allocation5] sm:$0xff]  ;;  %4242 = vst [vmem:[#allocation18_spill] sm:$0xff] %v3234_v22  ;;  %v3241_v23 = vld [vmem:[%s4197_s3 + $0x70] sm:$0xff] }
  0x24   :  { %331 = vmatpush1.msra.mxu1 %v3193_v8  ;;  %v301_v19 = vld [vmem:[#allocation4] sm:$0xff]  ;;  %192 = vmatprep.mubr.f32.mxu0 %v4214_v0  ;;  %v3247_v24 = vld [vmem:[%s4197_s3 + $0x68] sm:$0xff]  ;;  %v3254_v25 = vld [vmem:[%s4197_s3 + $0x60] sm:$0xff] }
  0x25   :  { %332 = vmatprep.subr.mxu1 %v3196_v9  ;;  %464 = vrot.lane.b32.xlu0 %v301_v19, %s3096_s1  ;;  %v3260_v26 = vld [vmem:[%s4197_s3 + $0x58] sm:$0xff]  ;;  %v3267_v27 = vld [vmem:[%s4197_s3 + $0x50] sm:$0xff]  ;;  %v3273_v28 = vld [vmem:[%s4197_s3 + $0x48] sm:$0xff] }
  0x26   :  { %333 = vmatpush1.msra.mxu1 %v3199_v10  ;;  %v3279_v29 = vld [vmem:[%s4197_s3 + $0x40] sm:$0xff]  ;;  %v3285_v30 = vld [vmem:[%s4197_s3 + $0x38] sm:$0xff]  ;;  %v3291_v31 = vld [vmem:[%s4197_s3 + $0x30] sm:$0xff] }
  0x27   :  { %334 = vmatprep.subr.mxu1 %v3202_v11  ;;  %v3297_v32 = vld [vmem:[%s4197_s3 + $0x28] sm:$0xff]  ;;  %v3303_v33 = vld [vmem:[%s4197_s3 + $0x20] sm:$0xff]  ;;  %v3309_v34 = vld [vmem:[%s4197_s3 + $0x18] sm:$0xff] }
  0x28   :  { %335 = vmatpush1.msra.mxu1 %v3205_v12  ;;  %v3315_v35 = vld [vmem:[%s4197_s3 + $0x10] sm:$0xff]  ;;  %v3321_v36 = vld [vmem:[%s4197_s3 + $0x8] sm:$0xff]  ;;  %v3327_v37 = vld [vmem:[%s4197_s3] sm:$0xff] }
  0x29   :  { %336 = vmatprep.subr.mxu1 %v3214_v15  ;;  %v300_v38 = vld [vmem:[#allocation3] sm:$0xff]  ;;  %v85_v42 = vld [vmem:[%s4196_s2] sm:$0x3]  ;;  %v3372_v61 = vld [vmem:[#allocation7 + $0x78] sm:$0xff] }
  0x2a   :  { %337 = vmatpush1.msra.mxu1 %v3220_v17  ;;  %v3358_v43 = vrot.slane %v85_v42, %v4207_v41  ;;  %v3366_v48 = vrot.slane %v85_v42, %v4206_v44  ;;  %4245 = vst [vmem:[#allocation21_spill] sm:$0xff] %v3372_v61  ;;  %v3374_v62 = vld [vmem:[#allocation7 + $0x70] sm:$0xff]  ;;  %v76_v63 = vld [vmem:[%s4194_s0 + $0x8] sm:$0xff]  ;;  %497 = vmatprep.subr.mxu0 %v3372_v61  ;;  %v3381_v13 = vld [vmem:[#allocation7 + $0x68] sm:$0xff] }
  0x2b   :  { %338 = vmatprep.subr.mxu1 %v3223_v18  ;;  %2817 = vmatmul.mubr.msk.f32.gmra.mxu0 %vm97_vm1, %v76_v63  ;;  %v3383_v14 = vld [vmem:[#allocation7 + $0x60] sm:$0xff]  ;;  %v3390_v19 = vld [vmem:[#allocation7 + $0x58] sm:$0xff]  ;;  %v78_v42 = vld [vmem:[%s4194_s0 + $0x18] sm:$0xff] }
  0x2c   :  { %339 = vmatpush1.msra.mxu1 %v3227_v20  ;;  %4243 = vst [vmem:[#allocation19_spill] sm:$0xff] %v3358_v43  ;;  %4244 = vst [vmem:[#allocation20_spill] sm:$0xff] %v3366_v48  ;;  %498 = vmatpush1.msra.mxu0 %v3374_v62  ;;  %v77_v16 = vld [vmem:[%s4194_s0 + $0x10] sm:$0xff]  ;;  %v82_v63 = vld [vmem:[%s4194_s0 + $0x38] sm:$0xff] }
  0x2d   :  { %2824 = vmatmul.mubr.msk.f32.vlgmr.msra.gmra.mxu1 %vm70_vm0, %v302_v21  ;;  %400 = vmatprep.subr.mxu1 %v3234_v22  ;;  %v3393_v21 = vld [vmem:[#allocation7 + $0x50] sm:$0xff]  ;;  %v3401_v39 = vld [vmem:[#allocation7 + $0x40] sm:$0xff]  ;;  %v303_v41 = vld [vmem:[#allocation6] sm:$0xff] }
  0x2e   :  { %401 = vmatpush1.msra.mxu1 %v3241_v23  ;;  %448 = vmatprep.mubr.f32.mxu1 %v4214_v0 }
  0x2f   :  { %402 = vmatprep.subr.mxu1 %v3247_v24  ;;  %198 = vmatprep.mubr.f32.mxu0 %v4214_v0 }
  0x30   :  { %403 = vmatpush1.msra.mxu1 %v3254_v25  ;;  %499 = vmatprep.subr.mxu0 %v3381_v13 }
  0x31   :  { %404 = vmatprep.subr.mxu1 %v3260_v26  ;;  %500 = vmatpush1.msra.mxu0 %v3383_v14 }
  0x32   :  { %405 = vmatpush1.msra.mxu1 %v3267_v27  ;;  %2818 = vmatmul.mubr.msk.f32.gmra.mxu0 %vm97_vm1, %v77_v16 }
  0x33   :  { %406 = vmatprep.subr.mxu1 %v3273_v28  ;;  %501 = vmatprep.subr.mxu0 %v3390_v19 }
  0x34   :  { %407 = vmatpush1.msra.mxu1 %v3279_v29  ;;  %502 = vmatpush1.msra.mxu0 %v3393_v21 }
  0x35   :  { %408 = vmatprep.subr.mxu1 %v3285_v30  ;;  %204 = vmatprep.mubr.f32.mxu0 %v4214_v0 }
  0x36   :  { %409 = vmatpush1.msra.mxu1 %v3291_v31  ;;  %2819 = vmatmul.mubr.msk.f32.gmra.mxu0 %vm97_vm1, %v78_v42 }
  0x37   :  { %410 = vmatprep.subr.mxu1 %v3297_v32  ;;  %210 = vmatprep.mubr.f32.mxu0 %v4214_v0 }
  0x38   :  { %411 = vmatpush1.msra.mxu1 %v3303_v33 }
  0x39   :  { %412 = vmatprep.subr.mxu1 %v3309_v34 }
  0x3a   :  { %413 = vmatpush1.msra.mxu1 %v3315_v35 }
  0x3b   :  { %414 = vmatprep.subr.mxu1 %v3321_v36 }
  0x3c   :  { %415 = vmatpush1.msra.mxu1 %v3327_v37 }
  0x3d   :  { %2825 = vmatmul.mubr.msk.f32.vlgmr.msra.gmra.mxu1 %vm70_vm0, %v300_v38  ;;  %624 = vmatprep.subr.mxu1 %v3174_v1  ;;  %v3397_v38 = vld [vmem:[#allocation7 + $0x48] sm:$0xff] }
  0x3e   :  { %625 = vmatpush1.msra.mxu1 %v3176_v2  ;;  %672 = vmatprep.mubr.f32.mxu1 %v4214_v0 }
  0x3f   :  { %626 = vmatprep.subr.mxu1 %v3178_v3  ;;  %503 = vmatprep.subr.mxu0 %v3397_v38 }
  0x40   :  { %627 = vmatpush1.msra.mxu1 %v3181_v4  ;;  %504 = vmatpush1.msra.mxu0 %v3401_v39 }
  0x41   :  { %628 = vmatprep.subr.mxu1 %v3184_v5 }
  0x42   :  { %629 = vmatpush1.msra.mxu1 %v3187_v6 }
  0x43   :  { %630 = vmatprep.subr.mxu1 %v3190_v7 }
  0x44   :  { %631 = vmatpush1.msra.mxu1 %v3193_v8 }
  0x45   :  { %632 = vmatprep.subr.mxu1 %v3196_v9 }
  0x46   :  { %633 = vmatpush1.msra.mxu1 %v3199_v10 }
  0x47   :  { %634 = vmatprep.subr.mxu1 %v3202_v11 }
  0x48   :  { %635 = vmatpush1.msra.mxu1 %v3205_v12 }
  0x49   :  { %636 = vmatprep.subr.mxu1 %v3214_v15 }
  0x4a   :  { %637 = vmatpush1.msra.mxu1 %v3220_v17 }
  0x4b   :  { %638 = vmatprep.subr.mxu1 %v3223_v18 }
  0x4c   :  { %639 = vmatpush1.msra.mxu1 %v3227_v20 }
  0x4d   :  { %798 = vmatprep.subr.mxu1 %v3372_v61 }
  0x97   :  { %v465_v16 = vpop.permute.xlu0 %464 }
  0xe3   :  { %v188_v46 = vpop.f32.mrf.mxu0 }
  0xe4   :  { %v189_v47 = vadd.f32 %v188_v46, %v3358_v43  ;;  %v3408_v46 = vld [vmem:[#allocation7 + $0x38] sm:$0xff] }
  0xe5   :  { %v190_v50 = vpop.f32.mrf.mxu0  ;;  %505 = vmatprep.subr.mxu0 %v3408_v46 }
  0xe6   :  { %v191_v52 = vadd.f32 %v190_v50, %v3366_v48  ;;  %v3414_v50 = vld [vmem:[#allocation7 + $0x28] sm:$0xff] }
  0xed   :  { %v3361_v45 = vpop.f32.mrf.mxu1 }
  0xef   :  { %v3368_v49 = vpop.f32.mrf.mxu1 }
  0xfd   :  { %v450_v51 = vpop.f32.mrf.mxu1 }
  0xfe   :  { %v455_v53 = vadd.f32 %v450_v51, %v189_v47  ;;  %v3411_v47 = vld [vmem:[#allocation7 + $0x30] sm:$0xff]  ;;  %v3418_v51 = vld [vmem:[#allocation7 + $0x20] sm:$0xff] }
  0xff   :  { %v452_v54 = vpop.f32.mrf.mxu1  ;;  %506 = vmatpush1.msra.mxu0 %v3411_v47 }
 0x100   :  { %2903 = vtanh.f32 %v455_v53  ;;  %v456_v55 = vadd.f32 %v452_v54, %v191_v52  ;;  %v79_v52 = vld [vmem:[%s4194_s0 + $0x20] sm:$0xff]  ;;  %v3425_v53 = vld [vmem:[#allocation7 + $0x18] sm:$0xff]  ;;  %507 = vmatprep.subr.mxu0 %v3414_v50 }
 0x101   :  { %v3428_v54 = vld [vmem:[#allocation7 + $0x10] sm:$0xff]  ;;  %508 = vmatpush1.msra.mxu0 %v3418_v51 }
 0x102   :  { %2905 = vtanh.f32 %v456_v55  ;;  %v3431_v55 = vld [vmem:[#allocation7 + $0x8] sm:$0xff]  ;;  %2820 = vmatmul.mubr.msk.f32.gmra.mxu0 %vm97_vm1, %v79_v52  ;;  %509 = vmatprep.subr.mxu0 %v3425_v53 }
 0x103   :  { %4246 = vst [vmem:[#allocation22_spill] sm:$0xff] %v3431_v55  ;;  %216 = vmatprep.mubr.f32.mxu0 %v4214_v0  ;;  %510 = vmatpush1.msra.mxu0 %v3428_v54 }
 0x104   :  { %511 = vmatprep.subr.mxu0 %v3431_v55 }
 0x10d   :  { %v2904_v56 = vpop.eup %2903 }
 0x10e   :  { %v459_v57 = vmul.f32 0.5, %v2904_v56  ;;  %v3435_v56 = vld [vmem:[#allocation7] sm:$0xff] }
 0x10f   :  { %v2906_v59 = vpop.eup %2905  ;;  %4247 = vst [vmem:[#allocation23_spill] sm:$0xff] %v3435_v56  ;;  %512 = vmatpush1.msra.mxu0 %v3435_v56 }
 0x110   :  { %v460_v58 = vadd.f32 0.5, %v459_v57  ;;  %v80_v57 = vld [vmem:[%s4194_s0 + $0x28] sm:$0xff]  ;;  %701 = vmatprep.subr.mxu0 %v3234_v22  ;;  %v461_v44 = vmul.f32 0.5, %v2906_v59 }
 0x111   :  { %2821 = vmatmul.mubr.msk.f32.gmra.mxu0 %vm97_vm1, %v80_v57 }
 0x112   :  { %v468_v60 = vmul.f32 %v2906_v59, %v460_v58  ;;  %222 = vmatprep.mubr.f32.mxu0 %v4214_v0  ;;  %v467_v42 = vmul.f32 %v465_v16, %v460_v58  ;;  %v462_v22 = vadd.f32 0.5, %v461_v44  ;;  %v194_v58 = vpop.f32.mrf.mxu0 }
 0x114   :  { %470 = vrot.lane.b32.xlu0 %v468_v60, %s3096_s1  ;;  %v81_v60 = vld [vmem:[%s4194_s0 + $0x30] sm:$0xff]  ;;  %v196_v59 = vpop.f32.mrf.mxu0 }
 0x115   :  { %2822 = vmatmul.mubr.msk.f32.gmra.mxu0 %vm97_vm1, %v81_v60 }
 0x116   :  { %228 = vmatprep.mubr.f32.mxu0 %v4214_v0 }
 0x118   :  { %572 = vrot.lane.b32.xlu0 %v303_v41, %s3096_s1 }
 0x119   :  { %2823 = vmatmul.mubr.msk.f32.gmra.mxu0 %vm97_vm1, %v82_v63 }
 0x11a   :  { %545 = vmatprep.mubr.f32.mxu0 %v4214_v0 }
 0x186   :  { %v471_v52 = vpop.permute.xlu0 %470 }
 0x187   :  { %v473_v57 = vadd.f32 %v471_v52, %v467_v42 }
 0x189   :  { %2907 = vtanh.f32 %v473_v57 }
 0x196   :  { %v2908_v60 = vpop.eup %2907 }
 0x197   :  { %v475_v56 = vmul.f32 %v2908_v60, %v462_v22 }
 0x199   :  { %477 = vrot.lane.b32.xlu1 %v475_v56, %s3096_s1 }
 0x19d   :  { %587 = vrot.lane.b32.xlu1 %v473_v57, %s3096_s1 }
 0x20b   :  { %v478_v55 = vpop.permute.xlu1 %477 }
 0x20c   :  { %585 = vst.msk [vmem:[#allocation3] sm:$0xff] %vm70_vm0, %v478_v55  ;;  %2826 = vmatmul.mubr.msk.f32.vlgmr.msra.gmra.mxu0 %vm70_vm0, %v478_v55  ;;  %v3499_v55 = vpop.f32.mrf.mxu0 }
 0x20d   :  { %702 = vmatpush1.msra.mxu0 %v3241_v23  ;;  %749 = vmatprep.mubr.f32.mxu0 %v4214_v0  ;;  %4248 = vst [vmem:[#allocation24_spill] sm:$0xff] %v3499_v55 }
 0x20e   :  { %703 = vmatprep.subr.mxu0 %v3247_v24  ;;  %v3501_v56 = vpop.f32.mrf.mxu0 }
 0x20f   :  { %704 = vmatpush1.msra.mxu0 %v3254_v25  ;;  %v588_v41 = vpop.permute.xlu1 %587  ;;  %4249 = vst [vmem:[#allocation25_spill] sm:$0xff] %v3501_v56 }
 0x210   :  { %705 = vmatprep.subr.mxu0 %v3260_v26  ;;  %590 = vst.msk [vmem:[#allocation4] sm:$0xff] %vm70_vm0, %v588_v41  ;;  %v3503_v63 = vpop.f32.mrf.mxu0 }
 0x211   :  { %706 = vmatpush1.msra.mxu0 %v3267_v27  ;;  %4250 = vst [vmem:[#allocation26_spill] sm:$0xff] %v3503_v63 }
 0x212   :  { %707 = vmatprep.subr.mxu0 %v3273_v28  ;;  %v3505_v16 = vpop.f32.mrf.mxu0 }
 0x213   :  { %708 = vmatpush1.msra.mxu0 %v3279_v29  ;;  %v601_v44 = vld [vmem:[#allocation3] sm:$0xff]  ;;  %4251 = vst [vmem:[#allocation27_spill] sm:$0xff] %v3505_v16 }
 0x214   :  { %709 = vmatprep.subr.mxu0 %v3285_v30  ;;  %v3507_v42 = vpop.f32.mrf.mxu0 }
 0x215   :  { %710 = vmatpush1.msra.mxu0 %v3291_v31  ;;  %4252 = vst [vmem:[#allocation28_spill] sm:$0xff] %v3507_v42  ;;  %v4260_v42 = vsub.s32 0, %v3350_v40 }
 0x216   :  { %711 = vmatprep.subr.mxu0 %v3297_v32  ;;  %v3509_v52 = vpop.f32.mrf.mxu0 }
 0x217   :  { %712 = vmatpush1.msra.mxu0 %v3303_v33  ;;  %v602_v22 = vld [vmem:[#allocation4] sm:$0xff]  ;;  %4253 = vst [vmem:[#allocation29_spill] sm:$0xff] %v3509_v52 }
 0x218   :  { %713 = vmatprep.subr.mxu0 %v3309_v34  ;;  %765 = vrot.lane.b32.xlu0 %v602_v22, %s3096_s1  ;;  %v3511_v57 = vpop.f32.mrf.mxu0 }
 0x219   :  { %714 = vmatpush1.msra.mxu0 %v3315_v35  ;;  %4254 = vst [vmem:[#allocation30_spill] sm:$0xff] %v3511_v57 }
 0x21a   :  { %715 = vmatprep.subr.mxu0 %v3321_v36  ;;  %v3513_v60 = vpop.f32.mrf.mxu0 }
 0x21b   :  { %716 = vmatpush1.msra.mxu0 %v3327_v37  ;;  %4255 = vst [vmem:[#allocation31_spill] sm:$0xff] %v3513_v60  ;;  %v4261_v60 = vsub.s32 1, %v3350_v40 }
 0x21c   :  { %2828 = vmatmul.mubr.msk.f32.vlgmr.msra.gmra.mxu0 %vm70_vm0, %v601_v44  ;;  %914 = vmatprep.subr.mxu0 %v3174_v1  ;;  %v3515_v41 = vpop.f32.mrf.mxu0 }
 0x21d   :  { %915 = vmatpush1.msra.mxu0 %v3176_v2  ;;  %962 = vmatprep.mubr.f32.mxu0 %v4214_v0  ;;  %4256 = vst [vmem:[#allocation32_spill] sm:$0xff] %v3515_v41  ;;  %v299_v0 = vld [vmem:[%s4200_s6] sm:$0x3] }
 0x21e   :  { %916 = vmatprep.subr.mxu0 %v3178_v3  ;;  %v3517_v22 = vpop.f32.mrf.mxu0  ;;  %v3528_v16 = vrot.slane %v299_v0, %v4260_v42  ;;  %v3533_v41 = vrot.slane %v299_v0, %v4261_v60 }
 0x21f   :  { %917 = vmatpush1.msra.mxu0 %v3181_v4  ;;  %4257 = vst [vmem:[#allocation33_spill] sm:$0xff] %v3517_v22 }
 0x220   :  { %918 = vmatprep.subr.mxu0 %v3184_v5  ;;  %v3519_v44 = vpop.f32.mrf.mxu0 }
 0x221   :  { %919 = vmatpush1.msra.mxu0 %v3187_v6  ;;  %4258 = vst [vmem:[#allocation34_spill] sm:$0xff] %v3519_v44 }
 0x222   :  { %920 = vmatprep.subr.mxu0 %v3190_v7  ;;  %v3524_v63 = vpop.f32.mrf.mxu0 }
 0x223   :  { %921 = vmatpush1.msra.mxu0 %v3193_v8  ;;  %4259 = vst [vmem:[#allocation35_spill] sm:$0xff] %v3524_v63  ;;  %v195_v63 = vadd.f32 %v194_v58, %v3358_v43 }
 0x224   :  { %922 = vmatprep.subr.mxu0 %v3196_v9 }
 0x225   :  { %923 = vmatpush1.msra.mxu0 %v3199_v10 }
 0x226   :  { %924 = vmatprep.subr.mxu0 %v3202_v11 }
 0x227   :  { %925 = vmatpush1.msra.mxu0 %v3205_v12 }
 0x228   :  { %926 = vmatprep.subr.mxu0 %v3214_v15 }
 0x229   :  { %927 = vmatpush1.msra.mxu0 %v3220_v17 }
 0x22a   :  { %928 = vmatprep.subr.mxu0 %v3223_v18 }
 0x22b   :  { %929 = vmatpush1.msra.mxu0 %v3227_v20 }
 0x22c   :  { %1088 = vmatprep.subr.mxu0 %v3372_v61  ;;  %v197_v61 = vadd.f32 %v196_v59, %v3366_v48  ;;  %v573_v59 = vpop.permute.xlu0 %572 }
 0x2cc   :  { %v547_v52 = vpop.f32.mrf.mxu0 }
 0x2cd   :  { %v548_v57 = vadd.f32 %v547_v52, %v3361_v45 }
 0x2ce   :  { %v549_v22 = vpop.f32.mrf.mxu0 }
 0x2cf   :  { %v563_v44 = vadd.f32 %v3528_v16, %v548_v57  ;;  %v550_v56 = vadd.f32 %v549_v22, %v3368_v49 }
 0x2d1   :  { %2909 = vtanh.f32 %v563_v44  ;;  %v564_v55 = vadd.f32 %v3533_v41, %v550_v56 }
 0x2d3   :  { %2911 = vtanh.f32 %v564_v55 }
 0x2dc   :  { %v751_v42 = vpop.f32.mrf.mxu0 }
 0x2dd   :  { %v756_v20 = vadd.f32 %v751_v42, %v195_v63 }
 0x2de   :  { %v2910_v45 = vpop.eup %2909  ;;  %v753_v52 = vpop.f32.mrf.mxu0 }
 0x2df   :  { %2913 = vtanh.f32 %v756_v20  ;;  %v757_v0 = vadd.f32 %v753_v52, %v197_v61  ;;  %v567_v40 = vmul.f32 0.5, %v2910_v45  ;;  %v766_v61 = vpop.permute.xlu0 %765 }
 0x2e0   :  { %v2912_v18 = vpop.eup %2911 }
 0x2e1   :  { %v568_v60 = vadd.f32 0.5, %v567_v40  ;;  %2915 = vtanh.f32 %v757_v0  ;;  %v569_v20 = vmul.f32 0.5, %v2912_v18 }
 0x2e3   :  { %v576_v57 = vmul.f32 %v2912_v18, %v568_v60  ;;  %v575_v63 = vmul.f32 %v573_v59, %v568_v60  ;;  %v570_v40 = vadd.f32 0.5, %v569_v20  ;;  %v4264_v20 = vld [vmem:[#allocation23_spill] sm:$0xff] }
 0x2e5   :  { %578 = vrot.lane.b32.xlu1 %v576_v57, %s3096_s1 }
 0x2ec   :  { %v2914_v49 = vpop.eup %2913 }
 0x2ed   :  { %v760_v56 = vmul.f32 0.5, %v2914_v49 }
 0x2ee   :  { %v2916_v22 = vpop.eup %2915 }
 0x2ef   :  { %v761_v55 = vadd.f32 0.5, %v760_v56  ;;  %v762_v49 = vmul.f32 0.5, %v2916_v22 }
 0x2f1   :  { %v769_v58 = vmul.f32 %v2916_v22, %v761_v55  ;;  %v768_v45 = vmul.f32 %v766_v61, %v761_v55  ;;  %v763_v56 = vadd.f32 0.5, %v762_v49  ;;  %v4265_v61 = vld [vmem:[#allocation18_spill] sm:$0xff] }
 0x2f3   :  { %771 = vrot.lane.b32.xlu1 %v769_v58, %s3096_s1 }
 0x357   :  { %v579_v44 = vpop.permute.xlu1 %578 }
 0x358   :  { %v581_v42 = vadd.f32 %v579_v44, %v575_v63 }
 0x35a   :  { %2917 = vtanh.f32 %v581_v42 }
 0x365   :  { %v772_v52 = vpop.permute.xlu1 %771 }
 0x366   :  { %v774_v0 = vadd.f32 %v772_v52, %v768_v45 }
 0x367   :  { %v2918_v48 = vpop.eup %2917 }
 0x368   :  { %2919 = vtanh.f32 %v774_v0  ;;  %v583_v57 = vmul.f32 %v2918_v48, %v570_v40  ;;  %v4262_v48 = vmov 0.0   ;;  %v4267_v40 = vld [vmem:[#allocation17_spill] sm:$0xff] }
 0x36a   :  { %592 = vrot.lane.b32.xlu0 %v583_v57, %s3096_s1  ;;  %v4268_v57 = vld [vmem:[#allocation21_spill] sm:$0xff] }
 0x36e   :  { %597 = vrot.lane.b32.xlu0 %v581_v42, %s3096_s1  ;;  %v4263_v42 = vld [vmem:[#allocation22_spill] sm:$0xff] }
 0x375   :  { %v2920_v58 = vpop.eup %2919 }
 0x376   :  { %v776_v60 = vmul.f32 %v2920_v58, %v763_v56 }
 0x378   :  { %778 = vrot.lane.b32.xlu1 %v776_v60, %s3096_s1 }
 0x37c   :  { %877 = vrot.lane.b32.xlu1 %v774_v0, %s3096_s1  ;;  %v4266_v0 = vld [vmem:[#allocation16_spill] sm:$0xff] }
 0x3dc   :  { %v593_v18 = vpop.permute.xlu0 %592 }
 0x3dd   :  { %595 = vst.msk [vmem:[#allocation5] sm:$0xff] %vm70_vm0, %v593_v18 }
 0x3e0   :  { %v598_v55 = vpop.permute.xlu0 %597 }
 0x3e1   :  { %600 = vst.msk [vmem:[#allocation6] sm:$0xff] %vm70_vm0, %v598_v55 }
 0x3e4   :  { %v603_v59 = vld [vmem:[#allocation5] sm:$0xff] }
 0x3e5   :  { %2827 = vmatmul.mubr.msk.f32.vlgmr.msra.gmra.mxu1 %vm70_vm0, %v603_v59 }
 0x3e6   :  { %799 = vmatpush1.msra.mxu1 %v3374_v62  ;;  %846 = vmatprep.mubr.f32.mxu1 %v4262_v48 }
 0x3e7   :  { %800 = vmatprep.subr.mxu1 %v3381_v13 }
 0x3e8   :  { %801 = vmatpush1.msra.mxu1 %v3383_v14  ;;  %v604_v22 = vld [vmem:[#allocation6] sm:$0xff] }
 0x3e9   :  { %802 = vmatprep.subr.mxu1 %v3390_v19  ;;  %862 = vrot.lane.b32.xlu0 %v604_v22, %s3096_s1 }
 0x3ea   :  { %803 = vmatpush1.msra.mxu1 %v3393_v21  ;;  %v779_v63 = vpop.permute.xlu1 %778 }
 0x3eb   :  { %875 = vst.msk [vmem:[#allocation3] sm:$0xff] %vm70_vm0, %v779_v63  ;;  %804 = vmatprep.subr.mxu1 %v3397_v38 }
 0x3ec   :  { %805 = vmatpush1.msra.mxu1 %v3401_v39 }
 0x3ed   :  { %806 = vmatprep.subr.mxu1 %v3408_v46 }
 0x3ee   :  { %807 = vmatpush1.msra.mxu1 %v3411_v47  ;;  %v878_v44 = vpop.permute.xlu1 %877 }
 0x3ef   :  { %880 = vst.msk [vmem:[#allocation4] sm:$0xff] %vm70_vm0, %v878_v44  ;;  %808 = vmatprep.subr.mxu1 %v3414_v50 }
 0x3f0   :  { %809 = vmatpush1.msra.mxu1 %v3418_v51 }
 0x3f1   :  { %810 = vmatprep.subr.mxu1 %v3425_v53 }
 0x3f2   :  { %811 = vmatpush1.msra.mxu1 %v3428_v54  ;;  %v891_v52 = vld [vmem:[#allocation3] sm:$0xff] }
 0x3f3   :  { %812 = vmatprep.subr.mxu1 %v4263_v42 }
 0x3f4   :  { %813 = vmatpush1.msra.mxu1 %v4264_v20 }
 0x3f5   :  { %2829 = vmatmul.mubr.msk.f32.vlgmr.msra.gmra.mxu1 %vm70_vm0, %v779_v63  ;;  %991 = vmatprep.subr.mxu1 %v4265_v61  ;;  %v4269_v63 = vld [vmem:[#allocation24_spill] sm:$0xff] }
 0x3f6   :  { %992 = vmatpush1.msra.mxu1 %v3241_v23  ;;  %v892_v45 = vld [vmem:[#allocation4] sm:$0xff]  ;;  %1039 = vmatprep.mubr.f32.mxu1 %v4262_v48  ;;  %v201_v44 = vadd.f32 %v4269_v63, %v3358_v43 }
 0x3f7   :  { %993 = vmatprep.subr.mxu1 %v3247_v24  ;;  %1055 = vrot.lane.b32.xlu0 %v892_v45, %s3096_s1 }
 0x3f8   :  { %994 = vmatpush1.msra.mxu1 %v3254_v25 }
 0x3f9   :  { %995 = vmatprep.subr.mxu1 %v3260_v26 }
 0x3fa   :  { %996 = vmatpush1.msra.mxu1 %v3267_v27 }
 0x3fb   :  { %997 = vmatprep.subr.mxu1 %v3273_v28 }
 0x3fc   :  { %998 = vmatpush1.msra.mxu1 %v3279_v29 }
 0x3fd   :  { %999 = vmatprep.subr.mxu1 %v3285_v30 }
 0x3fe   :  { %1000 = vmatpush1.msra.mxu1 %v3291_v31 }
 0x3ff   :  { %1001 = vmatprep.subr.mxu1 %v3297_v32 }
 0x400   :  { %1002 = vmatpush1.msra.mxu1 %v3303_v33 }
 0x401   :  { %1003 = vmatprep.subr.mxu1 %v3309_v34 }
 0x402   :  { %1004 = vmatpush1.msra.mxu1 %v3315_v35 }
 0x403   :  { %1005 = vmatprep.subr.mxu1 %v3321_v36 }
 0x404   :  { %1006 = vmatpush1.msra.mxu1 %v3327_v37 }
 0x405   :  { %2831 = vmatmul.mubr.msk.f32.vlgmr.msra.gmra.mxu1 %vm70_vm0, %v891_v52  ;;  %1204 = vmatprep.subr.mxu1 %v3174_v1  ;;  %v4270_v52 = vld [vmem:[#allocation20_spill] sm:$0xff] }
 0x406   :  { %1205 = vmatpush1.msra.mxu1 %v3176_v2  ;;  %1252 = vmatprep.mubr.f32.mxu1 %v4262_v48 }
 0x407   :  { %1206 = vmatprep.subr.mxu1 %v3178_v3 }
 0x408   :  { %1207 = vmatpush1.msra.mxu1 %v3181_v4 }
 0x409   :  { %1208 = vmatprep.subr.mxu1 %v3184_v5 }
 0x40a   :  { %1209 = vmatpush1.msra.mxu1 %v3187_v6 }
 0x40b   :  { %1210 = vmatprep.subr.mxu1 %v3190_v7 }
 0x40c   :  { %1211 = vmatpush1.msra.mxu1 %v3193_v8 }
 0x40d   :  { %1212 = vmatprep.subr.mxu1 %v3196_v9 }
 0x40e   :  { %1213 = vmatpush1.msra.mxu1 %v3199_v10 }
 0x40f   :  { %1214 = vmatprep.subr.mxu1 %v3202_v11 }
 0x410   :  { %1215 = vmatpush1.msra.mxu1 %v3205_v12 }
 0x411   :  { %1216 = vmatprep.subr.mxu1 %v3214_v15 }
 0x412   :  { %1217 = vmatpush1.msra.mxu1 %v3220_v17 }
 0x413   :  { %1218 = vmatprep.subr.mxu1 %v4266_v0 }
 0x414   :  { %1219 = vmatpush1.msra.mxu1 %v4267_v40  ;;  %v4271_v40 = vld [vmem:[#allocation25_spill] sm:$0xff] }
 0x415   :  { %1378 = vmatprep.subr.mxu1 %v4268_v57  ;;  %v203_v0 = vadd.f32 %v4271_v40, %v4270_v52 }
 0x45b   :  { %v863_v40 = vpop.permute.xlu0 %862 }
 0x4a5   :  { %v674_v49 = vpop.f32.mrf.mxu1 }
 0x4a7   :  { %v676_v56 = vpop.f32.mrf.mxu1 }
 0x4b5   :  { %v848_v58 = vpop.f32.mrf.mxu1 }
 0x4b6   :  { %v849_v60 = vadd.f32 %v848_v58, %v674_v49 }
 0x4b7   :  { %v850_v18 = vpop.f32.mrf.mxu1 }
 0x4b8   :  { %v853_v55 = vadd.f32 %v849_v60, %v3528_v16  ;;  %v851_v59 = vadd.f32 %v850_v18, %v676_v56 }
 0x4ba   :  { %2921 = vtanh.f32 %v853_v55  ;;  %v854_v22 = vadd.f32 %v851_v59, %v3533_v41 }
 0x4bc   :  { %2923 = vtanh.f32 %v854_v22 }
 0x4c5   :  { %v1041_v45 = vpop.f32.mrf.mxu1 }
 0x4c6   :  { %v1046_v57 = vadd.f32 %v1041_v45, %v201_v44 }
 0x4c7   :  { %v2922_v17 = vpop.eup %2921  ;;  %v1043_v15 = vpop.f32.mrf.mxu1 }
 0x4c8   :  { %2925 = vtanh.f32 %v1046_v57  ;;  %v1047_v49 = vadd.f32 %v1043_v15, %v203_v0  ;;  %v857_v58 = vmul.f32 0.5, %v2922_v17  ;;  %v1056_v17 = vpop.permute.xlu0 %1055 }
 0x4c9   :  { %v2924_v60 = vpop.eup %2923 }
 0x4ca   :  { %v858_v12 = vadd.f32 0.5, %v857_v58  ;;  %2927 = vtanh.f32 %v1047_v49  ;;  %v859_v15 = vmul.f32 0.5, %v2924_v60 }
 0x4cc   :  { %v866_v56 = vmul.f32 %v2924_v60, %v858_v12  ;;  %v865_v44 = vmul.f32 %v863_v40, %v858_v12  ;;  %v860_v58 = vadd.f32 0.5, %v859_v15 }
 0x4ce   :  { %868 = vrot.lane.b32.xlu1 %v866_v56, %s3096_s1 }
 0x4d5   :  { %v2926_v18 = vpop.eup %2925 }
 0x4d6   :  { %v1050_v55 = vmul.f32 0.5, %v2926_v18 }
 0x4d7   :  { %v2928_v22 = vpop.eup %2927 }
 0x4d8   :  { %v1051_v59 = vadd.f32 0.5, %v1050_v55  ;;  %v1052_v18 = vmul.f32 0.5, %v2928_v22 }
 0x4da   :  { %v1059_v63 = vmul.f32 %v2928_v22, %v1051_v59  ;;  %v1058_v0 = vmul.f32 %v1056_v17, %v1051_v59  ;;  %v1053_v55 = vadd.f32 0.5, %v1052_v18 }
 0x4dc   :  { %1061 = vrot.lane.b32.xlu1 %v1059_v63, %s3096_s1 }
 0x540   :  { %v869_v45 = vpop.permute.xlu1 %868 }
 0x541   :  { %v871_v52 = vadd.f32 %v869_v45, %v865_v44 }
 0x543   :  { %2929 = vtanh.f32 %v871_v52 }
 0x54e   :  { %v1062_v57 = vpop.permute.xlu1 %1061 }
 0x54f   :  { %v1064_v49 = vadd.f32 %v1062_v57, %v1058_v0 }
 0x550   :  { %v2930_v43 = vpop.eup %2929 }
 0x551   :  { %2931 = vtanh.f32 %v1064_v49  ;;  %v873_v56 = vmul.f32 %v2930_v43, %v860_v58 }
 0x553   :  { %882 = vrot.lane.b32.xlu0 %v873_v56, %s3096_s1 }
 0x557   :  { %887 = vrot.lane.b32.xlu0 %v871_v52, %s3096_s1 }
 0x55e   :  { %v2932_v63 = vpop.eup %2931 }
 0x55f   :  { %v1066_v12 = vmul.f32 %v2932_v63, %v1053_v55 }
 0x561   :  { %1068 = vrot.lane.b32.xlu1 %v1066_v12, %s3096_s1 }
 0x565   :  { %1167 = vrot.lane.b32.xlu1 %v1064_v49, %s3096_s1 }
 0x5c5   :  { %v883_v60 = vpop.permute.xlu0 %882 }
 0x5c6   :  { %885 = vst.msk [vmem:[#allocation5] sm:$0xff] %vm70_vm0, %v883_v60 }
 0x5c9   :  { %v888_v59 = vpop.permute.xlu0 %887 }
 0x5ca   :  { %890 = vst.msk [vmem:[#allocation6] sm:$0xff] %vm70_vm0, %v888_v59 }
 0x5cd   :  { %v893_v40 = vld [vmem:[#allocation5] sm:$0xff] }
 0x5ce   :  { %2830 = vmatmul.mubr.msk.f32.vlgmr.msra.gmra.mxu0 %vm70_vm0, %v893_v40 }
 0x5cf   :  { %1089 = vmatpush1.msra.mxu0 %v3374_v62  ;;  %1136 = vmatprep.mubr.f32.mxu0 %v4262_v48 }
 0x5d0   :  { %1090 = vmatprep.subr.mxu0 %v3381_v13 }
 0x5d1   :  { %1091 = vmatpush1.msra.mxu0 %v3383_v14  ;;  %v894_v43 = vld [vmem:[#allocation6] sm:$0xff] }
 0x5d2   :  { %1092 = vmatprep.subr.mxu0 %v3390_v19  ;;  %1152 = vrot.lane.b32.xlu0 %v894_v43, %s3096_s1 }
 0x5d3   :  { %1093 = vmatpush1.msra.mxu0 %v3393_v21  ;;  %v1069_v52 = vpop.permute.xlu1 %1068 }
 0x5d4   :  { %1094 = vmatprep.subr.mxu0 %v3397_v38  ;;  %1165 = vst.msk [vmem:[#allocation3] sm:$0xff] %vm70_vm0, %v1069_v52 }
 0x5d5   :  { %1095 = vmatpush1.msra.mxu0 %v3401_v39 }
 0x5d6   :  { %1096 = vmatprep.subr.mxu0 %v3408_v46 }
 0x5d7   :  { %1097 = vmatpush1.msra.mxu0 %v3411_v47  ;;  %v1168_v22 = vpop.permute.xlu1 %1167 }
 0x5d8   :  { %1098 = vmatprep.subr.mxu0 %v3414_v50  ;;  %1170 = vst.msk [vmem:[#allocation4] sm:$0xff] %vm70_vm0, %v1168_v22 }
 0x5d9   :  { %1099 = vmatpush1.msra.mxu0 %v3418_v51 }
 0x5da   :  { %1100 = vmatprep.subr.mxu0 %v3425_v53 }
 0x5db   :  { %1101 = vmatpush1.msra.mxu0 %v3428_v54 }
 0x5dc   :  { %1102 = vmatprep.subr.mxu0 %v4263_v42 }
 0x5dd   :  { %1103 = vmatpush1.msra.mxu0 %v4264_v20 }
 0x5de   :  { %2832 = vmatmul.mubr.msk.f32.vlgmr.msra.gmra.mxu0 %vm70_vm0, %v1069_v52  ;;  %1281 = vmatprep.subr.mxu0 %v4265_v61 }
 0x5df   :  { %1282 = vmatpush1.msra.mxu0 %v3241_v23  ;;  %v1182_v44 = vld [vmem:[#allocation4] sm:$0xff]  ;;  %1329 = vmatprep.mubr.f32.mxu0 %v4262_v48  ;;  %v1181_v23 = vld [vmem:[#allocation3] sm:$0xff] }
 0x5e0   :  { %1283 = vmatprep.subr.mxu0 %v3247_v24  ;;  %1345 = vrot.lane.b32.xlu0 %v1182_v44, %s3096_s1 }
 0x5e1   :  { %1284 = vmatpush1.msra.mxu0 %v3254_v25 }
 0x5e2   :  { %1285 = vmatprep.subr.mxu0 %v3260_v26 }
 0x5e3   :  { %1286 = vmatpush1.msra.mxu0 %v3267_v27  ;;  %v4278_v27 = vld [vmem:[#allocation19_spill] sm:$0xff] }
 0x5e4   :  { %1287 = vmatprep.subr.mxu0 %v3273_v28  ;;  %v4279_v28 = vld [vmem:[#allocation26_spill] sm:$0xff] }
 0x5e5   :  { %1288 = vmatpush1.msra.mxu0 %v3279_v29  ;;  %v207_v29 = vadd.f32 %v4279_v28, %v4278_v27  ;;  %v3812_v28 = vld [vmem:[#allocation9 + $0x78] sm:$0xff] }
 0x5e6   :  { %1289 = vmatprep.subr.mxu0 %v3285_v30 }
 0x5e7   :  { %1290 = vmatpush1.msra.mxu0 %v3291_v31  ;;  %v4280_v31 = vld [vmem:[#allocation20_spill] sm:$0xff] }
 0x5e8   :  { %1291 = vmatprep.subr.mxu0 %v3297_v32  ;;  %v4281_v32 = vld [vmem:[#allocation27_spill] sm:$0xff] }
 0x5e9   :  { %1292 = vmatpush1.msra.mxu0 %v3303_v33  ;;  %v209_v33 = vadd.f32 %v4281_v32, %v4280_v31  ;;  %v3822_v32 = vld [vmem:[#allocation9 + $0x60] sm:$0xff] }
 0x5ea   :  { %1293 = vmatprep.subr.mxu0 %v3309_v34 }
 0x5eb   :  { %1294 = vmatpush1.msra.mxu0 %v3315_v35 }
 0x5ec   :  { %1295 = vmatprep.subr.mxu0 %v3321_v36 }
 0x5ed   :  { %1296 = vmatpush1.msra.mxu0 %v3327_v37 }
 0x5ee   :  { %2834 = vmatmul.mubr.msk.f32.vlgmr.msra.gmra.mxu0 %vm70_vm0, %v1181_v23  ;;  %1494 = vmatprep.subr.mxu0 %v3174_v1  ;;  %v4272_v1 = vld [vmem:[#allocation13_spill] sm:$0xff] }
 0x5ef   :  { %1495 = vmatpush1.msra.mxu0 %v3176_v2  ;;  %1542 = vmatprep.mubr.f32.mxu0 %v4262_v48  ;;  %v4273_v2 = vld [vmem:[#allocation14_spill] sm:$0xff] }
 0x5f0   :  { %1496 = vmatprep.subr.mxu0 %v3178_v3  ;;  %v4274_v3 = vld [vmem:[#allocation15_spill] sm:$0xff] }
 0x5f1   :  { %1497 = vmatpush1.msra.mxu0 %v3181_v4  ;;  %v4275_v4 = vld [vmem:[#allocation16_spill] sm:$0xff] }
 0x5f2   :  { %1498 = vmatprep.subr.mxu0 %v3184_v5  ;;  %v4276_v5 = vld [vmem:[#allocation17_spill] sm:$0xff] }
 0x5f3   :  { %1499 = vmatpush1.msra.mxu0 %v3187_v6  ;;  %v4277_v6 = vld [vmem:[#allocation21_spill] sm:$0xff] }
 0x5f4   :  { %1500 = vmatprep.subr.mxu0 %v3190_v7 }
 0x5f5   :  { %1501 = vmatpush1.msra.mxu0 %v3193_v8 }
 0x5f6   :  { %1502 = vmatprep.subr.mxu0 %v3196_v9 }
 0x5f7   :  { %1503 = vmatpush1.msra.mxu0 %v3199_v10 }
 0x5f8   :  { %1504 = vmatprep.subr.mxu0 %v3202_v11 }
 0x5f9   :  { %1505 = vmatpush1.msra.mxu0 %v4272_v1 }
 0x5fa   :  { %1506 = vmatprep.subr.mxu0 %v4273_v2 }
 0x5fb   :  { %1507 = vmatpush1.msra.mxu0 %v4274_v3 }
 0x5fc   :  { %1508 = vmatprep.subr.mxu0 %v4275_v4 }
 0x5fd   :  { %1509 = vmatpush1.msra.mxu0 %v4276_v5 }
 0x5fe   :  { %1668 = vmatprep.subr.mxu0 %v4277_v6 }
 0x644   :  { %v1153_v18 = vpop.permute.xlu0 %1152 }
 0x652   :  { %v1346_v59 = vpop.permute.xlu0 %1345 }
 0x68e   :  { %v964_v7 = vpop.f32.mrf.mxu0 }
 0x690   :  { %v966_v8 = vpop.f32.mrf.mxu0 }
 0x69e   :  { %v1138_v24 = vpop.f32.mrf.mxu0 }
 0x69f   :  { %v1139_v9 = vadd.f32 %v1138_v24, %v964_v7 }
 0x6a0   :  { %v1140_v25 = vpop.f32.mrf.mxu0 }
 0x6a1   :  { %v1143_v10 = vadd.f32 %v1139_v9, %v3528_v16  ;;  %v1141_v11 = vadd.f32 %v1140_v25, %v966_v8  ;;  %v3796_v25 = vld [vmem:[%s4197_s3 + $0x10] sm:$0xff] }
 0x6a3   :  { %2933 = vtanh.f32 %v1143_v10  ;;  %v1144_v26 = vadd.f32 %v1141_v11, %v3533_v41  ;;  %v3802_v10 = vld [vmem:[%s4197_s3 + $0x8] sm:$0xff]  ;;  %v3808_v11 = vld [vmem:[%s4197_s3] sm:$0xff] }
 0x6a5   :  { %2935 = vtanh.f32 %v1144_v26 }
 0x6ae   :  { %v1331_v30 = vpop.f32.mrf.mxu0 }
 0x6af   :  { %v1336_v34 = vadd.f32 %v1331_v30, %v207_v29  ;;  %v3815_v29 = vld [vmem:[#allocation9 + $0x70] sm:$0xff]  ;;  %v3819_v30 = vld [vmem:[#allocation9 + $0x68] sm:$0xff] }
 0x6b0   :  { %v2934_v35 = vpop.eup %2933  ;;  %v1333_v36 = vpop.f32.mrf.mxu0 }
 0x6b1   :  { %2937 = vtanh.f32 %v1336_v34  ;;  %v1337_v37 = vadd.f32 %v1333_v36, %v209_v33  ;;  %v1147_v61 = vmul.f32 0.5, %v2934_v35  ;;  %v3825_v33 = vld [vmem:[#allocation9 + $0x58] sm:$0xff]  ;;  %v3828_v34 = vld [vmem:[#allocation9 + $0x50] sm:$0xff]  ;;  %v3831_v35 = vld [vmem:[#allocation9 + $0x48] sm:$0xff] }
 0x6b2   :  { %v2936_v15 = vpop.eup %2935  ;;  %v3834_v36 = vld [vmem:[#allocation9 + $0x40] sm:$0xff] }
 0x6b3   :  { %v1148_v45 = vadd.f32 0.5, %v1147_v61  ;;  %2939 = vtanh.f32 %v1337_v37  ;;  %v1149_v60 = vmul.f32 0.5, %v2936_v15  ;;  %v3837_v37 = vld [vmem:[#allocation9 + $0x38] sm:$0xff]  ;;  %v3840_v61 = vld [vmem:[#allocation9 + $0x30] sm:$0xff] }
 0x6b5   :  { %v1156_v17 = vmul.f32 %v2936_v15, %v1148_v45  ;;  %v1155_v55 = vmul.f32 %v1153_v18, %v1148_v45  ;;  %v1150_v22 = vadd.f32 0.5, %v1149_v60  ;;  %v3843_v45 = vld [vmem:[#allocation9 + $0x28] sm:$0xff]  ;;  %v3846_v15 = vld [vmem:[#allocation9 + $0x20] sm:$0xff] }
 0x6b6   :  { %4282 = vst [vmem:[#allocation22_spill] sm:$0xff] %v3846_v15 }
 0x6b7   :  { %1158 = vrot.lane.b32.xlu1 %v1156_v17, %s3096_s1  ;;  %v3849_v17 = vld [vmem:[#allocation9 + $0x18] sm:$0xff] }
 0x6b8   :  { %4283 = vst [vmem:[#allocation23_spill] sm:$0xff] %v3849_v17 }
 0x6be   :  { %v2938_v0 = vpop.eup %2937 }
 0x6bf   :  { %v1340_v57 = vmul.f32 0.5, %v2938_v0  ;;  %v3852_v0 = vld [vmem:[#allocation9 + $0x10] sm:$0xff] }
 0x6c0   :  { %v2940_v58 = vpop.eup %2939  ;;  %4284 = vst [vmem:[#allocation18_spill] sm:$0xff] %v3852_v0 }
 0x6c1   :  { %v1341_v49 = vadd.f32 0.5, %v1340_v57  ;;  %v1342_v1 = vmul.f32 0.5, %v2940_v58  ;;  %v3855_v57 = vld [vmem:[#allocation9 + $0x8] sm:$0xff] }
 0x6c2   :  { %4285 = vst [vmem:[#allocation24_spill] sm:$0xff] %v3855_v57 }
 0x6c3   :  { %v1349_v56 = vmul.f32 %v2940_v58, %v1341_v49  ;;  %v1348_v40 = vmul.f32 %v1346_v59, %v1341_v49  ;;  %v1343_v2 = vadd.f32 0.5, %v1342_v1  ;;  %v3858_v49 = vld [vmem:[#allocation9] sm:$0xff] }
 0x6c4   :  { %4286 = vst [vmem:[#allocation25_spill] sm:$0xff] %v3858_v49 }
 0x6c5   :  { %1351 = vrot.lane.b32.xlu1 %v1349_v56, %s3096_s1 }
 0x729   :  { %v1159_v63 = vpop.permute.xlu1 %1158 }
 0x72a   :  { %v1161_v12 = vadd.f32 %v1159_v63, %v1155_v55 }
 0x72c   :  { %2941 = vtanh.f32 %v1161_v12 }
 0x737   :  { %v1352_v43 = vpop.permute.xlu1 %1351 }
 0x738   :  { %v1354_v52 = vadd.f32 %v1352_v43, %v1348_v40  ;;  %v4287_v40 = vld [vmem:[#allocation28_spill] sm:$0xff] }
 0x739   :  { %v2942_v44 = vpop.eup %2941  ;;  %v213_v43 = vadd.f32 %v4287_v40, %v4278_v27 }
 0x73a   :  { %2943 = vtanh.f32 %v1354_v52  ;;  %v1163_v23 = vmul.f32 %v2942_v44, %v1150_v22  ;;  %v4288_v22 = vld [vmem:[#allocation29_spill] sm:$0xff] }
 0x73b   :  { %v215_v44 = vadd.f32 %v4288_v22, %v4280_v31 }
 0x73c   :  { %1172 = vrot.lane.b32.xlu0 %v1163_v23, %s3096_s1 }
 0x740   :  { %1177 = vrot.lane.b32.xlu0 %v1161_v12, %s3096_s1 }
 0x747   :  { %v2944_v3 = vpop.eup %2943 }
 0x748   :  { %v1356_v4 = vmul.f32 %v2944_v3, %v1343_v2 }
 0x74a   :  { %1358 = vrot.lane.b32.xlu1 %v1356_v4, %s3096_s1 }
 0x74e   :  { %1457 = vrot.lane.b32.xlu1 %v1354_v52, %s3096_s1 }
 0x7ae   :  { %v1173_v5 = vpop.permute.xlu0 %1172 }
 0x7af   :  { %1175 = vst.msk [vmem:[#allocation5] sm:$0xff] %vm70_vm0, %v1173_v5 }
 0x7b2   :  { %v1178_v7 = vpop.permute.xlu0 %1177 }
 0x7b3   :  { %1180 = vst.msk [vmem:[#allocation6] sm:$0xff] %vm70_vm0, %v1178_v7 }
 0x7b6   :  { %v1183_v8 = vld [vmem:[#allocation5] sm:$0xff] }
 0x7b7   :  { %2833 = vmatmul.mubr.msk.f32.vlgmr.msra.gmra.mxu1 %vm70_vm0, %v1183_v8 }
 0x7b8   :  { %1379 = vmatpush1.msra.mxu1 %v3374_v62  ;;  %1426 = vmatprep.mubr.f32.mxu1 %v4262_v48 }
 0x7b9   :  { %1380 = vmatprep.subr.mxu1 %v3381_v13  ;;  %v3716_v13 = vld [vmem:[%s4197_s3 + $0x78] sm:$0xff] }
 0x7ba   :  { %1381 = vmatpush1.msra.mxu1 %v3383_v14  ;;  %v1184_v24 = vld [vmem:[#allocation6] sm:$0xff]  ;;  %v3722_v14 = vld [vmem:[%s4197_s3 + $0x70] sm:$0xff] }
 0x7bb   :  { %1382 = vmatprep.subr.mxu1 %v3390_v19  ;;  %1442 = vrot.lane.b32.xlu0 %v1184_v24, %s3096_s1 }
 0x7bc   :  { %1383 = vmatpush1.msra.mxu1 %v3393_v21  ;;  %v1359_v9 = vpop.permute.xlu1 %1358  ;;  %v3729_v21 = vld [vmem:[%s4197_s3 + $0x68] sm:$0xff] }
 0x7bd   :  { %1384 = vmatprep.subr.mxu1 %v3397_v38  ;;  %1455 = vst.msk [vmem:[#allocation3] sm:$0xff] %vm70_vm0, %v1359_v9  ;;  %v3736_v38 = vld [vmem:[%s4197_s3 + $0x60] sm:$0xff] }
 0x7be   :  { %1385 = vmatpush1.msra.mxu1 %v3401_v39  ;;  %v3742_v39 = vld [vmem:[%s4197_s3 + $0x58] sm:$0xff] }
 0x7bf   :  { %1386 = vmatprep.subr.mxu1 %v3408_v46  ;;  %v3748_v46 = vld [vmem:[%s4197_s3 + $0x50] sm:$0xff] }
 0x7c0   :  { %1387 = vmatpush1.msra.mxu1 %v3411_v47  ;;  %v1458_v62 = vpop.permute.xlu1 %1457  ;;  %v3754_v47 = vld [vmem:[%s4197_s3 + $0x48] sm:$0xff] }
 0x7c1   :  { %1388 = vmatprep.subr.mxu1 %v3414_v50  ;;  %1460 = vst.msk [vmem:[#allocation4] sm:$0xff] %vm70_vm0, %v1458_v62  ;;  %v3760_v50 = vld [vmem:[%s4197_s3 + $0x40] sm:$0xff] }
 0x7c2   :  { %1389 = vmatpush1.msra.mxu1 %v3418_v51  ;;  %v3766_v51 = vld [vmem:[%s4197_s3 + $0x38] sm:$0xff] }
 0x7c3   :  { %1390 = vmatprep.subr.mxu1 %v3425_v53  ;;  %v3772_v53 = vld [vmem:[%s4197_s3 + $0x30] sm:$0xff] }
 0x7c4   :  { %1391 = vmatpush1.msra.mxu1 %v3428_v54  ;;  %v3778_v54 = vld [vmem:[%s4197_s3 + $0x28] sm:$0xff]  ;;  %v1471_v26 = vld [vmem:[#allocation3] sm:$0xff] }
 0x7c5   :  { %1392 = vmatprep.subr.mxu1 %v4263_v42  ;;  %v3784_v42 = vld [vmem:[%s4197_s3 + $0x20] sm:$0xff] }
 0x7c6   :  { %1393 = vmatpush1.msra.mxu1 %v4264_v20  ;;  %v3790_v20 = vld [vmem:[%s4197_s3 + $0x18] sm:$0xff] }
 0x7c7   :  { %2835 = vmatmul.mubr.msk.f32.vlgmr.msra.gmra.mxu1 %vm70_vm0, %v1359_v9  ;;  %1571 = vmatprep.subr.mxu1 %v3716_v13 }
 0x7c8   :  { %1572 = vmatpush1.msra.mxu1 %v3722_v14  ;;  %v1472_v19 = vld [vmem:[#allocation4] sm:$0xff]  ;;  %1619 = vmatprep.mubr.f32.mxu1 %v4262_v48 }
 0x7c9   :  { %1573 = vmatprep.subr.mxu1 %v3729_v21  ;;  %1635 = vrot.lane.b32.xlu0 %v1472_v19, %s3096_s1 }
 0x7ca   :  { %1574 = vmatpush1.msra.mxu1 %v3736_v38 }
 0x7cb   :  { %1575 = vmatprep.subr.mxu1 %v3742_v39 }
 0x7cc   :  { %1576 = vmatpush1.msra.mxu1 %v3748_v46 }
 0x7cd   :  { %1577 = vmatprep.subr.mxu1 %v3754_v47 }
 0x7ce   :  { %1578 = vmatpush1.msra.mxu1 %v3760_v50 }
 0x7cf   :  { %1579 = vmatprep.subr.mxu1 %v3766_v51 }
 0x7d0   :  { %1580 = vmatpush1.msra.mxu1 %v3772_v53 }
 0x7d1   :  { %1581 = vmatprep.subr.mxu1 %v3778_v54 }
 0x7d2   :  { %1582 = vmatpush1.msra.mxu1 %v3784_v42 }
 0x7d3   :  { %1583 = vmatprep.subr.mxu1 %v3790_v20 }
 0x7d4   :  { %1584 = vmatpush1.msra.mxu1 %v3796_v25 }
 0x7d5   :  { %1585 = vmatprep.subr.mxu1 %v3802_v10 }
 0x7d6   :  { %1586 = vmatpush1.msra.mxu1 %v3808_v11 }
 0x7d7   :  { %2837 = vmatmul.mubr.msk.f32.vlgmr.msra.gmra.mxu1 %vm70_vm0, %v1471_v26  ;;  %1784 = vmatprep.subr.mxu1 %v3812_v28 }
 0x7d8   :  { %1785 = vmatpush1.msra.mxu1 %v3815_v29  ;;  %1832 = vmatprep.mubr.f32.mxu1 %v4262_v48 }
 0x7d9   :  { %1786 = vmatprep.subr.mxu1 %v3819_v30 }
 0x7da   :  { %1787 = vmatpush1.msra.mxu1 %v3822_v32 }
 0x7db   :  { %1788 = vmatprep.subr.mxu1 %v3825_v33 }
 0x7dc   :  { %1789 = vmatpush1.msra.mxu1 %v3828_v34 }
 0x7dd   :  { %1790 = vmatprep.subr.mxu1 %v3831_v35 }
 0x7de   :  { %1791 = vmatpush1.msra.mxu1 %v3834_v36 }
 0x7df   :  { %1792 = vmatprep.subr.mxu1 %v3837_v37 }
 0x7e0   :  { %1793 = vmatpush1.msra.mxu1 %v3840_v61 }
 0x7e1   :  { %1794 = vmatprep.subr.mxu1 %v3843_v45 }
 0x7e2   :  { %1795 = vmatpush1.msra.mxu1 %v3846_v15 }
 0x7e3   :  { %1796 = vmatprep.subr.mxu1 %v3849_v17 }
 0x7e4   :  { %1797 = vmatpush1.msra.mxu1 %v3852_v0 }
 0x7e5   :  { %1798 = vmatprep.subr.mxu1 %v3855_v57 }
 0x7e6   :  { %1799 = vmatpush1.msra.mxu1 %v3858_v49 }
 0x7e7   :  { %1958 = vmatprep.subr.mxu1 %v4277_v6 }
 0x82d   :  { %v1443_v26 = vpop.permute.xlu0 %1442 }
 0x877   :  { %v1254_v58 = vpop.f32.mrf.mxu1 }
 0x879   :  { %v1256_v56 = vpop.f32.mrf.mxu1 }
 0x887   :  { %v1428_v18 = vpop.f32.mrf.mxu1 }
 0x888   :  { %v1429_v55 = vadd.f32 %v1428_v18, %v1254_v58 }
 0x889   :  { %v1430_v63 = vpop.f32.mrf.mxu1 }
 0x88a   :  { %v1433_v12 = vadd.f32 %v1429_v55, %v3528_v16  ;;  %v1431_v60 = vadd.f32 %v1430_v63, %v1256_v56  ;;  %v1636_v63 = vpop.permute.xlu0 %1635 }
 0x88c   :  { %2945 = vtanh.f32 %v1433_v12  ;;  %v1434_v59 = vadd.f32 %v1431_v60, %v3533_v41 }
 0x88e   :  { %2947 = vtanh.f32 %v1434_v59 }
 0x897   :  { %v1621_v52 = vpop.f32.mrf.mxu1 }
 0x898   :  { %v1626_v6 = vadd.f32 %v1621_v52, %v213_v43 }
 0x899   :  { %v2946_v23 = vpop.eup %2945  ;;  %v1623_v1 = vpop.f32.mrf.mxu1 }
 0x89a   :  { %2949 = vtanh.f32 %v1626_v6  ;;  %v1627_v2 = vadd.f32 %v1623_v1, %v215_v44  ;;  %v1437_v3 = vmul.f32 0.5, %v2946_v23 }
 0x89b   :  { %v2948_v5 = vpop.eup %2947 }
 0x89c   :  { %v1438_v4 = vadd.f32 0.5, %v1437_v3  ;;  %2951 = vtanh.f32 %v1627_v2  ;;  %v1439_v55 = vmul.f32 0.5, %v2948_v5 }
 0x89e   :  { %v1446_v7 = vmul.f32 %v2948_v5, %v1438_v4  ;;  %v1445_v58 = vmul.f32 %v1443_v26, %v1438_v4  ;;  %v1440_v40 = vadd.f32 0.5, %v1439_v55  ;;  %v3877_v4 = vld [vmem:[#allocation7 + $0x70] sm:$0xff]  ;;  %v3881_v5 = vld [vmem:[#allocation7 + $0x68] sm:$0xff]  ;;  %v3898_v26 = vld [vmem:[#allocation7 + $0x40] sm:$0xff] }
 0x89f   :  { %v3907_v55 = vld [vmem:[#allocation7 + $0x28] sm:$0xff] }
 0x8a0   :  { %1448 = vrot.lane.b32.xlu1 %v1446_v7, %s3096_s1  ;;  %v3884_v7 = vld [vmem:[#allocation7 + $0x60] sm:$0xff] }
 0x8a7   :  { %v2950_v8 = vpop.eup %2949 }
 0x8a8   :  { %v1630_v24 = vmul.f32 0.5, %v2950_v8 }
 0x8a9   :  { %v2952_v62 = vpop.eup %2951 }
 0x8aa   :  { %v1631_v9 = vadd.f32 0.5, %v1630_v24  ;;  %v1632_v22 = vmul.f32 0.5, %v2952_v62  ;;  %v3887_v24 = vld [vmem:[#allocation7 + $0x58] sm:$0xff] }
 0x8ac   :  { %v1639_v19 = vmul.f32 %v2952_v62, %v1631_v9  ;;  %v1638_v12 = vmul.f32 %v1636_v63, %v1631_v9  ;;  %v1633_v44 = vadd.f32 0.5, %v1632_v22  ;;  %v3891_v9 = vld [vmem:[#allocation7 + $0x50] sm:$0xff]  ;;  %v3911_v63 = vld [vmem:[#allocation7 + $0x20] sm:$0xff]  ;;  %v3963_v22 = vld [vmem:[#allocation7 + $0x78] sm:$0xff] }
 0x8ad   :  { %4289 = vst [vmem:[#allocation13_spill] sm:$0xff] %v3963_v22 }
 0x8ae   :  { %1641 = vrot.lane.b32.xlu1 %v1639_v19, %s3096_s1  ;;  %v3894_v19 = vld [vmem:[#allocation7 + $0x48] sm:$0xff] }
 0x912   :  { %v1449_v56 = vpop.permute.xlu1 %1448 }
 0x913   :  { %v1451_v18 = vadd.f32 %v1449_v56, %v1445_v58  ;;  %v3901_v58 = vld [vmem:[#allocation7 + $0x38] sm:$0xff]  ;;  %v3904_v56 = vld [vmem:[#allocation7 + $0x30] sm:$0xff] }
 0x915   :  { %2953 = vtanh.f32 %v1451_v18 }
 0x920   :  { %v1642_v60 = vpop.permute.xlu1 %1641 }
 0x921   :  { %v1644_v59 = vadd.f32 %v1642_v60, %v1638_v12  ;;  %v3914_v12 = vld [vmem:[#allocation7 + $0x18] sm:$0xff]  ;;  %v3917_v60 = vld [vmem:[#allocation7 + $0x10] sm:$0xff] }
 0x922   :  { %v2954_v43 = vpop.eup %2953 }
 0x923   :  { %2955 = vtanh.f32 %v1644_v59  ;;  %v1453_v52 = vmul.f32 %v2954_v43, %v1440_v40  ;;  %v3923_v40 = vld [vmem:[#allocation7] sm:$0xff] }
 0x925   :  { %1462 = vrot.lane.b32.xlu0 %v1453_v52, %s3096_s1 }
 0x929   :  { %1467 = vrot.lane.b32.xlu0 %v1451_v18, %s3096_s1 }
 0x930   :  { %v2956_v6 = vpop.eup %2955 }
 0x931   :  { %v1646_v23 = vmul.f32 %v2956_v6, %v1633_v44 }
 0x933   :  { %1648 = vrot.lane.b32.xlu1 %v1646_v23, %s3096_s1 }
 0x937   :  { %1747 = vrot.lane.b32.xlu1 %v1644_v59, %s3096_s1  ;;  %v3920_v59 = vld [vmem:[#allocation7 + $0x8] sm:$0xff] }
 0x997   :  { %v1463_v1 = vpop.permute.xlu0 %1462 }
 0x998   :  { %1465 = vst.msk [vmem:[#allocation5] sm:$0xff] %vm70_vm0, %v1463_v1 }
 0x99b   :  { %v1468_v2 = vpop.permute.xlu0 %1467 }
 0x99c   :  { %1470 = vst.msk [vmem:[#allocation6] sm:$0xff] %vm70_vm0, %v1468_v2 }
 0x99f   :  { %v1473_v3 = vld [vmem:[#allocation5] sm:$0xff] }
 0x9a0   :  { %2836 = vmatmul.mubr.msk.f32.vlgmr.msra.gmra.mxu0 %vm70_vm0, %v1473_v3 }
 0x9a1   :  { %1669 = vmatpush1.msra.mxu0 %v3877_v4  ;;  %1716 = vmatprep.mubr.f32.mxu0 %v4262_v48 }
 0x9a2   :  { %1670 = vmatprep.subr.mxu0 %v3881_v5 }
 0x9a3   :  { %1671 = vmatpush1.msra.mxu0 %v3884_v7  ;;  %v1474_v8 = vld [vmem:[#allocation6] sm:$0xff] }
 0x9a4   :  { %1672 = vmatprep.subr.mxu0 %v3887_v24  ;;  %1732 = vrot.lane.b32.xlu0 %v1474_v8, %s3096_s1 }
 0x9a5   :  { %1673 = vmatpush1.msra.mxu0 %v3891_v9  ;;  %v1649_v62 = vpop.permute.xlu1 %1648 }
 0x9a6   :  { %1674 = vmatprep.subr.mxu0 %v3894_v19  ;;  %1745 = vst.msk [vmem:[#allocation3] sm:$0xff] %vm70_vm0, %v1649_v62 }
 0x9a7   :  { %1675 = vmatpush1.msra.mxu0 %v3898_v26 }
 0x9a8   :  { %1676 = vmatprep.subr.mxu0 %v3901_v58 }
 0x9a9   :  { %1677 = vmatpush1.msra.mxu0 %v3904_v56  ;;  %v1748_v18 = vpop.permute.xlu1 %1747 }
 0x9aa   :  { %1678 = vmatprep.subr.mxu0 %v3907_v55  ;;  %1750 = vst.msk [vmem:[#allocation4] sm:$0xff] %vm70_vm0, %v1748_v18  ;;  %v4290_v18 = vld [vmem:[#allocation30_spill] sm:$0xff] }
 0x9ab   :  { %1679 = vmatpush1.msra.mxu0 %v3911_v63 }
 0x9ac   :  { %1680 = vmatprep.subr.mxu0 %v3914_v12 }
 0x9ad   :  { %1681 = vmatpush1.msra.mxu0 %v3917_v60  ;;  %v1761_v52 = vld [vmem:[#allocation3] sm:$0xff] }
 0x9ae   :  { %1682 = vmatprep.subr.mxu0 %v3920_v59 }
 0x9af   :  { %1683 = vmatpush1.msra.mxu0 %v3923_v40 }
 0x9b0   :  { %2838 = vmatmul.mubr.msk.f32.vlgmr.msra.gmra.mxu0 %vm70_vm0, %v1649_v62  ;;  %1861 = vmatprep.subr.mxu0 %v3716_v13 }
 0x9b1   :  { %1862 = vmatpush1.msra.mxu0 %v3722_v14  ;;  %v1762_v43 = vld [vmem:[#allocation4] sm:$0xff]  ;;  %1909 = vmatprep.mubr.f32.mxu0 %v4262_v48 }
 0x9b2   :  { %1863 = vmatprep.subr.mxu0 %v3729_v21  ;;  %1925 = vrot.lane.b32.xlu0 %v1762_v43, %s3096_s1  ;;  %v219_v43 = vadd.f32 %v4290_v18, %v4278_v27 }
 0x9b3   :  { %1864 = vmatpush1.msra.mxu0 %v3736_v38 }
 0x9b4   :  { %1865 = vmatprep.subr.mxu0 %v3742_v39 }
 0x9b5   :  { %1866 = vmatpush1.msra.mxu0 %v3748_v46 }
 0x9b6   :  { %1867 = vmatprep.subr.mxu0 %v3754_v47 }
 0x9b7   :  { %1868 = vmatpush1.msra.mxu0 %v3760_v50 }
 0x9b8   :  { %1869 = vmatprep.subr.mxu0 %v3766_v51 }
 0x9b9   :  { %1870 = vmatpush1.msra.mxu0 %v3772_v53 }
 0x9ba   :  { %1871 = vmatprep.subr.mxu0 %v3778_v54 }
 0x9bb   :  { %1872 = vmatpush1.msra.mxu0 %v3784_v42 }
 0x9bc   :  { %1873 = vmatprep.subr.mxu0 %v3790_v20 }
 0x9bd   :  { %1874 = vmatpush1.msra.mxu0 %v3796_v25 }
 0x9be   :  { %1875 = vmatprep.subr.mxu0 %v3802_v10 }
 0x9bf   :  { %1876 = vmatpush1.msra.mxu0 %v3808_v11 }
 0x9c0   :  { %2840 = vmatmul.mubr.msk.f32.vlgmr.msra.gmra.mxu0 %vm70_vm0, %v1761_v52  ;;  %2074 = vmatprep.subr.mxu0 %v3812_v28 }
 0x9c1   :  { %2075 = vmatpush1.msra.mxu0 %v3815_v29  ;;  %2122 = vmatprep.mubr.f32.mxu0 %v4262_v48 }
 0x9c2   :  { %2076 = vmatprep.subr.mxu0 %v3819_v30 }
 0x9c3   :  { %2077 = vmatpush1.msra.mxu0 %v3822_v32 }
 0x9c4   :  { %2078 = vmatprep.subr.mxu0 %v3825_v33 }
 0x9c5   :  { %2079 = vmatpush1.msra.mxu0 %v3828_v34 }
 0x9c6   :  { %2080 = vmatprep.subr.mxu0 %v3831_v35 }
 0x9c7   :  { %2081 = vmatpush1.msra.mxu0 %v3834_v36 }
 0x9c8   :  { %2082 = vmatprep.subr.mxu0 %v3837_v37 }
 0x9c9   :  { %2083 = vmatpush1.msra.mxu0 %v3840_v61 }
 0x9ca   :  { %2084 = vmatprep.subr.mxu0 %v3843_v45 }
 0x9cb   :  { %2085 = vmatpush1.msra.mxu0 %v3846_v15 }
 0x9cc   :  { %2086 = vmatprep.subr.mxu0 %v3849_v17 }
 0x9cd   :  { %2087 = vmatpush1.msra.mxu0 %v3852_v0 }
 0x9ce   :  { %2088 = vmatprep.subr.mxu0 %v3855_v57 }
 0x9cf   :  { %2089 = vmatpush1.msra.mxu0 %v3858_v49  ;;  %v4291_v49 = vld [vmem:[#allocation31_spill] sm:$0xff] }
 0x9d0   :  { %2248 = vmatprep.subr.mxu0 %v3963_v22  ;;  %v221_v57 = vadd.f32 %v4291_v49, %v4280_v31 }
 0xa16   :  { %v1733_v49 = vpop.permute.xlu0 %1732 }
 0xa60   :  { %v1544_v44 = vpop.f32.mrf.mxu0 }
 0xa62   :  { %v1546_v6 = vpop.f32.mrf.mxu0 }
 0xa70   :  { %v1718_v23 = vpop.f32.mrf.mxu0 }
 0xa71   :  { %v1719_v1 = vadd.f32 %v1718_v23, %v1544_v44 }
 0xa72   :  { %v1720_v2 = vpop.f32.mrf.mxu0 }
 0xa73   :  { %v1723_v3 = vadd.f32 %v1719_v1, %v3528_v16  ;;  %v1721_v8 = vadd.f32 %v1720_v2, %v1546_v6 }
 0xa75   :  { %2957 = vtanh.f32 %v1723_v3  ;;  %v1724_v62 = vadd.f32 %v1721_v8, %v3533_v41 }
 0xa77   :  { %2959 = vtanh.f32 %v1724_v62 }
 0xa80   :  { %v1911_v52 = vpop.f32.mrf.mxu0 }
 0xa81   :  { %v1916_v22 = vadd.f32 %v1911_v52, %v219_v43 }
 0xa82   :  { %v2958_v0 = vpop.eup %2957  ;;  %v1913_v17 = vpop.f32.mrf.mxu0 }
 0xa83   :  { %2961 = vtanh.f32 %v1916_v22  ;;  %v1917_v44 = vadd.f32 %v1913_v17, %v221_v57  ;;  %v1727_v23 = vmul.f32 0.5, %v2958_v0  ;;  %v1926_v0 = vpop.permute.xlu0 %1925 }
 0xa84   :  { %v2960_v1 = vpop.eup %2959 }
 0xa85   :  { %v1728_v15 = vadd.f32 0.5, %v1727_v23  ;;  %2963 = vtanh.f32 %v1917_v44  ;;  %v1729_v17 = vmul.f32 0.5, %v2960_v1 }
 0xa87   :  { %v1736_v6 = vmul.f32 %v2960_v1, %v1728_v15  ;;  %v1735_v43 = vmul.f32 %v1733_v49, %v1728_v15  ;;  %v1730_v23 = vadd.f32 0.5, %v1729_v17 }
 0xa89   :  { %1738 = vrot.lane.b32.xlu1 %v1736_v6, %s3096_s1 }
 0xa90   :  { %v2962_v2 = vpop.eup %2961 }
 0xa91   :  { %v1920_v3 = vmul.f32 0.5, %v2962_v2 }
 0xa92   :  { %v2964_v62 = vpop.eup %2963 }
 0xa93   :  { %v1921_v8 = vadd.f32 0.5, %v1920_v3  ;;  %v1922_v2 = vmul.f32 0.5, %v2964_v62 }
 0xa95   :  { %v1929_v18 = vmul.f32 %v2964_v62, %v1921_v8  ;;  %v1928_v57 = vmul.f32 %v1926_v0, %v1921_v8  ;;  %v1923_v3 = vadd.f32 0.5, %v1922_v2  ;;  %v4300_v2 = vld [vmem:[#allocation20_spill] sm:$0xff] }
 0xa97   :  { %1931 = vrot.lane.b32.xlu1 %v1929_v18, %s3096_s1 }
 0xafb   :  { %v1739_v52 = vpop.permute.xlu1 %1738 }
 0xafc   :  { %v1741_v31 = vadd.f32 %v1739_v52, %v1735_v43 }
 0xafe   :  { %2965 = vtanh.f32 %v1741_v31 }
 0xb09   :  { %v1932_v22 = vpop.permute.xlu1 %1931 }
 0xb0a   :  { %v1934_v44 = vadd.f32 %v1932_v22, %v1928_v57  ;;  %v4298_v22 = vld [vmem:[#allocation19_spill] sm:$0xff] }
 0xb0b   :  { %v2966_v27 = vpop.eup %2965 }
 0xb0c   :  { %2967 = vtanh.f32 %v1934_v44  ;;  %v1743_v6 = vmul.f32 %v2966_v27, %v1730_v23 }
 0xb0e   :  { %1752 = vrot.lane.b32.xlu0 %v1743_v6, %s3096_s1 }
 0xb12   :  { %1757 = vrot.lane.b32.xlu0 %v1741_v31, %s3096_s1 }
 0xb19   :  { %v2968_v18 = vpop.eup %2967 }
 0xb1a   :  { %v1936_v15 = vmul.f32 %v2968_v18, %v1923_v3  ;;  %v4301_v3 = vld [vmem:[#allocation33_spill] sm:$0xff] }
 0xb1b   :  { %v227_v18 = vadd.f32 %v4301_v3, %v4300_v2 }
 0xb1c   :  { %1938 = vrot.lane.b32.xlu1 %v1936_v15, %s3096_s1 }
 0xb20   :  { %2037 = vrot.lane.b32.xlu1 %v1934_v44, %s3096_s1  ;;  %v4299_v44 = vld [vmem:[#allocation32_spill] sm:$0xff] }
 0xb21   :  { %v225_v23 = vadd.f32 %v4299_v44, %v4298_v22 }
 0xb80   :  { %v1753_v1 = vpop.permute.xlu0 %1752 }
 0xb81   :  { %1755 = vst.msk [vmem:[#allocation5] sm:$0xff] %vm70_vm0, %v1753_v1 }
 0xb84   :  { %v1758_v8 = vpop.permute.xlu0 %1757 }
 0xb85   :  { %1760 = vst.msk [vmem:[#allocation6] sm:$0xff] %vm70_vm0, %v1758_v8 }
 0xb88   :  { %v1763_v49 = vld [vmem:[#allocation5] sm:$0xff] }
 0xb89   :  { %2839 = vmatmul.mubr.msk.f32.vlgmr.msra.gmra.mxu1 %vm70_vm0, %v1763_v49 }
 0xb8a   :  { %1959 = vmatpush1.msra.mxu1 %v3877_v4  ;;  %2006 = vmatprep.mubr.f32.mxu1 %v4262_v48 }
 0xb8b   :  { %1960 = vmatprep.subr.mxu1 %v3881_v5 }
 0xb8c   :  { %1961 = vmatpush1.msra.mxu1 %v3884_v7  ;;  %v1764_v27 = vld [vmem:[#allocation6] sm:$0xff] }
 0xb8d   :  { %1962 = vmatprep.subr.mxu1 %v3887_v24  ;;  %2022 = vrot.lane.b32.xlu0 %v1764_v27, %s3096_s1 }
 0xb8e   :  { %1963 = vmatpush1.msra.mxu1 %v3891_v9  ;;  %v1939_v31 = vpop.permute.xlu1 %1938 }
 0xb8f   :  { %1964 = vmatprep.subr.mxu1 %v3894_v19  ;;  %2035 = vst.msk [vmem:[#allocation3] sm:$0xff] %vm70_vm0, %v1939_v31 }
 0xb90   :  { %1965 = vmatpush1.msra.mxu1 %v3898_v26 }
 0xb91   :  { %1966 = vmatprep.subr.mxu1 %v3901_v58 }
 0xb92   :  { %1967 = vmatpush1.msra.mxu1 %v3904_v56  ;;  %v2038_v62 = vpop.permute.xlu1 %2037 }
 0xb93   :  { %1968 = vmatprep.subr.mxu1 %v3907_v55  ;;  %2040 = vst.msk [vmem:[#allocation4] sm:$0xff] %vm70_vm0, %v2038_v62 }
 0xb94   :  { %1969 = vmatpush1.msra.mxu1 %v3911_v63 }
 0xb95   :  { %1970 = vmatprep.subr.mxu1 %v3914_v12 }
 0xb96   :  { %1971 = vmatpush1.msra.mxu1 %v3917_v60  ;;  %v2051_v52 = vld [vmem:[#allocation3] sm:$0xff] }
 0xb97   :  { %1972 = vmatprep.subr.mxu1 %v3920_v59 }
 0xb98   :  { %1973 = vmatpush1.msra.mxu1 %v3923_v40 }
 0xb99   :  { %2841 = vmatmul.mubr.msk.f32.vlgmr.msra.gmra.mxu1 %vm70_vm0, %v1939_v31  ;;  %2151 = vmatprep.subr.mxu1 %v3716_v13 }
 0xb9a   :  { %2152 = vmatpush1.msra.mxu1 %v3722_v14  ;;  %v2052_v43 = vld [vmem:[#allocation4] sm:$0xff]  ;;  %2199 = vmatprep.mubr.f32.mxu1 %v4262_v48 }
 0xb9b   :  { %2153 = vmatprep.subr.mxu1 %v3729_v21  ;;  %2215 = vrot.lane.b32.xlu0 %v2052_v43, %s3096_s1 }
 0xb9c   :  { %2154 = vmatpush1.msra.mxu1 %v3736_v38 }
 0xb9d   :  { %2155 = vmatprep.subr.mxu1 %v3742_v39 }
 0xb9e   :  { %2156 = vmatpush1.msra.mxu1 %v3748_v46 }
 0xb9f   :  { %2157 = vmatprep.subr.mxu1 %v3754_v47 }
 0xba0   :  { %2158 = vmatpush1.msra.mxu1 %v3760_v50 }
 0xba1   :  { %2159 = vmatprep.subr.mxu1 %v3766_v51 }
 0xba2   :  { %2160 = vmatpush1.msra.mxu1 %v3772_v53 }
 0xba3   :  { %2161 = vmatprep.subr.mxu1 %v3778_v54 }
 0xba4   :  { %2162 = vmatpush1.msra.mxu1 %v3784_v42 }
 0xba5   :  { %2163 = vmatprep.subr.mxu1 %v3790_v20 }
 0xba6   :  { %2164 = vmatpush1.msra.mxu1 %v3796_v25 }
 0xba7   :  { %2165 = vmatprep.subr.mxu1 %v3802_v10 }
 0xba8   :  { %2166 = vmatpush1.msra.mxu1 %v3808_v11 }
 0xba9   :  { %2843 = vmatmul.mubr.msk.f32.vlgmr.msra.gmra.mxu1 %vm70_vm0, %v2051_v52  ;;  %2364 = vmatprep.subr.mxu1 %v3812_v28  ;;  %v4292_v28 = vld [vmem:[#allocation22_spill] sm:$0xff] }
 0xbaa   :  { %2365 = vmatpush1.msra.mxu1 %v3815_v29  ;;  %2412 = vmatprep.mubr.f32.mxu1 %v4262_v48  ;;  %v4293_v29 = vld [vmem:[#allocation23_spill] sm:$0xff] }
 0xbab   :  { %2366 = vmatprep.subr.mxu1 %v3819_v30  ;;  %v4294_v30 = vld [vmem:[#allocation18_spill] sm:$0xff] }
 0xbac   :  { %2367 = vmatpush1.msra.mxu1 %v3822_v32  ;;  %v4295_v32 = vld [vmem:[#allocation24_spill] sm:$0xff] }
 0xbad   :  { %2368 = vmatprep.subr.mxu1 %v3825_v33  ;;  %v4296_v33 = vld [vmem:[#allocation25_spill] sm:$0xff] }
 0xbae   :  { %2369 = vmatpush1.msra.mxu1 %v3828_v34  ;;  %v4297_v34 = vld [vmem:[#allocation13_spill] sm:$0xff] }
 0xbaf   :  { %2370 = vmatprep.subr.mxu1 %v3831_v35 }
 0xbb0   :  { %2371 = vmatpush1.msra.mxu1 %v3834_v36 }
 0xbb1   :  { %2372 = vmatprep.subr.mxu1 %v3837_v37 }
 0xbb2   :  { %2373 = vmatpush1.msra.mxu1 %v3840_v61 }
 0xbb3   :  { %2374 = vmatprep.subr.mxu1 %v3843_v45 }
 0xbb4   :  { %2375 = vmatpush1.msra.mxu1 %v4292_v28 }
 0xbb5   :  { %2376 = vmatprep.subr.mxu1 %v4293_v29 }
 0xbb6   :  { %2377 = vmatpush1.msra.mxu1 %v4294_v30 }
 0xbb7   :  { %2378 = vmatprep.subr.mxu1 %v4295_v32 }
 0xbb8   :  { %2379 = vmatpush1.msra.mxu1 %v4296_v33 }
 0xbb9   :  { %2538 = vmatprep.subr.mxu1 %v4297_v34 }
 0xbff   :  { %v2023_v33 = vpop.permute.xlu0 %2022 }
 0xc49   :  { %v1834_v35 = vpop.f32.mrf.mxu1 }
 0xc4b   :  { %v1836_v36 = vpop.f32.mrf.mxu1 }
 0xc59   :  { %v2008_v17 = vpop.f32.mrf.mxu1 }
 0xc5a   :  { %v2009_v37 = vadd.f32 %v2008_v17, %v1834_v35 }
 0xc5b   :  { %v2010_v0 = vpop.f32.mrf.mxu1 }
 0xc5c   :  { %v2013_v61 = vadd.f32 %v2009_v37, %v3528_v16  ;;  %v2011_v45 = vadd.f32 %v2010_v0, %v1836_v36  ;;  %v2216_v37 = vpop.permute.xlu0 %2215 }
 0xc5e   :  { %2969 = vtanh.f32 %v2013_v61  ;;  %v2014_v57 = vadd.f32 %v2011_v45, %v3533_v41 }
 0xc60   :  { %2971 = vtanh.f32 %v2014_v57 }
 0xc69   :  { %v2201_v6 = vpop.f32.mrf.mxu1 }
 0xc6a   :  { %v2206_v15 = vadd.f32 %v2201_v6, %v225_v23 }
 0xc6b   :  { %v2970_v1 = vpop.eup %2969  ;;  %v2203_v8 = vpop.f32.mrf.mxu1 }
 0xc6c   :  { %2973 = vtanh.f32 %v2206_v15  ;;  %v2207_v49 = vadd.f32 %v2203_v8, %v227_v18  ;;  %v2017_v27 = vmul.f32 0.5, %v2970_v1 }
 0xc6d   :  { %v2972_v62 = vpop.eup %2971 }
 0xc6e   :  { %v2018_v31 = vadd.f32 0.5, %v2017_v27  ;;  %2975 = vtanh.f32 %v2207_v49  ;;  %v2019_v17 = vmul.f32 0.5, %v2972_v62 }
 0xc70   :  { %v2026_v43 = vmul.f32 %v2972_v62, %v2018_v31  ;;  %v2025_v34 = vmul.f32 %v2023_v33, %v2018_v31  ;;  %v2020_v57 = vadd.f32 0.5, %v2019_v17 }
 0xc72   :  { %2028 = vrot.lane.b32.xlu1 %v2026_v43, %s3096_s1 }
 0xc79   :  { %v2974_v52 = vpop.eup %2973 }
 0xc7a   :  { %v2210_v28 = vmul.f32 0.5, %v2974_v52 }
 0xc7b   :  { %v2976_v30 = vpop.eup %2975 }
 0xc7c   :  { %v2211_v29 = vadd.f32 0.5, %v2210_v28  ;;  %v2212_v6 = vmul.f32 0.5, %v2976_v30 }
 0xc7e   :  { %v2219_v32 = vmul.f32 %v2976_v30, %v2211_v29  ;;  %v2218_v0 = vmul.f32 %v2216_v37, %v2211_v29  ;;  %v2213_v3 = vadd.f32 0.5, %v2212_v6 }
 0xc80   :  { %2221 = vrot.lane.b32.xlu1 %v2219_v32, %s3096_s1 }
 0xce4   :  { %v2029_v35 = vpop.permute.xlu1 %2028 }
 0xce5   :  { %v2031_v36 = vadd.f32 %v2029_v35, %v2025_v34 }
 0xce7   :  { %2977 = vtanh.f32 %v2031_v36 }
 0xcf2   :  { %v2222_v61 = vpop.permute.xlu1 %2221 }
 0xcf3   :  { %v2224_v45 = vadd.f32 %v2222_v61, %v2218_v0 }
 0xcf4   :  { %v2978_v44 = vpop.eup %2977 }
 0xcf5   :  { %2979 = vtanh.f32 %v2224_v45  ;;  %v2033_v23 = vmul.f32 %v2978_v44, %v2020_v57 }
 0xcf7   :  { %2042 = vrot.lane.b32.xlu0 %v2033_v23, %s3096_s1 }
 0xcfb   :  { %2047 = vrot.lane.b32.xlu0 %v2031_v36, %s3096_s1 }
 0xd02   :  { %v2980_v18 = vpop.eup %2979 }
 0xd03   :  { %v2226_v15 = vmul.f32 %v2980_v18, %v2213_v3 }
 0xd05   :  { %2228 = vrot.lane.b32.xlu1 %v2226_v15, %s3096_s1 }
 0xd09   :  { %2327 = vrot.lane.b32.xlu1 %v2224_v45, %s3096_s1 }
 0xd69   :  { %v2043_v1 = vpop.permute.xlu0 %2042 }
 0xd6a   :  { %2045 = vst.msk [vmem:[#allocation5] sm:$0xff] %vm70_vm0, %v2043_v1 }
 0xd6d   :  { %v2048_v8 = vpop.permute.xlu0 %2047 }
 0xd6e   :  { %2050 = vst.msk [vmem:[#allocation6] sm:$0xff] %vm70_vm0, %v2048_v8 }
 0xd71   :  { %v2053_v49 = vld [vmem:[#allocation5] sm:$0xff] }
 0xd72   :  { %2842 = vmatmul.mubr.msk.f32.vlgmr.msra.gmra.mxu0 %vm70_vm0, %v2053_v49 }
 0xd73   :  { %2249 = vmatpush1.msra.mxu0 %v3877_v4  ;;  %2296 = vmatprep.mubr.f32.mxu0 %v4262_v48 }
 0xd74   :  { %2250 = vmatprep.subr.mxu0 %v3881_v5 }
 0xd75   :  { %2251 = vmatpush1.msra.mxu0 %v3884_v7  ;;  %v2054_v27 = vld [vmem:[#allocation6] sm:$0xff] }
 0xd76   :  { %2252 = vmatprep.subr.mxu0 %v3887_v24  ;;  %2312 = vrot.lane.b32.xlu0 %v2054_v27, %s3096_s1 }
 0xd77   :  { %2253 = vmatpush1.msra.mxu0 %v3891_v9  ;;  %v2229_v31 = vpop.permute.xlu1 %2228 }
 0xd78   :  { %2254 = vmatprep.subr.mxu0 %v3894_v19  ;;  %2325 = vst.msk [vmem:[#allocation3] sm:$0xff] %vm70_vm0, %v2229_v31 }
 0xd79   :  { %2255 = vmatpush1.msra.mxu0 %v3898_v26 }
 0xd7a   :  { %2256 = vmatprep.subr.mxu0 %v3901_v58 }
 0xd7b   :  { %2257 = vmatpush1.msra.mxu0 %v3904_v56  ;;  %v2328_v62 = vpop.permute.xlu1 %2327 }
 0xd7c   :  { %2258 = vmatprep.subr.mxu0 %v3907_v55  ;;  %2330 = vst.msk [vmem:[#allocation4] sm:$0xff] %vm70_vm0, %v2328_v62 }
 0xd7d   :  { %2259 = vmatpush1.msra.mxu0 %v3911_v63 }
 0xd7e   :  { %2260 = vmatprep.subr.mxu0 %v3914_v12 }
 0xd7f   :  { %2261 = vmatpush1.msra.mxu0 %v3917_v60 }
 0xd80   :  { %2262 = vmatprep.subr.mxu0 %v3920_v59 }
 0xd81   :  { %2263 = vmatpush1.msra.mxu0 %v3923_v40 }
 0xd82   :  { %2844 = vmatmul.mubr.msk.f32.vlgmr.msra.gmra.mxu0 %vm70_vm0, %v2229_v31  ;;  %2441 = vmatprep.subr.mxu0 %v3716_v13  ;;  %v2341_v13 = vld [vmem:[#allocation3] sm:$0xff] }
 0xd83   :  { %2442 = vmatpush1.msra.mxu0 %v3722_v14  ;;  %v2342_v43 = vld [vmem:[#allocation4] sm:$0xff]  ;;  %2489 = vmatprep.mubr.f32.mxu0 %v4262_v48 }
 0xd84   :  { %2443 = vmatprep.subr.mxu0 %v3729_v21  ;;  %2505 = vrot.lane.b32.xlu0 %v2342_v43, %s3096_s1 }
 0xd85   :  { %2444 = vmatpush1.msra.mxu0 %v3736_v38 }
 0xd86   :  { %2445 = vmatprep.subr.mxu0 %v3742_v39 }
 0xd87   :  { %2446 = vmatpush1.msra.mxu0 %v3748_v46 }
 0xd88   :  { %2447 = vmatprep.subr.mxu0 %v3754_v47 }
 0xd89   :  { %2448 = vmatpush1.msra.mxu0 %v3760_v50 }
 0xd8a   :  { %2449 = vmatprep.subr.mxu0 %v3766_v51 }
 0xd8b   :  { %2450 = vmatpush1.msra.mxu0 %v3772_v53  ;;  %v4302_v53 = vld [vmem:[#allocation34_spill] sm:$0xff] }
 0xd8c   :  { %2451 = vmatprep.subr.mxu0 %v3778_v54  ;;  %v231_v54 = vadd.f32 %v4302_v53, %v4298_v22  ;;  %v2636_v53 = vld [vmem:[%s4201_s7 + $0x8] sm:$0xff] }
 0xd8d   :  { %2452 = vmatpush1.msra.mxu0 %v3784_v42 }
 0xd8e   :  { %2453 = vmatprep.subr.mxu0 %v3790_v20  ;;  %v4303_v20 = vld [vmem:[#allocation35_spill] sm:$0xff] }
 0xd8f   :  { %2454 = vmatpush1.msra.mxu0 %v3796_v25  ;;  %v233_v25 = vadd.f32 %v4303_v20, %v4300_v2  ;;  %v2727_v20 = vld [vmem:[%s4203_s9 + $0x18] sm:$0xff] }
 0xd90   :  { %2455 = vmatprep.subr.mxu0 %v3802_v10 }
 0xd91   :  { %2456 = vmatpush1.msra.mxu0 %v3808_v11 }
 0xd92   :  { %2846 = vmatmul.mubr.msk.f32.vlgmr.msra.gmra.mxu0 %vm70_vm0, %v2341_v13  ;;  %2866 = vmatprep.subr.mxu0 %v4262_v48 }
 0xd93   :  { %2882 = vmatprep.mubr.msk.f32.mxu0 %vm3097_vm2, %v4262_v48 }
 0xde8   :  { %v2313_v2 = vpop.permute.xlu0 %2312 }
 0xdf6   :  { %v2506_v57 = vpop.permute.xlu0 %2505 }
 0xe32   :  { %v2124_v14 = vpop.f32.mrf.mxu0 }
 0xe34   :  { %v2126_v21 = vpop.f32.mrf.mxu0 }
 0xe42   :  { %v2298_v38 = vpop.f32.mrf.mxu0 }
 0xe43   :  { %v2299_v39 = vadd.f32 %v2298_v38, %v2124_v14 }
 0xe44   :  { %v2300_v46 = vpop.f32.mrf.mxu0 }
 0xe45   :  { %v2303_v47 = vadd.f32 %v2299_v39, %v3528_v16  ;;  %v2301_v50 = vadd.f32 %v2300_v46, %v2126_v21 }
 0xe47   :  { %2981 = vtanh.f32 %v2303_v47  ;;  %v2304_v51 = vadd.f32 %v2301_v50, %v3533_v41  ;;  %v2638_v50 = vld [vmem:[%s4201_s7 + $0x18] sm:$0xff] }
 0xe49   :  { %2983 = vtanh.f32 %v2304_v51  ;;  %v2637_v51 = vld [vmem:[%s4201_s7 + $0x10] sm:$0xff] }
 0xe52   :  { %v2491_v42 = vpop.f32.mrf.mxu0 }
 0xe53   :  { %v2496_v10 = vadd.f32 %v2491_v42, %v231_v54  ;;  %v2635_v54 = vld [vmem:[%s4201_s7] sm:$0xff] }
 0xe54   :  { %v2982_v11 = vpop.eup %2981  ;;  %v2493_v52 = vpop.f32.mrf.mxu0 }
 0xe55   :  { %2985 = vtanh.f32 %v2496_v10  ;;  %v2497_v28 = vadd.f32 %v2493_v52, %v233_v25  ;;  %v2307_v29 = vmul.f32 0.5, %v2982_v11 }
 0xe56   :  { %v2984_v32 = vpop.eup %2983 }
 0xe57   :  { %v2308_v30 = vadd.f32 0.5, %v2307_v29  ;;  %2987 = vtanh.f32 %v2497_v28  ;;  %v2309_v45 = vmul.f32 0.5, %v2984_v32 }
 0xe59   :  { %v2316_v33 = vmul.f32 %v2984_v32, %v2308_v30  ;;  %v2315_v37 = vmul.f32 %v2313_v2, %v2308_v30  ;;  %v2310_v3 = vadd.f32 0.5, %v2309_v45  ;;  %v2726_v30 = vld [vmem:[%s4203_s9 + $0x10] sm:$0xff]  ;;  %v2725_v32 = vld [vmem:[%s4203_s9 + $0x8] sm:$0xff]  ;;  %v2850_v2 = vld [vmem:[%s4204_s10] ss:$0 sm:$0xff] }
 0xe5b   :  { %2318 = vrot.lane.b32.xlu1 %v2316_v33, %s3096_s1  ;;  %v2724_v33 = vld [vmem:[%s4203_s9] sm:$0xff] }
 0xe62   :  { %v2986_v34 = vpop.eup %2985 }
 0xe63   :  { %v2500_v35 = vmul.f32 0.5, %v2986_v34  ;;  %v2848_v34 = vld [vmem:[%s4202_s8] ss:$0 sm:$0xff] }
 0xe64   :  { %v2988_v22 = vpop.eup %2987 }
 0xe65   :  { %v2501_v36 = vadd.f32 0.5, %v2500_v35  ;;  %v2502_v1 = vmul.f32 0.5, %v2988_v22 }
 0xe67   :  { %v2509_v17 = vmul.f32 %v2988_v22, %v2501_v36  ;;  %v2508_v44 = vmul.f32 %v2506_v57, %v2501_v36  ;;  %v2503_v8 = vadd.f32 0.5, %v2502_v1 }
 0xe69   :  { %2511 = vrot.lane.b32.xlu1 %v2509_v17, %s3096_s1 }
 0xecd   :  { %v2319_v0 = vpop.permute.xlu1 %2318 }
 0xece   :  { %v2321_v61 = vadd.f32 %v2319_v0, %v2315_v37 }
 0xed0   :  { %2989 = vtanh.f32 %v2321_v61 }
 0xedb   :  { %v2512_v23 = vpop.permute.xlu1 %2511 }
 0xedc   :  { %v2514_v6 = vadd.f32 %v2512_v23, %v2508_v44 }
 0xedd   :  { %v2990_v18 = vpop.eup %2989 }
 0xede   :  { %2991 = vtanh.f32 %v2514_v6  ;;  %v2323_v15 = vmul.f32 %v2990_v18, %v2310_v3 }
 0xee0   :  { %2332 = vrot.lane.b32.xlu0 %v2323_v15, %s3096_s1 }
 0xee4   :  { %2337 = vrot.lane.b32.xlu0 %v2321_v61, %s3096_s1 }
 0xeeb   :  { %v2992_v49 = vpop.eup %2991 }
 0xeec   :  { %v2516_v27 = vmul.f32 %v2992_v49, %v2503_v8 }
 0xeee   :  { %2518 = vrot.lane.b32.xlu1 %v2516_v27, %s3096_s1 }
 0xf52   :  { %v2333_v31 = vpop.permute.xlu0 %2332 }
 0xf53   :  { %2335 = vst.msk [vmem:[#allocation5] sm:$0xff] %vm70_vm0, %v2333_v31 }
 0xf56   :  { %v2338_v62 = vpop.permute.xlu0 %2337 }
 0xf57   :  { %2340 = vst.msk [vmem:[#allocation6] sm:$0xff] %vm70_vm0, %v2338_v62 }
 0xf5a   :  { %v2343_v43 = vld [vmem:[#allocation5] sm:$0xff] }
 0xf5b   :  { %2845 = vmatmul.mubr.msk.f32.vlgmr.msra.gmra.mxu1 %vm70_vm0, %v2343_v43 }
 0xf5c   :  { %2539 = vmatpush1.msra.mxu1 %v3877_v4  ;;  %2586 = vmatprep.mubr.f32.mxu1 %v4262_v48 }
 0xf5d   :  { %2540 = vmatprep.subr.mxu1 %v3881_v5 }
 0xf5e   :  { %2541 = vmatpush1.msra.mxu1 %v3884_v7  ;;  %v2344_v13 = vld [vmem:[#allocation6] sm:$0xff] }
 0xf5f   :  { %2542 = vmatprep.subr.mxu1 %v3887_v24  ;;  %2602 = vrot.lane.b32.xlu1 %v2344_v13, %s3096_s1 }
 0xf60   :  { %2543 = vmatpush1.msra.mxu1 %v3891_v9  ;;  %v2519_v14 = vpop.permute.xlu1 %2518 }
 0xf61   :  { %2544 = vmatprep.subr.mxu1 %v3894_v19  ;;  %2615 = vst.msk [vmem:[#allocation3] sm:$0xff] %vm70_vm0, %v2519_v14 }
 0xf62   :  { %2545 = vmatpush1.msra.mxu1 %v3898_v26 }
 0xf63   :  { %2546 = vmatprep.subr.mxu1 %v3901_v58 }
 0xf64   :  { %2547 = vmatpush1.msra.mxu1 %v3904_v56 }
 0xf65   :  { %2548 = vmatprep.subr.mxu1 %v3907_v55 }
 0xf66   :  { %2549 = vmatpush1.msra.mxu1 %v3911_v63 }
 0xf67   :  { %2550 = vmatprep.subr.mxu1 %v3914_v12 }
 0xf68   :  { %2551 = vmatpush1.msra.mxu1 %v3917_v60 }
 0xf69   :  { %2552 = vmatprep.subr.mxu1 %v3920_v59  ;;  %v2642_v59 = vld [vmem:[%s4201_s7 + $0x38] sm:$0xff] }
 0xf6a   :  { %2553 = vmatpush1.msra.mxu1 %v3923_v40  ;;  %2867 = vmatpush3.msra.mxu0 %v2642_v59  ;;  %v2639_v40 = vld [vmem:[%s4201_s7 + $0x20] sm:$0xff] }
 0xf6b   :  { %2847 = vmatmul.mubr.msk.f32.vlgmr.msra.gmra.mxu1 %vm70_vm0, %v2519_v14  ;;  %2885 = vmatprep.subr.mxu1 %v4262_v48 }
 0xf6c   :  { %2868 = vmatprep.subr.mxu0 %v4262_v48  ;;  %2893 = vmatprep.mubr.msk.f32.mxu1 %vm3097_vm2, %v4262_v48 }
 0xf6d   :  { %2886 = vmatpush3.msra.mxu1 %v2727_v20 }
 0xf6e   :  { %2887 = vmatprep.subr.mxu1 %v4262_v48 }
 0xf6f   :  { %2888 = vmatpush3.msra.mxu1 %v2726_v30 }
 0xf70   :  { %2889 = vmatprep.subr.mxu1 %v4262_v48 }
 0xf71   :  { %2890 = vmatpush3.msra.mxu1 %v2725_v32 }
 0xf72   :  { %2891 = vmatprep.subr.mxu1 %v4262_v48 }
 0xf73   :  { %2892 = vmatpush3.msra.mxu1 %v2724_v33 }
 0xfd1   :  { %v2603_v21 = vpop.permute.xlu1 %2602 }
0x101b   :  { %v2414_v4 = vpop.f32.mrf.mxu1 }
0x101d   :  { %v2416_v5 = vpop.f32.mrf.mxu1 }
0x102b   :  { %v2588_v7 = vpop.f32.mrf.mxu1 }
0x102c   :  { %v2589_v24 = vadd.f32 %v2588_v7, %v2414_v4 }
0x102d   :  { %v2590_v9 = vpop.f32.mrf.mxu1 }
0x102e   :  { %v2593_v19 = vadd.f32 %v2589_v24, %v3528_v16  ;;  %v2591_v26 = vadd.f32 %v2590_v9, %v2416_v5  ;;  %v2641_v16 = vld [vmem:[%s4201_s7 + $0x30] sm:$0xff] }
0x102f   :  { %2869 = vmatpush3.msra.mxu0 %v2641_v16 }
0x1030   :  { %2993 = vtanh.f32 %v2593_v19  ;;  %v2594_v58 = vadd.f32 %v2591_v26, %v3533_v41  ;;  %v2640_v41 = vld [vmem:[%s4201_s7 + $0x28] sm:$0xff]  ;;  %2870 = vmatprep.subr.mxu0 %v4262_v48 }
0x1031   :  { %2871 = vmatpush3.msra.mxu0 %v2640_v41 }
0x1032   :  { %2995 = vtanh.f32 %v2594_v58  ;;  %2872 = vmatprep.subr.mxu0 %v4262_v48 }
0x1033   :  { %2873 = vmatpush3.msra.mxu0 %v2639_v40 }
0x1034   :  { %2874 = vmatprep.subr.mxu0 %v4262_v48 }
0x1035   :  { %2875 = vmatpush3.msra.mxu0 %v2638_v50 }
0x1036   :  { %2876 = vmatprep.subr.mxu0 %v4262_v48 }
0x1037   :  { %2877 = vmatpush3.msra.mxu0 %v2637_v51 }
0x1038   :  { %2878 = vmatprep.subr.mxu0 %v4262_v48 }
0x1039   :  { %2879 = vmatpush3.msra.mxu0 %v2636_v53 }
0x103a   :  { %2880 = vmatprep.subr.mxu0 %v4262_v48 }
0x103b   :  { %2881 = vmatpush3.msra.mxu0 %v2635_v54 }
0x103d   :  { %v2994_v56 = vpop.eup %2993 }
0x103e   :  { %v2597_v55 = vmul.f32 0.5, %v2994_v56 }
0x103f   :  { %v2996_v12 = vpop.eup %2995 }
0x1040   :  { %v2598_v63 = vadd.f32 0.5, %v2597_v55  ;;  %v2599_v42 = vmul.f32 0.5, %v2996_v12 }
0x1042   :  { %v2606_v60 = vmul.f32 %v2996_v12, %v2598_v63  ;;  %v2605_v38 = vmul.f32 %v2603_v21, %v2598_v63  ;;  %v2600_v25 = vadd.f32 0.5, %v2599_v42 }
0x1044   :  { %2608 = vrot.lane.b32.xlu0 %v2606_v60, %s3096_s1 }
0x1048   :  { %2617 = vrot.lane.b32.xlu0 %v2514_v6, %s3096_s1 }
0x10b6   :  { %v2609_v39 = vpop.permute.xlu0 %2608 }
0x10b7   :  { %v2611_v46 = vadd.f32 %v2609_v39, %v2605_v38 }
0x10b9   :  { %2997 = vtanh.f32 %v2611_v46 }
0x10ba   :  { %v2618_v47 = vpop.permute.xlu0 %2617 }
0x10bb   :  { %2620 = vst.msk [vmem:[#allocation4] sm:$0xff] %vm70_vm0, %v2618_v47 }
0x10c6   :  { %v2998_v10 = vpop.eup %2997 }
0x10c7   :  { %v2613_v11 = vmul.f32 %v2998_v10, %v2600_v25 }
0x10c9   :  { %2622 = vrot.lane.b32.xlu1 %v2613_v11, %s3096_s1 }
0x10cd   :  { %2627 = vrot.lane.b32.xlu1 %v2611_v46, %s3096_s1 }
0x113b   :  { %v2623_v52 = vpop.permute.xlu1 %2622 }
0x113c   :  { %2625 = vst.msk [vmem:[#allocation5] sm:$0xff] %vm70_vm0, %v2623_v52 }
0x113f   :  { %v2628_v28 = vpop.permute.xlu1 %2627 }
0x1140   :  { %2630 = vst.msk [vmem:[#allocation6] sm:$0xff] %vm70_vm0, %v2628_v28 }
0x1143   :  { %v2634_v29 = vld [vmem:[#allocation5] sm:$0xff] }
0x1144   :  { %2883 = vmatmul.mubr.msk.f32.vlgmr.msra.gmra.mxu0 %vm70_vm0, %v2634_v29 }
0x1204   :  { %v2719_v35 = vpop.f32.mrf.mxu0 }
0x1205   :  { %v2720_v36 = vadd.f32 %v2848_v34, %v2719_v35 }
0x1206   :  { %v2884_v22 = vpop.f32.mrf.mxu0 }
0x1207   :  { %v2723_v17 = vmax.f32 %v2720_v36, 0.0 }
0x1209   :  { %2894 = vmatmul.mubr.msk.f32.vlgmr.msra.gmra.mxu1 %vm2735_vm3, %v2723_v17 }
0x12c9   :  { %v2805_v48 = vpop.f32.mrf.mxu1 }
0x12ca   :  { %v2806_v37 = vadd.f32 %v2850_v2, %v2805_v48 }
0x12cb   :  { %v2895_v0 = vpop.f32.mrf.mxu1 }
0x12cc   :  { %2809 = vst [vmem:[%s4205_s11] sm:$0xff] %v2806_v37 }
0x12cd   :  { %2814 = vsyncpa [#allocation8], 1 }
0x12ce   :  { %2815 = vsyncpa [#allocation10], 1 }

</bundles_post_ra>
